<compile_context>
chip_gen: v7x
topology: tpu7x:2x2x1
jax: 0.10.0
libtpu: 0.0.40
codegen_flags: <defaults>
</compile_context>

<pallas_src>
import functools

import jax
import jax.numpy as jnp
from jax.experimental import pallas as pl
from jax.experimental.pallas import tpu as pltpu

LN_EPS = 1e-5


def _layernorm(h, gamma, beta):
    # LayerNorm over last axis, matching torch.nn.LayerNorm (biased variance,
    # eps inside rsqrt). All in f32.
    mu = jnp.mean(h, axis=-1, keepdims=True)
    var = jnp.mean((h - mu) ** 2, axis=-1, keepdims=True)
    return (h - mu) * jax.lax.rsqrt(var + LN_EPS) * gamma + beta


def _ln_relu(h, p):
    # p is a packed (3, D) f32 block: row 0 = bias, row 1 = gamma, row 2 = beta.
    h = h + p[0:1, :]
    h = _layernorm(h, p[1:2, :], p[2:3, :])
    return jnp.maximum(h, 0.0)


def dnn_kernel(
    x_ref,                      # (tile_b, D0)  bf16
    w1_ref, p1_ref,             # (D0, D1) bf16, (3, D1) f32
    w2_ref, p2_ref,             # (D1, D2) bf16, (3, D2) f32
    w3_ref, p3_ref,             # (D2, D3) bf16, (3, D3) f32
    w4_ref,                     # (1, D3)  f32
    b4_ref,                     # (1, 1)   f32 in SMEM
    out_ref,                    # (tile_b, 1) f32
):
    # Block 1: bf16 matmul on the MXU, f32 accumulate, f32 LN/ReLU on the VPU.
    h = jnp.dot(x_ref[...], w1_ref[...], preferred_element_type=jnp.float32)
    h = _ln_relu(h, p1_ref[...])

    # Block 2
    h = jnp.dot(h.astype(jnp.bfloat16), w2_ref[...],
                preferred_element_type=jnp.float32)
    h = _ln_relu(h, p2_ref[...])

    # Block 3
    h = jnp.dot(h.astype(jnp.bfloat16), w3_ref[...],
                preferred_element_type=jnp.float32)
    h = _ln_relu(h, p3_ref[...])

    # Output Linear(D3 -> 1): VPU multiply + cross-lane (XLU) reduce instead of
    # an N=1 MXU matmul.
    out = jnp.sum(h * w4_ref[...], axis=-1, keepdims=True) + b4_ref[0, 0]
    out_ref[...] = out.astype(out_ref.dtype)


@functools.partial(jax.jit, static_argnames=("tile_b",))
def dnn_forward(x, params, tile_b=256):
    """x: [B, input_dim] f32. params: dict produced by init_params."""
    B, D0 = x.shape
    w1, w2, w3 = params["w1"], params["w2"], params["w3"]
    p1, p2, p3 = params["p1"], params["p2"], params["p3"]
    w4_row, b4 = params["w4_row"], params["b4"]
    D1, D2, D3 = w1.shape[1], w2.shape[1], w3.shape[1]
    Dout = 1

    # Pad batch to a multiple of tile_b, slice back at the end.
    B_pad = pl.cdiv(B, tile_b) * tile_b
    if B_pad != B:
        x = jnp.pad(x, ((0, B_pad - B), (0, 0)))
    x = x.astype(jnp.bfloat16)          # half the HBM->VMEM bytes for x tiles

    grid = (B_pad // tile_b,)

    def resident(arr):
        # Whole-array block, constant index -> stays resident across the grid.
        return pl.BlockSpec(arr.shape, lambda i: (0, 0))

    in_specs = [
        pl.BlockSpec((tile_b, D0), lambda i: (i, 0)),       # x tile
        resident(w1), resident(p1),
        resident(w2), resident(p2),
        resident(w3), resident(p3),
        resident(w4_row),
        pl.BlockSpec(memory_space=pltpu.MemorySpace.SMEM),  # b4 scalar
    ]
    out_specs = pl.BlockSpec((tile_b, Dout), lambda i: (i, 0))

    flops = 2 * B_pad * (D0 * D1 + D1 * D2 + D2 * D3 + D3 * Dout)
    transcendentals = 3 * B_pad  # one rsqrt per row per LayerNorm
    bytes_accessed = (
        x.size * x.dtype.itemsize
        + sum(int(a.size) * a.dtype.itemsize
              for a in (w1, p1, w2, p2, w3, p3, w4_row, b4))
        + B_pad * Dout * 4
    )

    out = pl.pallas_call(
        dnn_kernel,
        out_shape=jax.ShapeDtypeStruct((B_pad, Dout), jnp.float32),
        grid_spec=pltpu.PrefetchScalarGridSpec(
            num_scalar_prefetch=0,
            grid=grid,
            in_specs=in_specs,
            out_specs=out_specs,
        ),
        compiler_params=pltpu.CompilerParams(
            dimension_semantics=("parallel",),   # megacore split on v7x
            vmem_limit_bytes=32 * 1024 * 1024,
        ),
        cost_estimate=pl.CostEstimate(
            flops=flops,
            transcendentals=transcendentals,
            bytes_accessed=bytes_accessed,
        ),
    )(x, w1, p1, w2, p2, w3, p3, w4_row, b4)

    return out[:B]


def init_params(key, dims):
    """Deterministic init matching the PyTorch module.

    Linear weights: kaiming_normal_(fan_in, relu) -> std = sqrt(2 / fan_in),
    stored transposed [in, out] (bf16 for the three MXU layers).
    Linear biases:  PyTorch default uniform(-1/sqrt(fan_in), 1/sqrt(fan_in)).
    LayerNorm:      gamma = 1, beta = 0.  bias/gamma/beta packed as (3, D) f32.
    Final layer:    weight kept as an f32 row (1, D3) + scalar bias (1, 1).
    """
    d0, d1, d2, d3, dout = dims
    assert dout == 1
    params = {}
    sizes = [(d0, d1), (d1, d2), (d2, d3), (d3, dout)]
    for idx, (fan_in, fan_out) in enumerate(sizes, start=1):
        key, kw, kb = jax.random.split(key, 3)
        std = (2.0 / fan_in) ** 0.5
        w = std * jax.random.normal(kw, (fan_in, fan_out), dtype=jnp.float32)
        bound = 1.0 / (fan_in ** 0.5)
        b = jax.random.uniform(
            kb, (1, fan_out), minval=-bound, maxval=bound, dtype=jnp.float32
        )
        if idx <= 3:
            params[f"w{idx}"] = w.astype(jnp.bfloat16)
            g = jnp.ones((1, fan_out), dtype=jnp.float32)
            be = jnp.zeros((1, fan_out), dtype=jnp.float32)
            params[f"p{idx}"] = jnp.concatenate([b, g, be], axis=0)  # (3, D)
        else:
            params["w4_row"] = w.T.astype(jnp.float32)   # (1, d3)
            params["b4"] = b                             # (1, 1)
    return params


def dnn_reference(x, params):
    # Pure-JAX reference using the same bf16-in / f32-accumulate precision.
    h = x
    for k in (1, 2, 3):
        w = params[f"w{k}"]
        p = params[f"p{k}"]
        h = jnp.dot(h.astype(jnp.bfloat16), w,
                    preferred_element_type=jnp.float32) + p[0:1, :]
        h = _layernorm(h, p[1:2, :], p[2:3, :])
        h = jnp.maximum(h, 0.0)
    return jnp.sum(h * params["w4_row"], axis=-1, keepdims=True) + params["b4"]


if __name__ == "__main__":
    # Small, lane-dense shapes consistent with the module (4-layer MLP),
    # batch chosen so tile_b=256 gives a grid of 2 (both v7x cores busy).
    BATCH = 512
    DIMS = (512, 256, 256, 128, 1)   # input, hidden1, hidden2, hidden3, output
    TILE_B = 256

    key = jax.random.PRNGKey(0)
    key, kx = jax.random.split(key)
    x = jax.random.normal(kx, (BATCH, DIMS[0]), dtype=jnp.float32)
    params = init_params(key, DIMS)

    out = dnn_forward(x, params, tile_b=TILE_B)
    out = jax.block_until_ready(out)

    ref = dnn_reference(x, params)
    assert out.shape == (BATCH, DIMS[-1])
    assert jnp.allclose(out, ref, atol=5e-3, rtol=5e-3), "mismatch vs JAX reference"

    print("KERNEL_OK")
</pallas_src>

<mosaic_0001>
module attributes {stable_mosaic.version = 11 : i64} {
  func.func @dnn_kernel(%arg0: i32, %arg1: memref<256x512xbf16, #tpu.memory_space<vmem>>, %arg2: memref<512x256xbf16, #tpu.memory_space<vmem>>, %arg3: memref<3x256xf32, #tpu.memory_space<vmem>>, %arg4: memref<256x256xbf16, #tpu.memory_space<vmem>>, %arg5: memref<3x256xf32, #tpu.memory_space<vmem>>, %arg6: memref<256x128xbf16, #tpu.memory_space<vmem>>, %arg7: memref<3x128xf32, #tpu.memory_space<vmem>>, %arg8: memref<1x128xf32, #tpu.memory_space<vmem>>, %arg9: memref<1x1xf32, #tpu.memory_space<smem>>, %arg10: memref<256x1xf32, #tpu.memory_space<vmem>>) attributes {dimension_semantics = [#tpu.dimension_semantics<parallel>], iteration_bounds = array<i64: 2>, scalar_prefetch = 0 : i64, scratch_operands = 0 : i64, tpu.core_type = #tpu.core_type<tc>, window_params = [{transform_indices = @transform_0, window_bounds = array<i64: 256, 512>}, {pipeline_mode = #tpu.pipeline_mode<synchronous>, transform_indices = @transform_1, window_bounds = array<i64: 512, 256>}, {pipeline_mode = #tpu.pipeline_mode<synchronous>, transform_indices = @transform_2, window_bounds = array<i64: 3, 256>}, {pipeline_mode = #tpu.pipeline_mode<synchronous>, transform_indices = @transform_3, window_bounds = array<i64: 256, 256>}, {pipeline_mode = #tpu.pipeline_mode<synchronous>, transform_indices = @transform_4, window_bounds = array<i64: 3, 256>}, {pipeline_mode = #tpu.pipeline_mode<synchronous>, transform_indices = @transform_5, window_bounds = array<i64: 256, 128>}, {pipeline_mode = #tpu.pipeline_mode<synchronous>, transform_indices = @transform_6, window_bounds = array<i64: 3, 128>}, {pipeline_mode = #tpu.pipeline_mode<synchronous>, transform_indices = @transform_7, window_bounds = array<i64: 1, 128>}, {transform_indices = @transform_8, window_bounds = array<i64: 1, 1>}, {transform_indices = @transform_9, window_bounds = array<i64: 256, 1>}]} {
    %c0 = arith.constant 0 : index
    %c0_0 = arith.constant 0 : index
    %0 = vector.load %arg1[%c0, %c0_0] : memref<256x512xbf16, #tpu.memory_space<vmem>>, vector<256x512xbf16>
    %c0_1 = arith.constant 0 : index
    %c0_2 = arith.constant 0 : index
    %1 = vector.load %arg2[%c0_1, %c0_2] : memref<512x256xbf16, #tpu.memory_space<vmem>>, vector<512x256xbf16>
    %cst = arith.constant dense<0.000000e+00> : vector<256x256xf32>
    %2 = tpu.matmul %0, %1, %cst {dimension_numbers = #tpu.dot_dimension_numbers<[1], [0], [0], [1], [0, 0, 1, 1], [], []>} : vector<256x512xbf16>, vector<512x256xbf16>, vector<256x256xf32> -> vector<256x256xf32>
    %c0_3 = arith.constant 0 : index
    %c0_4 = arith.constant 0 : index
    %3 = vector.load %arg3[%c0_3, %c0_4] : memref<3x256xf32, #tpu.memory_space<vmem>>, vector<3x256xf32>
    %4 = vector.extract_strided_slice %3 {offsets = [0, 0], sizes = [1, 256], strides = [1, 1]} : vector<3x256xf32> to vector<1x256xf32>
    %5 = vector.broadcast %4 : vector<1x256xf32> to vector<256x256xf32>
    %6 = arith.addf %2, %5 : vector<256x256xf32>
    %7 = vector.extract_strided_slice %3 {offsets = [1, 0], sizes = [1, 256], strides = [1, 1]} : vector<3x256xf32> to vector<1x256xf32>
    %8 = vector.extract_strided_slice %3 {offsets = [2, 0], sizes = [1, 256], strides = [1, 1]} : vector<3x256xf32> to vector<1x256xf32>
    %cst_5 = arith.constant dense<0.000000e+00> : vector<256xf32>
    %9 = vector.multi_reduction <add>, %6, %cst_5 [1] : vector<256x256xf32> to vector<256xf32>
    %10 = vector.shape_cast %9 : vector<256xf32> to vector<256x1xf32>
    %cst_6 = arith.constant 2.560000e+02 : f32
    %11 = vector.broadcast %cst_6 : f32 to vector<256x1xf32>
    %12 = arith.divf %10, %11 : vector<256x1xf32>
    %13 = vector.broadcast %12 : vector<256x1xf32> to vector<256x256xf32>
    %14 = arith.subf %6, %13 : vector<256x256xf32>
    %15 = arith.mulf %14, %14 : vector<256x256xf32>
    %cst_7 = arith.constant dense<0.000000e+00> : vector<256xf32>
    %16 = vector.multi_reduction <add>, %15, %cst_7 [1] : vector<256x256xf32> to vector<256xf32>
    %17 = vector.shape_cast %16 : vector<256xf32> to vector<256x1xf32>
    %cst_8 = arith.constant 2.560000e+02 : f32
    %18 = vector.broadcast %cst_8 : f32 to vector<256x1xf32>
    %19 = arith.divf %17, %18 : vector<256x1xf32>
    %20 = vector.broadcast %12 : vector<256x1xf32> to vector<256x256xf32>
    %21 = arith.subf %6, %20 : vector<256x256xf32>
    %cst_9 = arith.constant 9.99999974E-6 : f32
    %22 = vector.broadcast %cst_9 : f32 to vector<256x1xf32>
    %23 = arith.addf %19, %22 : vector<256x1xf32>
    %24 = math.rsqrt %23 : vector<256x1xf32>
    %25 = vector.broadcast %24 : vector<256x1xf32> to vector<256x256xf32>
    %26 = arith.mulf %21, %25 : vector<256x256xf32>
    %27 = vector.broadcast %7 : vector<1x256xf32> to vector<256x256xf32>
    %28 = arith.mulf %26, %27 : vector<256x256xf32>
    %29 = vector.broadcast %8 : vector<1x256xf32> to vector<256x256xf32>
    %30 = arith.addf %28, %29 : vector<256x256xf32>
    %cst_10 = arith.constant 0.000000e+00 : f32
    %31 = vector.broadcast %cst_10 : f32 to vector<256x256xf32>
    %32 = arith.maximumf %30, %31 : vector<256x256xf32>
    %33 = arith.truncf %32 : vector<256x256xf32> to vector<256x256xbf16>
    %c0_11 = arith.constant 0 : index
    %c0_12 = arith.constant 0 : index
    %34 = vector.load %arg4[%c0_11, %c0_12] : memref<256x256xbf16, #tpu.memory_space<vmem>>, vector<256x256xbf16>
    %cst_13 = arith.constant dense<0.000000e+00> : vector<256x256xf32>
    %35 = tpu.matmul %33, %34, %cst_13 {dimension_numbers = #tpu.dot_dimension_numbers<[1], [0], [0], [1], [0, 0, 1, 1], [], []>} : vector<256x256xbf16>, vector<256x256xbf16>, vector<256x256xf32> -> vector<256x256xf32>
    %c0_14 = arith.constant 0 : index
    %c0_15 = arith.constant 0 : index
    %36 = vector.load %arg5[%c0_14, %c0_15] : memref<3x256xf32, #tpu.memory_space<vmem>>, vector<3x256xf32>
    %37 = vector.extract_strided_slice %36 {offsets = [0, 0], sizes = [1, 256], strides = [1, 1]} : vector<3x256xf32> to vector<1x256xf32>
    %38 = vector.broadcast %37 : vector<1x256xf32> to vector<256x256xf32>
    %39 = arith.addf %35, %38 : vector<256x256xf32>
    %40 = vector.extract_strided_slice %36 {offsets = [1, 0], sizes = [1, 256], strides = [1, 1]} : vector<3x256xf32> to vector<1x256xf32>
    %41 = vector.extract_strided_slice %36 {offsets = [2, 0], sizes = [1, 256], strides = [1, 1]} : vector<3x256xf32> to vector<1x256xf32>
    %cst_16 = arith.constant dense<0.000000e+00> : vector<256xf32>
    %42 = vector.multi_reduction <add>, %39, %cst_16 [1] : vector<256x256xf32> to vector<256xf32>
    %43 = vector.shape_cast %42 : vector<256xf32> to vector<256x1xf32>
    %cst_17 = arith.constant 2.560000e+02 : f32
    %44 = vector.broadcast %cst_17 : f32 to vector<256x1xf32>
    %45 = arith.divf %43, %44 : vector<256x1xf32>
    %46 = vector.broadcast %45 : vector<256x1xf32> to vector<256x256xf32>
    %47 = arith.subf %39, %46 : vector<256x256xf32>
    %48 = arith.mulf %47, %47 : vector<256x256xf32>
    %cst_18 = arith.constant dense<0.000000e+00> : vector<256xf32>
    %49 = vector.multi_reduction <add>, %48, %cst_18 [1] : vector<256x256xf32> to vector<256xf32>
    %50 = vector.shape_cast %49 : vector<256xf32> to vector<256x1xf32>
    %cst_19 = arith.constant 2.560000e+02 : f32
    %51 = vector.broadcast %cst_19 : f32 to vector<256x1xf32>
    %52 = arith.divf %50, %51 : vector<256x1xf32>
    %53 = vector.broadcast %45 : vector<256x1xf32> to vector<256x256xf32>
    %54 = arith.subf %39, %53 : vector<256x256xf32>
    %cst_20 = arith.constant 9.99999974E-6 : f32
    %55 = vector.broadcast %cst_20 : f32 to vector<256x1xf32>
    %56 = arith.addf %52, %55 : vector<256x1xf32>
    %57 = math.rsqrt %56 : vector<256x1xf32>
    %58 = vector.broadcast %57 : vector<256x1xf32> to vector<256x256xf32>
    %59 = arith.mulf %54, %58 : vector<256x256xf32>
    %60 = vector.broadcast %40 : vector<1x256xf32> to vector<256x256xf32>
    %61 = arith.mulf %59, %60 : vector<256x256xf32>
    %62 = vector.broadcast %41 : vector<1x256xf32> to vector<256x256xf32>
    %63 = arith.addf %61, %62 : vector<256x256xf32>
    %cst_21 = arith.constant 0.000000e+00 : f32
    %64 = vector.broadcast %cst_21 : f32 to vector<256x256xf32>
    %65 = arith.maximumf %63, %64 : vector<256x256xf32>
    %66 = arith.truncf %65 : vector<256x256xf32> to vector<256x256xbf16>
    %c0_22 = arith.constant 0 : index
    %c0_23 = arith.constant 0 : index
    %67 = vector.load %arg6[%c0_22, %c0_23] : memref<256x128xbf16, #tpu.memory_space<vmem>>, vector<256x128xbf16>
    %cst_24 = arith.constant dense<0.000000e+00> : vector<256x128xf32>
    %68 = tpu.matmul %66, %67, %cst_24 {dimension_numbers = #tpu.dot_dimension_numbers<[1], [0], [0], [1], [0, 0, 1, 1], [], []>} : vector<256x256xbf16>, vector<256x128xbf16>, vector<256x128xf32> -> vector<256x128xf32>
    %c0_25 = arith.constant 0 : index
    %c0_26 = arith.constant 0 : index
    %69 = vector.load %arg7[%c0_25, %c0_26] : memref<3x128xf32, #tpu.memory_space<vmem>>, vector<3x128xf32>
    %70 = vector.extract_strided_slice %69 {offsets = [0, 0], sizes = [1, 128], strides = [1, 1]} : vector<3x128xf32> to vector<1x128xf32>
    %71 = vector.broadcast %70 : vector<1x128xf32> to vector<256x128xf32>
    %72 = arith.addf %68, %71 : vector<256x128xf32>
    %73 = vector.extract_strided_slice %69 {offsets = [1, 0], sizes = [1, 128], strides = [1, 1]} : vector<3x128xf32> to vector<1x128xf32>
    %74 = vector.extract_strided_slice %69 {offsets = [2, 0], sizes = [1, 128], strides = [1, 1]} : vector<3x128xf32> to vector<1x128xf32>
    %cst_27 = arith.constant dense<0.000000e+00> : vector<256xf32>
    %75 = vector.multi_reduction <add>, %72, %cst_27 [1] : vector<256x128xf32> to vector<256xf32>
    %76 = vector.shape_cast %75 : vector<256xf32> to vector<256x1xf32>
    %cst_28 = arith.constant 1.280000e+02 : f32
    %77 = vector.broadcast %cst_28 : f32 to vector<256x1xf32>
    %78 = arith.divf %76, %77 : vector<256x1xf32>
    %79 = vector.broadcast %78 : vector<256x1xf32> to vector<256x128xf32>
    %80 = arith.subf %72, %79 : vector<256x128xf32>
    %81 = arith.mulf %80, %80 : vector<256x128xf32>
    %cst_29 = arith.constant dense<0.000000e+00> : vector<256xf32>
    %82 = vector.multi_reduction <add>, %81, %cst_29 [1] : vector<256x128xf32> to vector<256xf32>
    %83 = vector.shape_cast %82 : vector<256xf32> to vector<256x1xf32>
    %cst_30 = arith.constant 1.280000e+02 : f32
    %84 = vector.broadcast %cst_30 : f32 to vector<256x1xf32>
    %85 = arith.divf %83, %84 : vector<256x1xf32>
    %86 = vector.broadcast %78 : vector<256x1xf32> to vector<256x128xf32>
    %87 = arith.subf %72, %86 : vector<256x128xf32>
    %cst_31 = arith.constant 9.99999974E-6 : f32
    %88 = vector.broadcast %cst_31 : f32 to vector<256x1xf32>
    %89 = arith.addf %85, %88 : vector<256x1xf32>
    %90 = math.rsqrt %89 : vector<256x1xf32>
    %91 = vector.broadcast %90 : vector<256x1xf32> to vector<256x128xf32>
    %92 = arith.mulf %87, %91 : vector<256x128xf32>
    %93 = vector.broadcast %73 : vector<1x128xf32> to vector<256x128xf32>
    %94 = arith.mulf %92, %93 : vector<256x128xf32>
    %95 = vector.broadcast %74 : vector<1x128xf32> to vector<256x128xf32>
    %96 = arith.addf %94, %95 : vector<256x128xf32>
    %cst_32 = arith.constant 0.000000e+00 : f32
    %97 = vector.broadcast %cst_32 : f32 to vector<256x128xf32>
    %98 = arith.maximumf %96, %97 : vector<256x128xf32>
    %c0_33 = arith.constant 0 : index
    %c0_34 = arith.constant 0 : index
    %99 = vector.load %arg8[%c0_33, %c0_34] : memref<1x128xf32, #tpu.memory_space<vmem>>, vector<1x128xf32>
    %100 = vector.broadcast %99 : vector<1x128xf32> to vector<256x128xf32>
    %101 = arith.mulf %98, %100 : vector<256x128xf32>
    %cst_35 = arith.constant dense<0.000000e+00> : vector<256xf32>
    %102 = vector.multi_reduction <add>, %101, %cst_35 [1] : vector<256x128xf32> to vector<256xf32>
    %103 = vector.shape_cast %102 : vector<256xf32> to vector<256x1xf32>
    %c0_36 = arith.constant 0 : index
    %c0_37 = arith.constant 0 : index
    %104 = memref.load %arg9[%c0_36, %c0_37] : memref<1x1xf32, #tpu.memory_space<smem>>
    %105 = vector.broadcast %104 : f32 to vector<256x1xf32>
    %106 = arith.addf %103, %105 : vector<256x1xf32>
    %c0_38 = arith.constant 0 : index
    %c0_39 = arith.constant 0 : index
    %107 = vector.load %arg10[%c0_38, %c0_39] : memref<256x1xf32, #tpu.memory_space<vmem>>, vector<256x1xf32>
    tpu.vector_store %arg10[%c0_38, %c0_39], %106 {strides = array<i32>} : memref<256x1xf32, #tpu.memory_space<vmem>>, vector<256x1xf32>,
    return
  }
  func.func @transform_0(%arg0: i32) -> (i32, i32) {
    %c0_i32 = arith.constant 0 : i32
    %c0_i32_0 = arith.constant 0 : i32
    return %arg0, %c0_i32 : i32, i32
  }
  func.func @transform_1(%arg0: i32) -> (i32, i32) {
    %c0_i32 = arith.constant 0 : i32
    %c0_i32_0 = arith.constant 0 : i32
    %c0_i32_1 = arith.constant 0 : i32
    return %c0_i32, %c0_i32_0 : i32, i32
  }
  func.func @transform_2(%arg0: i32) -> (i32, i32) {
    %c0_i32 = arith.constant 0 : i32
    %c0_i32_0 = arith.constant 0 : i32
    %c0_i32_1 = arith.constant 0 : i32
    return %c0_i32, %c0_i32_0 : i32, i32
  }
  func.func @transform_3(%arg0: i32) -> (i32, i32) {
    %c0_i32 = arith.constant 0 : i32
    %c0_i32_0 = arith.constant 0 : i32
    %c0_i32_1 = arith.constant 0 : i32
    return %c0_i32, %c0_i32_0 : i32, i32
  }
  func.func @transform_4(%arg0: i32) -> (i32, i32) {
    %c0_i32 = arith.constant 0 : i32
    %c0_i32_0 = arith.constant 0 : i32
    %c0_i32_1 = arith.constant 0 : i32
    return %c0_i32, %c0_i32_0 : i32, i32
  }
  func.func @transform_5(%arg0: i32) -> (i32, i32) {
    %c0_i32 = arith.constant 0 : i32
    %c0_i32_0 = arith.constant 0 : i32
    %c0_i32_1 = arith.constant 0 : i32
    return %c0_i32, %c0_i32_0 : i32, i32
  }
  func.func @transform_6(%arg0: i32) -> (i32, i32) {
    %c0_i32 = arith.constant 0 : i32
    %c0_i32_0 = arith.constant 0 : i32
    %c0_i32_1 = arith.constant 0 : i32
    return %c0_i32, %c0_i32_0 : i32, i32
  }
  func.func @transform_7(%arg0: i32) -> (i32, i32) {
    %c0_i32 = arith.constant 0 : i32
    %c0_i32_0 = arith.constant 0 : i32
    %c0_i32_1 = arith.constant 0 : i32
    return %c0_i32, %c0_i32_0 : i32, i32
  }
  func.func @transform_8(%arg0: i32) -> (i32, i32) {
    %c0_i32 = arith.constant 0 : i32
    %c0_i32_0 = arith.constant 0 : i32
    %c0_i32_1 = arith.constant 0 : i32
    return %c0_i32, %c0_i32_0 : i32, i32
  }
  func.func @transform_9(%arg0: i32) -> (i32, i32) {
    %c0_i32 = arith.constant 0 : i32
    %c0_i32_0 = arith.constant 0 : i32
    return %arg0, %c0_i32 : i32, i32
  }
}

</mosaic_0001>

<bundles_post_ra>
// kernel: dnn_forward.1
= control target key start
LH: loop header
LB: loop body
LE: loop exit
PB: predicated region body
PF: predicated region fallthrough
CT: control target
= control target key end

     0   :  { %s5389_s11 = smov 0   ;;  %s8036_s0 = inlined_call_operand.vmem [shape: bf16[512,512], index: 0, kind: input, shape index: {}]   ;;  %s8037_s1 = inlined_call_operand.vmem [shape: bf16[512,256], index: 1, kind: input, shape index: {}]   ;;  %s8038_s2 = inlined_call_operand.vmem [shape: f32[3,256], index: 2, kind: input, shape index: {}]   ;;  %s8039_s3 = inlined_call_operand.vmem [shape: bf16[256,256], index: 3, kind: input, shape index: {}]   ;;  %s8040_s4 = inlined_call_operand.vmem [shape: f32[3,256], index: 4, kind: input, shape index: {}]   ;;  %s8041_s5 = inlined_call_operand.vmem [shape: bf16[256,128], index: 5, kind: input, shape index: {}]   ;;  %s8042_s6 = inlined_call_operand.vmem [shape: f32[3,128], index: 6, kind: input, shape index: {}]   ;;  %s8043_s7 = inlined_call_operand.vmem [shape: f32[1,128], index: 7, kind: input, shape index: {}]   ;;  %s8044_s8 = inlined_call_operand.<no memory space> [shape: f32[1,1], index: 8, kind: input, shape index: {}]   ;;  %s8045_s9 = inlined_call_operand.vmem [shape: f32[512,1], index: 9, kind: output, shape index: {}]  }
   0x1   :  { %14 = sst [smem:[#allocation2]] %s8044_s8 }
   0x2 LB: > { %s4442_s12 = sadd.s32 4294967295, %s5334_s11   ;;  %p4446_p0 = scmp.ge.s32.totalorder %s5334_s11, 1  ;;  %s5334_s11 = sphi %s5389_s11, %s20_s11  }
   0x3   : > { %p290_p1 = scmp.lt.s32.totalorder %s5334_s11, 3 }
   0x5   : > { %p291_p2 = pnand %p4446_p0, %p290_p1 }
   0x7   : > { %294 = sbr.rel (%p291_p2) target bundleno = 2153 (0x869), region = 56 }
   0xe   : > { %v4880_v0 = vld [vmem:[%s8037_s1 + $0x4] ss:$8 sps:$4 sm:$0xff]   ;;  %v4882_v1 = vld [vmem:[%s8037_s1] ss:$8 sps:$4 sm:$0xff]   ;;  %v4883_v2 = vld [vmem:[%s8037_s1 + $0x14] ss:$8 sps:$4 sm:$0xff]  }
   0xf   : > { %1129 = vmatprep.subr.bf16.mxu0 %v4880_v0  ;;  %v4885_v3 = vld [vmem:[%s8037_s1 + $0x10] ss:$8 sps:$4 sm:$0xff]   ;;  %v4886_v4 = vld [vmem:[%s8037_s1 + $0x24] ss:$8 sps:$4 sm:$0xff]   ;;  %s4447_s22 = sshll.u32 %s4442_s12, 5  ;;  %s4319_s13 = sld [smem:[#allocation2]] }
  0x10   : > { %1130 = vmatpush1.bf16.msra.mxu0 %v4882_v1  ;;  %v4888_v5 = vld [vmem:[%s8037_s1 + $0x20] ss:$8 sps:$4 sm:$0xff]   ;;  %v4889_v6 = vld [vmem:[%s8037_s1 + $0x34] ss:$8 sps:$4 sm:$0xff]   ;;  %p328_p3 = scmp.lt.s32.totalorder %s4447_s22, 63  ;;  %vm4353_vm0 = vcmask 7168  }
  0x11   : > { %1131 = vmatprep.subr.bf16.mxu0 %v4883_v2  ;;  %v4891_v7 = vld [vmem:[%s8037_s1 + $0x30] ss:$8 sps:$4 sm:$0xff]   ;;  %v4892_v8 = vld [vmem:[%s8037_s1 + $0x44] ss:$8 sps:$4 sm:$0xff]   ;;  %v4894_v9 = vld [vmem:[%s8037_s1 + $0x40] ss:$8 sps:$4 sm:$0xff]  }
  0x12   : > { %s8276_s22 = smov (!%p328_p3, %s4447_s22), 63  ;;  %v4895_v10 = vld [vmem:[%s8037_s1 + $0x54] ss:$8 sps:$4 sm:$0xff]   ;;  %v4897_v11 = vld [vmem:[%s8037_s1 + $0x50] ss:$8 sps:$4 sm:$0xff]  }
  0x13   : > { %s4631_s8 = sshll.u32 %s8276_s22, 4  ;;  %v4898_v12 = vld [vmem:[%s8037_s1 + $0x64] ss:$8 sps:$4 sm:$0xff]   ;;  %v4900_v14 = vld [vmem:[%s8037_s1 + $0x60] ss:$8 sps:$4 sm:$0xff]   ;;  %s4451_s14 = sshll.u32 %s8276_s22, 3 }
  0x14   : > { %1132 = vmatpush1.bf16.msra.mxu0 %v4885_v3  ;;  %s5439_s19 = scalar_lea.vmem %s8036_s0, %s4631_s8  ;;  %v4901_v15 = vld [vmem:[%s8037_s1 + $0x74] ss:$8 sps:$4 sm:$0xff]   ;;  %v4903_v16 = vld [vmem:[%s8037_s1 + $0x70] ss:$8 sps:$4 sm:$0xff]   ;;  %v4904_v17 = vld [vmem:[%s8037_s1 + $0x84] ss:$8 sps:$4 sm:$0xff]   ;;  %s7933_s16 = scalar_lea.vmem %s8045_s9, %s4451_s14 }
  0x15   : > { %1133 = vmatprep.subr.bf16.mxu0 %v4886_v4  ;;  %v4930_v13 = vld [vmem:[%s5439_s19 + $0x4] ss:$16 sps:$4 sm:$0xff]   ;;  %v4906_v18 = vld [vmem:[%s8037_s1 + $0x80] ss:$8 sps:$4 sm:$0xff]   ;;  %v4909_v20 = vld [vmem:[%s8037_s1 + $0x90] ss:$8 sps:$4 sm:$0xff]  }
  0x16   : > { %1161 = vmatprep.mubr.bf16.mxu0 %v4930_v13  ;;  %v4907_v19 = vld [vmem:[%s8037_s1 + $0x94] ss:$8 sps:$4 sm:$0xff]   ;;  %v4910_v21 = vld [vmem:[%s8037_s1 + $0xa4] ss:$8 sps:$4 sm:$0xff]   ;;  %v4912_v22 = vld [vmem:[%s8037_s1 + $0xa0] ss:$8 sps:$4 sm:$0xff]  }
  0x17   : > { %v4913_v23 = vld [vmem:[%s8037_s1 + $0xb4] ss:$8 sps:$4 sm:$0xff]   ;;  %v4915_v24 = vld [vmem:[%s8037_s1 + $0xb0] ss:$8 sps:$4 sm:$0xff]   ;;  %v4916_v25 = vld [vmem:[%s8037_s1 + $0xc4] ss:$8 sps:$4 sm:$0xff]  }
  0x18   : > { %1134 = vmatpush1.bf16.msra.mxu0 %v4888_v5  ;;  %v4918_v26 = vld [vmem:[%s8037_s1 + $0xc0] ss:$8 sps:$4 sm:$0xff]   ;;  %v4919_v27 = vld [vmem:[%s8037_s1 + $0xd4] ss:$8 sps:$4 sm:$0xff]   ;;  %v4921_v28 = vld [vmem:[%s8037_s1 + $0xd0] ss:$8 sps:$4 sm:$0xff]  }
  0x19   : > { %1135 = vmatprep.subr.bf16.mxu0 %v4889_v6  ;;  %v4922_v29 = vld [vmem:[%s8037_s1 + $0xe4] ss:$8 sps:$4 sm:$0xff]   ;;  %v4924_v30 = vld [vmem:[%s8037_s1 + $0xe0] ss:$8 sps:$4 sm:$0xff]   ;;  %v4925_v31 = vld [vmem:[%s8037_s1 + $0xf4] ss:$8 sps:$4 sm:$0xff]  }
  0x1a   : > { %v4927_v32 = vld [vmem:[%s8037_s1 + $0xf0] ss:$8 sps:$4 sm:$0xff]   ;;  %v4933_v33 = vld [vmem:[%s8037_s1 + $0x104] ss:$8 sps:$4 sm:$0xff]   ;;  %v4931_v35 = vld [vmem:[%s8037_s1 + $0x100] ss:$8 sps:$4 sm:$0xff]  }
  0x1b   : > { %v4928_v34 = vld [vmem:[%s5439_s19] ss:$16 sps:$4 sm:$0xff]   ;;  %v4934_v36 = vld [vmem:[%s5439_s19 + $0x24] ss:$16 sps:$4 sm:$0xff]  }
  0x1c   : > { %1136 = vmatpush1.bf16.msra.mxu0 %v4891_v7  ;;  %v4939_v37 = vld [vmem:[%s8037_s1 + $0x114] ss:$8 sps:$4 sm:$0xff]   ;;  %v4937_v38 = vld [vmem:[%s8037_s1 + $0x110] ss:$8 sps:$4 sm:$0xff]   ;;  %v4945_v39 = vld [vmem:[%s8037_s1 + $0x124] ss:$8 sps:$4 sm:$0xff]  }
  0x1d   : > { %1137 = vmatprep.subr.bf16.mxu0 %v4892_v8  ;;  %v4936_v40 = vld [vmem:[%s5439_s19 + $0x20] ss:$16 sps:$4 sm:$0xff]   ;;  %v4940_v41 = vld [vmem:[%s5439_s19 + $0x44] ss:$16 sps:$4 sm:$0xff]  }
  0x1e   : > { %v4943_v42 = vld [vmem:[%s8037_s1 + $0x120] ss:$8 sps:$4 sm:$0xff]   ;;  %v4951_v43 = vld [vmem:[%s8037_s1 + $0x134] ss:$8 sps:$4 sm:$0xff]   ;;  %v4949_v44 = vld [vmem:[%s8037_s1 + $0x130] ss:$8 sps:$4 sm:$0xff]  }
  0x1f   : > { %v4957_v45 = vld [vmem:[%s8037_s1 + $0x144] ss:$8 sps:$4 sm:$0xff]   ;;  %v4942_v46 = vld [vmem:[%s5439_s19 + $0x40] ss:$16 sps:$4 sm:$0xff]   ;;  %v4963_v49 = vld [vmem:[%s8037_s1 + $0x154] ss:$8 sps:$4 sm:$0xff]  }
  0x20   : > { %1138 = vmatpush1.bf16.msra.mxu0 %v4894_v9  ;;  %v4946_v47 = vld [vmem:[%s5439_s19 + $0x64] ss:$16 sps:$4 sm:$0xff]   ;;  %v4955_v48 = vld [vmem:[%s8037_s1 + $0x140] ss:$8 sps:$4 sm:$0xff]   ;;  %v4961_v50 = vld [vmem:[%s8037_s1 + $0x150] ss:$8 sps:$4 sm:$0xff]  }
  0x21   : > { %1139 = vmatprep.subr.bf16.mxu0 %v4895_v10  ;;  %v4969_v51 = vld [vmem:[%s8037_s1 + $0x164] ss:$8 sps:$4 sm:$0xff]   ;;  %v4948_v52 = vld [vmem:[%s5439_s19 + $0x60] ss:$16 sps:$4 sm:$0xff]   ;;  %v4975_v55 = vld [vmem:[%s8037_s1 + $0x174] ss:$8 sps:$4 sm:$0xff]  }
  0x22   : > { %v4952_v53 = vld [vmem:[%s5439_s19 + $0x84] ss:$16 sps:$4 sm:$0xff]   ;;  %v4967_v54 = vld [vmem:[%s8037_s1 + $0x160] ss:$8 sps:$4 sm:$0xff]   ;;  %v4973_v56 = vld [vmem:[%s8037_s1 + $0x170] ss:$8 sps:$4 sm:$0xff]  }
  0x23   : > { %v4981_v57 = vld [vmem:[%s8037_s1 + $0x184] ss:$8 sps:$4 sm:$0xff]   ;;  %v4954_v58 = vld [vmem:[%s5439_s19 + $0x80] ss:$16 sps:$4 sm:$0xff]   ;;  %v4987_v61 = vld [vmem:[%s8037_s1 + $0x194] ss:$8 sps:$4 sm:$0xff]  }
  0x24   : > { %1140 = vmatpush1.bf16.msra.mxu0 %v4897_v11  ;;  %v4958_v59 = vld [vmem:[%s5439_s19 + $0xa4] ss:$16 sps:$4 sm:$0xff]   ;;  %v4979_v60 = vld [vmem:[%s8037_s1 + $0x180] ss:$8 sps:$4 sm:$0xff]   ;;  %v4985_v62 = vld [vmem:[%s8037_s1 + $0x190] ss:$8 sps:$4 sm:$0xff]  }
  0x25   : > { %1141 = vmatprep.subr.bf16.mxu0 %v4898_v12  ;;  %v4993_v63 = vld [vmem:[%s8037_s1 + $0x1a4] ss:$8 sps:$4 sm:$0xff]   ;;  %v4960_v0 = vld [vmem:[%s5439_s19 + $0xa0] ss:$16 sps:$4 sm:$0xff]   ;;  %v4999_v3 = vld [vmem:[%s8037_s1 + $0x1b4] ss:$8 sps:$4 sm:$0xff]  }
  0x26   : > { %v4964_v1 = vld [vmem:[%s5439_s19 + $0xc4] ss:$16 sps:$4 sm:$0xff]   ;;  %v4991_v2 = vld [vmem:[%s8037_s1 + $0x1a0] ss:$8 sps:$4 sm:$0xff]   ;;  %v4997_v4 = vld [vmem:[%s8037_s1 + $0x1b0] ss:$8 sps:$4 sm:$0xff]  }
  0x27   : > { %v5005_v5 = vld [vmem:[%s8037_s1 + $0x1c4] ss:$8 sps:$4 sm:$0xff]   ;;  %v4966_v6 = vld [vmem:[%s5439_s19 + $0xc0] ss:$16 sps:$4 sm:$0xff]   ;;  %v5011_v9 = vld [vmem:[%s8037_s1 + $0x1d4] ss:$8 sps:$4 sm:$0xff]  }
  0x28   : > { %1142 = vmatpush1.bf16.msra.mxu0 %v4900_v14  ;;  %v4970_v7 = vld [vmem:[%s5439_s19 + $0xe4] ss:$16 sps:$4 sm:$0xff]   ;;  %v5003_v8 = vld [vmem:[%s8037_s1 + $0x1c0] ss:$8 sps:$4 sm:$0xff]   ;;  %v5009_v10 = vld [vmem:[%s8037_s1 + $0x1d0] ss:$8 sps:$4 sm:$0xff]  }
  0x29   : > { %1143 = vmatprep.subr.bf16.mxu0 %v4901_v15  ;;  %v5017_v11 = vld [vmem:[%s8037_s1 + $0x1e4] ss:$8 sps:$4 sm:$0xff]   ;;  %v4972_v12 = vld [vmem:[%s5439_s19 + $0xe0] ss:$16 sps:$4 sm:$0xff]   ;;  %v5023_v15 = vld [vmem:[%s8037_s1 + $0x1f4] ss:$8 sps:$4 sm:$0xff]  }
  0x2a   : > { %v4976_v13 = vld [vmem:[%s5439_s19 + $0x104] ss:$16 sps:$4 sm:$0xff]   ;;  %v5015_v14 = vld [vmem:[%s8037_s1 + $0x1e0] ss:$8 sps:$4 sm:$0xff]  }
  0x2c   : > { %1144 = vmatpush1.bf16.msra.mxu0 %v4903_v16  ;;  %v5021_v16 = vld [vmem:[%s8037_s1 + $0x1f0] ss:$8 sps:$4 sm:$0xff]  }
  0x2d   : > { %1145 = vmatprep.subr.bf16.mxu0 %v4904_v17  ;;  %v4978_v17 = vld [vmem:[%s5439_s19 + $0x100] ss:$16 sps:$4 sm:$0xff]  }
  0x30   : > { %1146 = vmatpush1.bf16.msra.mxu0 %v4906_v18  ;;  %v4982_v18 = vld [vmem:[%s5439_s19 + $0x124] ss:$16 sps:$4 sm:$0xff]  }
  0x31   : > { %1147 = vmatprep.subr.bf16.mxu0 %v4907_v19  ;;  %v4984_v19 = vld [vmem:[%s5439_s19 + $0x120] ss:$16 sps:$4 sm:$0xff]  }
  0x34   : > { %1148 = vmatpush1.bf16.msra.mxu0 %v4909_v20  ;;  %v4988_v20 = vld [vmem:[%s5439_s19 + $0x144] ss:$16 sps:$4 sm:$0xff]  }
  0x35   : > { %1149 = vmatprep.subr.bf16.mxu0 %v4910_v21  ;;  %v4990_v21 = vld [vmem:[%s5439_s19 + $0x140] ss:$16 sps:$4 sm:$0xff]  }
  0x38   : > { %1150 = vmatpush1.bf16.msra.mxu0 %v4912_v22  ;;  %v4994_v22 = vld [vmem:[%s5439_s19 + $0x164] ss:$16 sps:$4 sm:$0xff]  }
  0x39   : > { %1151 = vmatprep.subr.bf16.mxu0 %v4913_v23  ;;  %v4996_v23 = vld [vmem:[%s5439_s19 + $0x160] ss:$16 sps:$4 sm:$0xff]  }
  0x3c   : > { %1152 = vmatpush1.bf16.msra.mxu0 %v4915_v24  ;;  %v5000_v24 = vld [vmem:[%s5439_s19 + $0x184] ss:$16 sps:$4 sm:$0xff]  }
  0x3d   : > { %1153 = vmatprep.subr.bf16.mxu0 %v4916_v25  ;;  %v5002_v25 = vld [vmem:[%s5439_s19 + $0x180] ss:$16 sps:$4 sm:$0xff]  }
  0x40   : > { %1154 = vmatpush1.bf16.msra.mxu0 %v4918_v26  ;;  %v5006_v26 = vld [vmem:[%s5439_s19 + $0x1a4] ss:$16 sps:$4 sm:$0xff]  }
  0x41   : > { %1155 = vmatprep.subr.bf16.mxu0 %v4919_v27  ;;  %v5008_v27 = vld [vmem:[%s5439_s19 + $0x1a0] ss:$16 sps:$4 sm:$0xff]  }
  0x44   : > { %1156 = vmatpush1.bf16.msra.mxu0 %v4921_v28  ;;  %v5012_v28 = vld [vmem:[%s5439_s19 + $0x1c4] ss:$16 sps:$4 sm:$0xff]  }
  0x45   : > { %1157 = vmatprep.subr.bf16.mxu0 %v4922_v29  ;;  %v5014_v29 = vld [vmem:[%s5439_s19 + $0x1c0] ss:$16 sps:$4 sm:$0xff]  }
  0x48   : > { %1158 = vmatpush1.bf16.msra.mxu0 %v4924_v30  ;;  %v5018_v30 = vld [vmem:[%s5439_s19 + $0x1e4] ss:$16 sps:$4 sm:$0xff]  }
  0x49   : > { %1159 = vmatprep.subr.bf16.mxu0 %v4925_v31  ;;  %v5020_v31 = vld [vmem:[%s5439_s19 + $0x1e0] ss:$16 sps:$4 sm:$0xff]  }
  0x4c   : > { %1160 = vmatpush1.bf16.msra.mxu0 %v4927_v32  ;;  %v5026_v32 = vld [vmem:[%s5439_s19 + $0xc] ss:$16 sps:$4 sm:$0xff]  }
  0x4d   : > { %1322 = vmatprep.subr.bf16.mxu0 %v4933_v33  ;;  %v5024_v33 = vld [vmem:[%s5439_s19 + $0x8] ss:$16 sps:$4 sm:$0xff]  }
  0x4f   : > { %1162 = vmatmul.mubr.bf16.vlgmr.msra.gmra.mrb[0].mxu0 %v4928_v34  ;;  %v5027_v34 = vld [vmem:[%s5439_s19 + $0x2c] ss:$16 sps:$4 sm:$0xff]  }
  0x50   : > { %1323 = vmatpush1.bf16.msra.mxu0 %v4931_v35  ;;  %1171 = vmatprep.mubr.bf16.mxu0 %v4934_v36  ;;  %v5029_v35 = vld [vmem:[%s5439_s19 + $0x28] ss:$16 sps:$4 sm:$0xff]   ;;  %v5030_v36 = vld [vmem:[%s5439_s19 + $0x4c] ss:$16 sps:$4 sm:$0xff]  }
  0x51   : > { %1324 = vmatprep.subr.bf16.mxu0 %v4939_v37  ;;  %v5032_v37 = vld [vmem:[%s5439_s19 + $0x48] ss:$16 sps:$4 sm:$0xff]  }
  0x54   : > { %1325 = vmatpush1.bf16.msra.mxu0 %v4937_v38  ;;  %v5033_v38 = vld [vmem:[%s5439_s19 + $0x6c] ss:$16 sps:$4 sm:$0xff]  }
  0x55   : > { %1326 = vmatprep.subr.bf16.mxu0 %v4945_v39  ;;  %v5035_v39 = vld [vmem:[%s5439_s19 + $0x68] ss:$16 sps:$4 sm:$0xff]  }
  0x57   : > { %1172 = vmatmul.mubr.bf16.gmra.mrb[4].mxu0 %v4936_v40  ;;  %v5036_v40 = vld [vmem:[%s5439_s19 + $0x8c] ss:$16 sps:$4 sm:$0xff]  }
  0x58   : > { %1181 = vmatprep.mubr.bf16.mxu0 %v4940_v41  ;;  %1327 = vmatpush1.bf16.msra.mxu0 %v4943_v42  ;;  %v5038_v41 = vld [vmem:[%s5439_s19 + $0x88] ss:$16 sps:$4 sm:$0xff]   ;;  %v5039_v42 = vld [vmem:[%s5439_s19 + $0xac] ss:$16 sps:$4 sm:$0xff]  }
  0x59   : > { %1328 = vmatprep.subr.bf16.mxu0 %v4951_v43  ;;  %v5041_v43 = vld [vmem:[%s5439_s19 + $0xa8] ss:$16 sps:$4 sm:$0xff]  }
  0x5c   : > { %1329 = vmatpush1.bf16.msra.mxu0 %v4949_v44  ;;  %v5042_v44 = vld [vmem:[%s5439_s19 + $0xcc] ss:$16 sps:$4 sm:$0xff]  }
  0x5d   : > { %1330 = vmatprep.subr.bf16.mxu0 %v4957_v45  ;;  %v5044_v45 = vld [vmem:[%s5439_s19 + $0xc8] ss:$16 sps:$4 sm:$0xff]  }
  0x5f   : > { %1182 = vmatmul.mubr.bf16.gmra.mrb[8].mxu0 %v4942_v46  ;;  %v5045_v46 = vld [vmem:[%s5439_s19 + $0xec] ss:$16 sps:$4 sm:$0xff]  }
  0x60   : > { %1191 = vmatprep.mubr.bf16.mxu0 %v4946_v47  ;;  %1331 = vmatpush1.bf16.msra.mxu0 %v4955_v48  ;;  %v5047_v47 = vld [vmem:[%s5439_s19 + $0xe8] ss:$16 sps:$4 sm:$0xff]   ;;  %v5048_v48 = vld [vmem:[%s5439_s19 + $0x10c] ss:$16 sps:$4 sm:$0xff]  }
  0x61   : > { %1332 = vmatprep.subr.bf16.mxu0 %v4963_v49  ;;  %v5050_v49 = vld [vmem:[%s5439_s19 + $0x108] ss:$16 sps:$4 sm:$0xff]  }
  0x64   : > { %1333 = vmatpush1.bf16.msra.mxu0 %v4961_v50  ;;  %v5051_v50 = vld [vmem:[%s5439_s19 + $0x12c] ss:$16 sps:$4 sm:$0xff]  }
  0x65   : > { %1334 = vmatprep.subr.bf16.mxu0 %v4969_v51  ;;  %v5053_v51 = vld [vmem:[%s5439_s19 + $0x128] ss:$16 sps:$4 sm:$0xff]  }
  0x67   : > { %1192 = vmatmul.mubr.bf16.gmra.mrb[12].mxu0 %v4948_v52  ;;  %v5054_v52 = vld [vmem:[%s5439_s19 + $0x14c] ss:$16 sps:$4 sm:$0xff]  }
  0x68   : > { %1201 = vmatprep.mubr.bf16.mxu0 %v4952_v53  ;;  %1335 = vmatpush1.bf16.msra.mxu0 %v4967_v54  ;;  %v5056_v53 = vld [vmem:[%s5439_s19 + $0x148] ss:$16 sps:$4 sm:$0xff]   ;;  %v5057_v54 = vld [vmem:[%s5439_s19 + $0x16c] ss:$16 sps:$4 sm:$0xff]  }
  0x69   : > { %1336 = vmatprep.subr.bf16.mxu0 %v4975_v55  ;;  %v5059_v55 = vld [vmem:[%s5439_s19 + $0x168] ss:$16 sps:$4 sm:$0xff]  }
  0x6c   : > { %1337 = vmatpush1.bf16.msra.mxu0 %v4973_v56  ;;  %v5060_v56 = vld [vmem:[%s5439_s19 + $0x18c] ss:$16 sps:$4 sm:$0xff]  }
  0x6d   : > { %1338 = vmatprep.subr.bf16.mxu0 %v4981_v57  ;;  %v5062_v57 = vld [vmem:[%s5439_s19 + $0x188] ss:$16 sps:$4 sm:$0xff]  }
  0x6f   : > { %1202 = vmatmul.mubr.bf16.gmra.mrb[16].mxu0 %v4954_v58  ;;  %v5063_v58 = vld [vmem:[%s5439_s19 + $0x1ac] ss:$16 sps:$4 sm:$0xff]  }
  0x70   : > { %1211 = vmatprep.mubr.bf16.mxu0 %v4958_v59  ;;  %1339 = vmatpush1.bf16.msra.mxu0 %v4979_v60  ;;  %v5065_v59 = vld [vmem:[%s5439_s19 + $0x1a8] ss:$16 sps:$4 sm:$0xff]   ;;  %v5066_v60 = vld [vmem:[%s5439_s19 + $0x1cc] ss:$16 sps:$4 sm:$0xff]  }
  0x71   : > { %1340 = vmatprep.subr.bf16.mxu0 %v4987_v61  ;;  %v5068_v61 = vld [vmem:[%s5439_s19 + $0x1c8] ss:$16 sps:$4 sm:$0xff]  }
  0x74   : > { %1341 = vmatpush1.bf16.msra.mxu0 %v4985_v62  ;;  %v5069_v62 = vld [vmem:[%s5439_s19 + $0x1ec] ss:$16 sps:$4 sm:$0xff]  }
  0x75   : > { %1342 = vmatprep.subr.bf16.mxu0 %v4993_v63  ;;  %v5071_v63 = vld [vmem:[%s5439_s19 + $0x1e8] ss:$16 sps:$4 sm:$0xff]  }
  0x77   : > { %1212 = vmatmul.mubr.bf16.gmra.mrb[20].mxu0 %v4960_v0  ;;  %v471_v0 = vlaneseq }
  0x78   : > { %1221 = vmatprep.mubr.bf16.mxu0 %v4964_v1  ;;  %1343 = vmatpush1.bf16.msra.mxu0 %v4991_v2 }
  0x79   : > { %1344 = vmatprep.subr.bf16.mxu0 %v4999_v3  ;;  %v5661_v1 = vshrl.u32 %v471_v0, 7  ;;  %v5669_v3 = vld [vmem:[%s8038_s2] sm:$0x77] }
  0x7a   : > { %8130 = vst [vmem:[#allocation5_spill] sm:$0xff] %v5669_v3 }
  0x7b   : > { %8128 = vst [vmem:[#allocation3_spill] sm:$0xff] %v5661_v1  ;;  %v5664_v2 = vsub.s32 0, %v5661_v1 }
  0x7c   : > { %1345 = vmatpush1.bf16.msra.mxu0 %v4997_v4  ;;  %v8046_v4 = vsub.s32 4, %v5661_v1  ;;  %v5077_v1 = vld [vmem:[%s8039_s3 + $0x10] ss:$8 sps:$4 sm:$0xff]  }
  0x7d   : > { %1346 = vmatprep.subr.bf16.mxu0 %v5005_v5  ;;  %8129 = vst [vmem:[#allocation4_spill] sm:$0xff] %v5664_v2  ;;  %v474_v5 = vrot.slane %v5669_v3, %v5664_v2 }
  0x7f   : > { %1222 = vmatmul.mubr.bf16.gmra.mrb[24].mxu0 %v4966_v6  ;;  %v478_v6 = vrot.slane %v5669_v3, %v8046_v4  ;;  %v5075_v4 = vld [vmem:[%s8039_s3 + $0x14] ss:$8 sps:$4 sm:$0xff]  }
  0x80   : > { %1231 = vmatprep.mubr.bf16.mxu0 %v4970_v7  ;;  %1347 = vmatpush1.bf16.msra.mxu0 %v5003_v8  ;;  %v5678_v7 = vrot.slane %v474_v5, %v5664_v2 }
  0x81   : > { %1348 = vmatprep.subr.bf16.mxu0 %v5011_v9  ;;  %v5681_v8 = vrot.slane %v478_v6, %v5664_v2 }
  0x84   : > { %1349 = vmatpush1.bf16.msra.mxu0 %v5009_v10 }
  0x85   : > { %1350 = vmatprep.subr.bf16.mxu0 %v5017_v11 }
  0x87   : > { %1232 = vmatmul.mubr.bf16.gmra.mrb[28].mxu0 %v4972_v12 }
  0x88   : > { %1241 = vmatprep.mubr.bf16.mxu0 %v4976_v13  ;;  %1351 = vmatpush1.bf16.msra.mxu0 %v5015_v14 }
  0x89   : > { %1352 = vmatprep.subr.bf16.mxu0 %v5023_v15 }
  0x8c   : > { %1353 = vmatpush1.bf16.msra.mxu0 %v5021_v16 }
  0x8f   : > { %1242 = vmatmul.mubr.bf16.gmra.mrb[32].mxu0 %v4978_v17 }
  0x90   : > { %1251 = vmatprep.mubr.bf16.mxu0 %v4982_v18 }
  0x97   : > { %1252 = vmatmul.mubr.bf16.gmra.mrb[36].mxu0 %v4984_v19 }
  0x98   : > { %1261 = vmatprep.mubr.bf16.mxu0 %v4988_v20 }
  0x9f   : > { %1262 = vmatmul.mubr.bf16.gmra.mrb[40].mxu0 %v4990_v21 }
  0xa0   : > { %1271 = vmatprep.mubr.bf16.mxu0 %v4994_v22 }
  0xa7   : > { %1272 = vmatmul.mubr.bf16.gmra.mrb[44].mxu0 %v4996_v23 }
  0xa8   : > { %1281 = vmatprep.mubr.bf16.mxu0 %v5000_v24 }
  0xaf   : > { %1282 = vmatmul.mubr.bf16.gmra.mrb[48].mxu0 %v5002_v25 }
  0xb0   : > { %1291 = vmatprep.mubr.bf16.mxu0 %v5006_v26 }
  0xb7   : > { %1292 = vmatmul.mubr.bf16.gmra.mrb[52].mxu0 %v5008_v27 }
  0xb8   : > { %1301 = vmatprep.mubr.bf16.mxu0 %v5012_v28 }
  0xbf   : > { %1302 = vmatmul.mubr.bf16.gmra.mrb[56].mxu0 %v5014_v29 }
  0xc0   : > { %1311 = vmatprep.mubr.bf16.mxu0 %v5018_v30 }
  0xc7   : > { %1312 = vmatmul.mubr.bf16.gmra.mrb[60].mxu0 %v5020_v31 }
  0xc8   : > { %1354 = vmatprep.mubr.bf16.mxu0 %v5026_v32 }
  0xcf   : > { %1355 = vmatmul.mubr.bf16.vlgmr.msra.gmra.mrb[0].mxu0 %v5024_v33 }
  0xd0   : > { %1364 = vmatprep.mubr.bf16.mxu0 %v5027_v34 }
  0xd7   : > { %1365 = vmatmul.mubr.bf16.gmra.mrb[4].mxu0 %v5029_v35 }
  0xd8   : > { %1374 = vmatprep.mubr.bf16.mxu0 %v5030_v36 }
  0xdf   : > { %1375 = vmatmul.mubr.bf16.gmra.mrb[8].mxu0 %v5032_v37 }
  0xe0   : > { %1384 = vmatprep.mubr.bf16.mxu0 %v5033_v38 }
  0xe7   : > { %1385 = vmatmul.mubr.bf16.gmra.mrb[12].mxu0 %v5035_v39 }
  0xe8   : > { %1394 = vmatprep.mubr.bf16.mxu0 %v5036_v40 }
  0xef   : > { %1395 = vmatmul.mubr.bf16.gmra.mrb[16].mxu0 %v5038_v41 }
  0xf0   : > { %1404 = vmatprep.mubr.bf16.mxu0 %v5039_v42 }
  0xf7   : > { %1405 = vmatmul.mubr.bf16.gmra.mrb[20].mxu0 %v5041_v43 }
  0xf8   : > { %1414 = vmatprep.mubr.bf16.mxu0 %v5042_v44 }
  0xff   : > { %1415 = vmatmul.mubr.bf16.gmra.mrb[24].mxu0 %v5044_v45 }
 0x100   : > { %1424 = vmatprep.mubr.bf16.mxu0 %v5045_v46 }
 0x107   : > { %1425 = vmatmul.mubr.bf16.gmra.mrb[28].mxu0 %v5047_v47 }
 0x108   : > { %1434 = vmatprep.mubr.bf16.mxu0 %v5048_v48 }
 0x10f   : > { %1435 = vmatmul.mubr.bf16.gmra.mrb[32].mxu0 %v5050_v49 }
 0x110   : > { %1444 = vmatprep.mubr.bf16.mxu0 %v5051_v50 }
 0x117   : > { %1445 = vmatmul.mubr.bf16.gmra.mrb[36].mxu0 %v5053_v51 }
 0x118   : > { %1454 = vmatprep.mubr.bf16.mxu0 %v5054_v52 }
 0x11f   : > { %1455 = vmatmul.mubr.bf16.gmra.mrb[40].mxu0 %v5056_v53 }
 0x120   : > { %1464 = vmatprep.mubr.bf16.mxu0 %v5057_v54 }
 0x127   : > { %1465 = vmatmul.mubr.bf16.gmra.mrb[44].mxu0 %v5059_v55 }
 0x128   : > { %1474 = vmatprep.mubr.bf16.mxu0 %v5060_v56 }
 0x12f   : > { %1475 = vmatmul.mubr.bf16.gmra.mrb[48].mxu0 %v5062_v57 }
 0x130   : > { %1484 = vmatprep.mubr.bf16.mxu0 %v5063_v58 }
 0x137   : > { %1485 = vmatmul.mubr.bf16.gmra.mrb[52].mxu0 %v5065_v59 }
 0x138   : > { %1494 = vmatprep.mubr.bf16.mxu0 %v5066_v60 }
 0x13f   : > { %1495 = vmatmul.mubr.bf16.gmra.mrb[56].mxu0 %v5068_v61 }
 0x140   : > { %1504 = vmatprep.mubr.bf16.mxu0 %v5069_v62 }
 0x147   : > { %1505 = vmatmul.mubr.bf16.gmra.mrb[60].mxu0 %v5071_v63 }
 0x1a2   : > { %v1356_v9 = vpop.f32.mrb[0].mxu0 }
 0x1a3   : > { %v5684_v10 = vadd.f32 %v1356_v9, %v5678_v7  ;;  %v1358_v11 = vpop.f32.mrb[1].mxu0 }
 0x1a4   : > { %v5687_v12 = vadd.f32 %v1358_v11, %v5681_v8  ;;  %v1360_v13 = vpop.f32.mrb[2].mxu0 }
 0x1a5   : > { %v1362_v14 = vpop.f32.mrb[3].mxu0  ;;  %v5690_v15 = vadd.f32 %v1360_v13, %v5678_v7 }
 0x1a6   : > { %v5693_v16 = vadd.f32 %v1362_v14, %v5681_v8  ;;  %v1515_v17 = vadd.f32 %v5687_v12, %v5684_v10 }
 0x1a8   : > { %1516 = vadd.xlane.f32.xlu0 %v1515_v17  ;;  %v1518_v19 = vadd.f32 %v5693_v16, %v5690_v15 }
 0x1aa   : > { %v1366_v18 = vpop.f32.mrb[4].mxu0 }
 0x1ab   : > { %v5700_v20 = vadd.f32 %v1366_v18, %v5678_v7  ;;  %v1368_v21 = vpop.f32.mrb[5].mxu0 }
 0x1ac   : > { %v5703_v22 = vadd.f32 %v1368_v21, %v5681_v8  ;;  %v1370_v23 = vpop.f32.mrb[6].mxu0  ;;  %1519 = vadd.xlane.f32.xlu0 %v1518_v19 }
 0x1ad   : > { %v1372_v24 = vpop.f32.mrb[7].mxu0  ;;  %v5706_v25 = vadd.f32 %v1370_v23, %v5678_v7 }
 0x1ae   : > { %v5709_v26 = vadd.f32 %v1372_v24, %v5681_v8  ;;  %v1521_v27 = vadd.f32 %v5703_v22, %v5700_v20 }
 0x1b0   : > { %1522 = vadd.xlane.f32.xlu1 %v1521_v27  ;;  %v1524_v29 = vadd.f32 %v5709_v26, %v5706_v25 }
 0x1b2   : > { %v1376_v28 = vpop.f32.mrb[8].mxu0 }
 0x1b3   : > { %v5716_v30 = vadd.f32 %v1376_v28, %v5678_v7  ;;  %v1378_v31 = vpop.f32.mrb[9].mxu0 }
 0x1b4   : > { %v5719_v32 = vadd.f32 %v1378_v31, %v5681_v8  ;;  %v1380_v33 = vpop.f32.mrb[10].mxu0  ;;  %1525 = vadd.xlane.f32.xlu1 %v1524_v29 }
 0x1b5   : > { %v5722_v34 = vadd.f32 %v1380_v33, %v5678_v7  ;;  %v1382_v35 = vpop.f32.mrb[11].mxu0 }
 0x1b6   : > { %v5725_v36 = vadd.f32 %v1382_v35, %v5681_v8  ;;  %v1527_v37 = vadd.f32 %v5719_v32, %v5716_v30 }
 0x1b8   : > { %1528 = vadd.xlane.f32.xlu0 %v1527_v37  ;;  %v1530_v38 = vadd.f32 %v5725_v36, %v5722_v34 }
 0x1ba   : > { %v1386_v39 = vpop.f32.mrb[12].mxu0  ;;  %1531 = vadd.xlane.f32.xlu1 %v1530_v38 }
 0x1bb   : > { %v5732_v40 = vadd.f32 %v1386_v39, %v5678_v7  ;;  %v1388_v41 = vpop.f32.mrb[13].mxu0 }
 0x1bc   : > { %v5735_v42 = vadd.f32 %v1388_v41, %v5681_v8  ;;  %v1390_v43 = vpop.f32.mrb[14].mxu0 }
 0x1bd   : > { %v5738_v44 = vadd.f32 %v1390_v43, %v5678_v7  ;;  %v1392_v45 = vpop.f32.mrb[15].mxu0 }
 0x1be   : > { %v5741_v46 = vadd.f32 %v1392_v45, %v5681_v8  ;;  %v1533_v47 = vadd.f32 %v5735_v42, %v5732_v40 }
 0x1c0   : > { %1534 = vadd.xlane.f32.xlu0 %v1533_v47  ;;  %v1536_v48 = vadd.f32 %v5741_v46, %v5738_v44 }
 0x1c2   : > { %v1396_v49 = vpop.f32.mrb[16].mxu0  ;;  %1537 = vadd.xlane.f32.xlu1 %v1536_v48 }
 0x1c3   : > { %v5748_v50 = vadd.f32 %v1396_v49, %v5678_v7  ;;  %v1398_v51 = vpop.f32.mrb[17].mxu0 }
 0x1c4   : > { %v5751_v52 = vadd.f32 %v1398_v51, %v5681_v8  ;;  %v1400_v53 = vpop.f32.mrb[18].mxu0 }
 0x1c5   : > { %v5754_v54 = vadd.f32 %v1400_v53, %v5678_v7  ;;  %v1402_v55 = vpop.f32.mrb[19].mxu0 }
 0x1c6   : > { %v5757_v56 = vadd.f32 %v1402_v55, %v5681_v8  ;;  %v1539_v57 = vadd.f32 %v5751_v52, %v5748_v50 }
 0x1c8   : > { %1540 = vadd.xlane.f32.xlu0 %v1539_v57  ;;  %v1542_v58 = vadd.f32 %v5757_v56, %v5754_v54 }
 0x1ca   : > { %v1406_v59 = vpop.f32.mrb[20].mxu0  ;;  %1543 = vadd.xlane.f32.xlu1 %v1542_v58 }
 0x1cb   : > { %v5764_v60 = vadd.f32 %v1406_v59, %v5678_v7  ;;  %v1408_v61 = vpop.f32.mrb[21].mxu0 }
 0x1cc   : > { %v5767_v62 = vadd.f32 %v1408_v61, %v5681_v8  ;;  %v1410_v63 = vpop.f32.mrb[22].mxu0 }
 0x1cd   : > { %v5770_v0 = vadd.f32 %v1410_v63, %v5678_v7  ;;  %v1412_v5 = vpop.f32.mrb[23].mxu0 }
 0x1ce   : > { %v5773_v6 = vadd.f32 %v1412_v5, %v5681_v8  ;;  %v1545_v9 = vadd.f32 %v5767_v62, %v5764_v60 }
 0x1d0   : > { %1546 = vadd.xlane.f32.xlu0 %v1545_v9  ;;  %v1548_v11 = vadd.f32 %v5773_v6, %v5770_v0 }
 0x1d2   : > { %v1416_v13 = vpop.f32.mrb[24].mxu0  ;;  %1549 = vadd.xlane.f32.xlu1 %v1548_v11 }
 0x1d3   : > { %v5780_v14 = vadd.f32 %v1416_v13, %v5678_v7  ;;  %v1418_v17 = vpop.f32.mrb[25].mxu0 }
 0x1d4   : > { %v5783_v18 = vadd.f32 %v1418_v17, %v5681_v8  ;;  %v1420_v19 = vpop.f32.mrb[26].mxu0 }
 0x1d5   : > { %v5786_v21 = vadd.f32 %v1420_v19, %v5678_v7  ;;  %v1422_v23 = vpop.f32.mrb[27].mxu0 }
 0x1d6   : > { %v5789_v24 = vadd.f32 %v1422_v23, %v5681_v8  ;;  %v1551_v27 = vadd.f32 %v5783_v18, %v5780_v14 }
 0x1d8   : > { %1552 = vadd.xlane.f32.xlu0 %v1551_v27  ;;  %v1554_v28 = vadd.f32 %v5789_v24, %v5786_v21 }
 0x1da   : > { %v1426_v29 = vpop.f32.mrb[28].mxu0  ;;  %1555 = vadd.xlane.f32.xlu1 %v1554_v28 }
 0x1db   : > { %v5796_v31 = vadd.f32 %v1426_v29, %v5678_v7  ;;  %v1428_v33 = vpop.f32.mrb[29].mxu0 }
 0x1dc   : > { %v5799_v35 = vadd.f32 %v1428_v33, %v5681_v8  ;;  %v1430_v37 = vpop.f32.mrb[30].mxu0 }
 0x1dd   : > { %v5802_v38 = vadd.f32 %v1430_v37, %v5678_v7  ;;  %v1432_v39 = vpop.f32.mrb[31].mxu0 }
 0x1de   : > { %v5805_v41 = vadd.f32 %v1432_v39, %v5681_v8  ;;  %v1557_v43 = vadd.f32 %v5799_v35, %v5796_v31 }
 0x1e0   : > { %1558 = vadd.xlane.f32.xlu0 %v1557_v43  ;;  %v1560_v45 = vadd.f32 %v5805_v41, %v5802_v38 }
 0x1e2   : > { %v1436_v47 = vpop.f32.mrb[32].mxu0  ;;  %1561 = vadd.xlane.f32.xlu1 %v1560_v45 }
 0x1e3   : > { %v5812_v48 = vadd.f32 %v1436_v47, %v5678_v7  ;;  %v1438_v49 = vpop.f32.mrb[33].mxu0 }
 0x1e4   : > { %v5815_v51 = vadd.f32 %v1438_v49, %v5681_v8  ;;  %v1440_v53 = vpop.f32.mrb[34].mxu0 }
 0x1e5   : > { %8131 = vst [vmem:[#allocation6_spill] sm:$0xff] %v5812_v48  ;;  %v5818_v55 = vadd.f32 %v1440_v53, %v5678_v7  ;;  %v1442_v57 = vpop.f32.mrb[35].mxu0 }
 0x1e6   : > { %8132 = vst [vmem:[#allocation7_spill] sm:$0xff] %v5815_v51  ;;  %v5821_v58 = vadd.f32 %v1442_v57, %v5681_v8  ;;  %v1563_v59 = vadd.f32 %v5815_v51, %v5812_v48 }
 0x1e7   : > { %8133 = vst [vmem:[#allocation8_spill] sm:$0xff] %v5818_v55 }
 0x1e8   : > { %8134 = vst [vmem:[#allocation9_spill] sm:$0xff] %v5821_v58  ;;  %1564 = vadd.xlane.f32.xlu0 %v1563_v59  ;;  %v1566_v61 = vadd.f32 %v5821_v58, %v5818_v55 }
 0x1ea   : > { %v1446_v63 = vpop.f32.mrb[36].mxu0  ;;  %1567 = vadd.xlane.f32.xlu1 %v1566_v61 }
 0x1eb   : > { %v5828_v5 = vadd.f32 %v1446_v63, %v5678_v7  ;;  %v1448_v9 = vpop.f32.mrb[37].mxu0 }
 0x1ec   : > { %v5831_v11 = vadd.f32 %v1448_v9, %v5681_v8  ;;  %v1450_v13 = vpop.f32.mrb[38].mxu0 }
 0x1ed   : > { %8135 = vst [vmem:[#allocation10_spill] sm:$0xff] %v5828_v5  ;;  %v5834_v17 = vadd.f32 %v1450_v13, %v5678_v7  ;;  %v1452_v19 = vpop.f32.mrb[39].mxu0 }
 0x1ee   : > { %8136 = vst [vmem:[#allocation11_spill] sm:$0xff] %v5831_v11  ;;  %v5837_v23 = vadd.f32 %v1452_v19, %v5681_v8  ;;  %v1569_v27 = vadd.f32 %v5831_v11, %v5828_v5  ;;  %v5086_v11 = vld [vmem:[%s8039_s3 + $0x40] ss:$8 sps:$4 sm:$0xff]   ;;  %v5090_v5 = vld [vmem:[%s8039_s3 + $0x64] ss:$8 sps:$4 sm:$0xff]  }
 0x1ef   : > { %8137 = vst [vmem:[#allocation12_spill] sm:$0xff] %v5834_v17 }
 0x1f0   : > { %8138 = vst [vmem:[#allocation13_spill] sm:$0xff] %v5837_v23  ;;  %1570 = vadd.xlane.f32.xlu0 %v1569_v27  ;;  %v1572_v28 = vadd.f32 %v5837_v23, %v5834_v17 }
 0x1f2   : > { %v1456_v29 = vpop.f32.mrb[40].mxu0  ;;  %1573 = vadd.xlane.f32.xlu1 %v1572_v28 }
 0x1f3   : > { %v5844_v33 = vadd.f32 %v1456_v29, %v5678_v7  ;;  %v1458_v37 = vpop.f32.mrb[41].mxu0 }
 0x1f4   : > { %v5847_v39 = vadd.f32 %v1458_v37, %v5681_v8  ;;  %v1460_v43 = vpop.f32.mrb[42].mxu0 }
 0x1f5   : > { %8139 = vst [vmem:[#allocation14_spill] sm:$0xff] %v5844_v33  ;;  %v5850_v45 = vadd.f32 %v1460_v43, %v5678_v7  ;;  %v1462_v47 = vpop.f32.mrb[43].mxu0 }
 0x1f6   : > { %8140 = vst [vmem:[#allocation15_spill] sm:$0xff] %v5847_v39  ;;  %v5853_v49 = vadd.f32 %v1462_v47, %v5681_v8  ;;  %v1575_v53 = vadd.f32 %v5847_v39, %v5844_v33 }
 0x1f7   : > { %8141 = vst [vmem:[#allocation16_spill] sm:$0xff] %v5850_v45 }
 0x1f8   : > { %8142 = vst [vmem:[#allocation17_spill] sm:$0xff] %v5853_v49  ;;  %1576 = vadd.xlane.f32.xlu0 %v1575_v53  ;;  %v1578_v57 = vadd.f32 %v5853_v49, %v5850_v45  ;;  %v5072_v53 = vld [vmem:[%s8039_s3 + $0x4] ss:$8 sps:$4 sm:$0xff]  }
 0x1f9   : > { %2500 = vmatprep.subr.bf16.mxu1 %v5072_v53  ;;  %v5078_v45 = vld [vmem:[%s8039_s3 + $0x24] ss:$8 sps:$4 sm:$0xff]   ;;  %v5080_v53 = vld [vmem:[%s8039_s3 + $0x20] ss:$8 sps:$4 sm:$0xff]  }
 0x1fa   : > { %v5859_v59 = vpop.f32.mrb[44].mxu0  ;;  %1579 = vadd.xlane.f32.xlu1 %v1578_v57  ;;  %v5074_v57 = vld [vmem:[%s8039_s3] ss:$8 sps:$4 sm:$0xff]  }
 0x1fb   : > { %v5861_v61 = vpop.f32.mrb[45].mxu0  ;;  %2501 = vmatpush1.bf16.msra.mxu1 %v5074_v57  ;;  %v5081_v57 = vld [vmem:[%s8039_s3 + $0x34] ss:$8 sps:$4 sm:$0xff]  }
 0x1fc   : > { %v5863_v63 = vpop.f32.mrb[46].mxu0  ;;  %2502 = vmatprep.subr.bf16.mxu1 %v5075_v4  ;;  %v5083_v4 = vld [vmem:[%s8039_s3 + $0x30] ss:$8 sps:$4 sm:$0xff]  }
 0x1fd   : > { %v5865_v9 = vpop.f32.mrb[47].mxu0 }
 0x1ff   : > { %2503 = vmatpush1.bf16.msra.mxu1 %v5077_v1  ;;  %v5084_v1 = vld [vmem:[%s8039_s3 + $0x44] ss:$8 sps:$4 sm:$0xff]  }
 0x200   : > { %2504 = vmatprep.subr.bf16.mxu1 %v5078_v45 }
 0x202   : > { %v5867_v13 = vpop.f32.mrb[48].mxu0 }
 0x203   : > { %v5869_v19 = vpop.f32.mrb[49].mxu0  ;;  %2505 = vmatpush1.bf16.msra.mxu1 %v5080_v53  ;;  %v5087_v53 = vld [vmem:[%s8039_s3 + $0x54] ss:$8 sps:$4 sm:$0xff]  }
 0x204   : > { %v5871_v27 = vpop.f32.mrb[50].mxu0  ;;  %2506 = vmatprep.subr.bf16.mxu1 %v5081_v57  ;;  %v5089_v57 = vld [vmem:[%s8039_s3 + $0x50] ss:$8 sps:$4 sm:$0xff]  }
 0x205   : > { %v5873_v28 = vpop.f32.mrb[51].mxu0 }
 0x207   : > { %2507 = vmatpush1.bf16.msra.mxu1 %v5083_v4  ;;  %v5092_v4 = vld [vmem:[%s8039_s3 + $0x60] ss:$8 sps:$4 sm:$0xff]  }
 0x208   : > { %2508 = vmatprep.subr.bf16.mxu1 %v5084_v1  ;;  %v5093_v1 = vld [vmem:[%s8039_s3 + $0x74] ss:$8 sps:$4 sm:$0xff]  }
 0x20a   : > { %v5875_v29 = vpop.f32.mrb[52].mxu0 }
 0x20b   : > { %v5877_v37 = vpop.f32.mrb[53].mxu0  ;;  %2509 = vmatpush1.bf16.msra.mxu1 %v5086_v11  ;;  %v5095_v11 = vld [vmem:[%s8039_s3 + $0x70] ss:$8 sps:$4 sm:$0xff]  }
 0x20c   : > { %v5879_v43 = vpop.f32.mrb[54].mxu0  ;;  %2510 = vmatprep.subr.bf16.mxu1 %v5087_v53  ;;  %v5096_v53 = vld [vmem:[%s8039_s3 + $0x84] ss:$8 sps:$4 sm:$0xff]  }
 0x20d   : > { %v5881_v47 = vpop.f32.mrb[55].mxu0 }
 0x20f   : > { %2511 = vmatpush1.bf16.msra.mxu1 %v5089_v57  ;;  %v5098_v57 = vld [vmem:[%s8039_s3 + $0x80] ss:$8 sps:$4 sm:$0xff]  }
 0x210   : > { %2512 = vmatprep.subr.bf16.mxu1 %v5090_v5 }
 0x212   : > { %v5892_v2 = vpop.f32.mrb[56].mxu0 }
 0x213   : > { %v5894_v3 = vpop.f32.mrb[57].mxu0  ;;  %2513 = vmatpush1.bf16.msra.mxu1 %v5092_v4 }
 0x214   : > { %v5899_v49 = vpop.f32.mrb[58].mxu0  ;;  %2514 = vmatprep.subr.bf16.mxu1 %v5093_v1 }
 0x215   : > { %v5904_v39 = vpop.f32.mrb[59].mxu0 }
 0x217   : > { %2515 = vmatpush1.bf16.msra.mxu1 %v5095_v11 }
 0x218   : > { %2516 = vmatprep.subr.bf16.mxu1 %v5096_v53  ;;  %v5965_v53 = vadd.f32 %v5859_v59, %v5678_v7 }
 0x21a   : > { %v5912_v33 = vpop.f32.mrb[60].mxu0 }
 0x21b   : > { %v5914_v23 = vpop.f32.mrb[61].mxu0  ;;  %2517 = vmatpush1.bf16.msra.mxu1 %v5098_v57  ;;  %v5969_v57 = vadd.f32 %v5861_v61, %v5681_v8  ;;  %v5983_v61 = vadd.f32 %v5863_v63, %v5678_v7 }
 0x21c   : > { %v5919_v17 = vpop.f32.mrb[62].mxu0 }
 0x21d   : > { %v5924_v45 = vpop.f32.mrb[63].mxu0 }
 0x235   : > { %v1517_v5 = vpop.xlane.xlu0 %1516 }
 0x236   : > { %v1612_v58 = vmul.f32 0.00390625, %v1517_v5 }
 0x238   : > { %v5954_v4 = vsub.f32 %v5684_v10, %v1612_v58  ;;  %v5957_v55 = vsub.f32 %v5687_v12, %v1612_v58 }
 0x239   : > { %v1520_v1 = vpop.xlane.xlu0 %1519 }
 0x23a   : > { %8143 = vst [vmem:[#allocation18_spill] sm:$0xff] %v5954_v4  ;;  %v1613_v51 = vmul.f32 0.00390625, %v1520_v1  ;;  %v1708_v48 = vmul.f32 %v5954_v4, %v5954_v4  ;;  %v1709_v11 = vmul.f32 %v5957_v55, %v5957_v55 }
 0x23c   : > { %v5972_v10 = vsub.f32 %v5690_v15, %v1613_v51  ;;  %v5975_v12 = vsub.f32 %v5693_v16, %v1613_v51  ;;  %v1772_v58 = vadd.f32 %v1709_v11, %v1708_v48  ;;  %v5987_v15 = vadd.f32 %v5865_v9, %v5681_v8 }
 0x23d   : > { %v1523_v5 = vpop.xlane.xlu1 %1522  ;;  %v1581_v51 = vadd.f32 %v5969_v57, %v5965_v53 }
 0x23e   : > { %v1614_v1 = vmul.f32 0.00390625, %v1523_v5  ;;  %1773 = vadd.xlane.f32.xlu0 %v1772_v58  ;;  %v1710_v4 = vmul.f32 %v5972_v10, %v5972_v10  ;;  %v1711_v59 = vmul.f32 %v5975_v12, %v5975_v12 }
 0x240   : > { %v5990_v16 = vsub.f32 %v5700_v20, %v1614_v1  ;;  %v5993_v48 = vsub.f32 %v5703_v22, %v1614_v1  ;;  %v1775_v11 = vadd.f32 %v1711_v59, %v1710_v4  ;;  %v6003_v20 = vadd.f32 %v5867_v13, %v5678_v7 }
 0x241   : > { %v1526_v58 = vpop.xlane.xlu1 %1525  ;;  %v6007_v22 = vadd.f32 %v5869_v19, %v5681_v8 }
 0x242   : > { %v1615_v5 = vmul.f32 0.00390625, %v1526_v58  ;;  %1582 = vadd.xlane.f32.xlu0 %v1581_v51  ;;  %1776 = vadd.xlane.f32.xlu1 %v1775_v11  ;;  %v1712_v63 = vmul.f32 %v5990_v16, %v5990_v16  ;;  %v1713_v9 = vmul.f32 %v5993_v48, %v5993_v48  ;;  %v1584_v51 = vadd.f32 %v5987_v15, %v5983_v61 }
 0x244   : > { %v6010_v4 = vsub.f32 %v5706_v25, %v1615_v5  ;;  %v6013_v1 = vsub.f32 %v5709_v26, %v1615_v5  ;;  %v1778_v59 = vadd.f32 %v1713_v9, %v1712_v63  ;;  %v6023_v25 = vadd.f32 %v5871_v27, %v5678_v7 }
 0x245   : > { %v1529_v11 = vpop.xlane.xlu0 %1528  ;;  %v6027_v26 = vadd.f32 %v5873_v28, %v5681_v8  ;;  %v1587_v63 = vadd.f32 %v6007_v22, %v6003_v20 }
 0x246   : > { %8144 = vst [vmem:[#allocation19_spill] sm:$0xff] %v6010_v4  ;;  %v1616_v58 = vmul.f32 0.00390625, %v1529_v11  ;;  %1779 = vadd.xlane.f32.xlu0 %v1778_v59  ;;  %1585 = vadd.xlane.f32.xlu1 %v1584_v51  ;;  %v1714_v13 = vmul.f32 %v6010_v4, %v6010_v4  ;;  %v1715_v19 = vmul.f32 %v6013_v1, %v6013_v1 }
 0x247   : > { %v1532_v5 = vpop.xlane.xlu1 %1531 }
 0x248   : > { %v6032_v9 = vsub.f32 %v5716_v30, %v1616_v58  ;;  %v6035_v59 = vsub.f32 %v5719_v32, %v1616_v58  ;;  %v1617_v51 = vmul.f32 0.00390625, %v1532_v5  ;;  %v1781_v11 = vadd.f32 %v1715_v19, %v1714_v13 }
 0x249   : > { %v1590_v32 = vadd.f32 %v6027_v26, %v6023_v25  ;;  %v6059_v13 = vadd.f32 %v5877_v37, %v5681_v8  ;;  %v6073_v37 = vadd.f32 %v5881_v47, %v5681_v8  ;;  %v5102_v47 = vld [vmem:[%s8039_s3 + $0xa4] ss:$8 sps:$4 sm:$0xff]  }
 0x24a   : > { %v6038_v4 = vsub.f32 %v5722_v34, %v1617_v51  ;;  %v6041_v27 = vsub.f32 %v5725_v36, %v1617_v51  ;;  %1588 = vadd.xlane.f32.xlu0 %v1587_v63  ;;  %1782 = vadd.xlane.f32.xlu1 %v1781_v11  ;;  %v1716_v28 = vmul.f32 %v6032_v9, %v6032_v9  ;;  %v5099_v63 = vld [vmem:[%s8039_s3 + $0x94] ss:$8 sps:$4 sm:$0xff]   ;;  %v5101_v11 = vld [vmem:[%s8039_s3 + $0x90] ss:$8 sps:$4 sm:$0xff]  }
 0x24b   : > { %v1717_v30 = vmul.f32 %v6035_v59, %v6035_v59  ;;  %v6055_v36 = vadd.f32 %v5875_v29, %v5678_v7  ;;  %v6069_v29 = vadd.f32 %v5879_v43, %v5678_v7  ;;  %2518 = vmatprep.subr.bf16.mxu1 %v5099_v63 }
 0x24c   : > { %8145 = vst [vmem:[#allocation20_spill] sm:$0xff] %v6038_v4  ;;  %v1718_v58 = vmul.f32 %v6038_v4, %v6038_v4  ;;  %v1719_v34 = vmul.f32 %v6041_v27, %v6041_v27  ;;  %2519 = vmatpush1.bf16.msra.mxu1 %v5101_v11  ;;  %v6111_v11 = vadd.f32 %v5894_v3, %v5681_v8 }
 0x24d   : > { %v1535_v19 = vpop.xlane.xlu0 %1534  ;;  %v1784_v5 = vadd.f32 %v1717_v30, %v1716_v28  ;;  %v1593_v43 = vadd.f32 %v6059_v13, %v6055_v36  ;;  %2520 = vmatprep.subr.bf16.mxu1 %v5102_v47  ;;  %v5107_v47 = vld [vmem:[%s8039_s3 + $0xb0] ss:$8 sps:$4 sm:$0xff]  }
 0x24e   : > { %v1618_v51 = vmul.f32 0.00390625, %v1535_v19  ;;  %1591 = vadd.xlane.f32.xlu1 %v1590_v32  ;;  %v1787_v4 = vadd.f32 %v1719_v34, %v1718_v58  ;;  %v5104_v58 = vld [vmem:[%s8039_s3 + $0xa0] ss:$8 sps:$4 sm:$0xff]  }
 0x24f   : > { %1785 = vadd.xlane.f32.xlu0 %v1784_v5  ;;  %v1538_v28 = vpop.xlane.xlu1 %1537 }
 0x250   : > { %v6076_v30 = vsub.f32 %v5732_v40, %v1618_v51  ;;  %v6079_v32 = vsub.f32 %v5735_v42, %v1618_v51  ;;  %v1619_v19 = vmul.f32 0.00390625, %v1538_v28  ;;  %2521 = vmatpush1.bf16.msra.mxu1 %v5104_v58  ;;  %v6107_v51 = vadd.f32 %v5892_v2, %v5678_v7 }
 0x251   : > { %v6125_v2 = vadd.f32 %v5904_v39, %v5681_v8  ;;  %v5108_v39 = vld [vmem:[%s8039_s3 + $0xc4] ss:$8 sps:$4 sm:$0xff]  }
 0x252   : > { %v6087_v5 = vsub.f32 %v5738_v44, %v1619_v19  ;;  %v6090_v63 = vsub.f32 %v5741_v46, %v1619_v19  ;;  %1788 = vadd.xlane.f32.xlu1 %v1787_v4  ;;  %v1720_v40 = vmul.f32 %v6076_v30, %v6076_v30  ;;  %v1721_v42 = vmul.f32 %v6079_v32, %v6079_v32  ;;  %v5105_v19 = vld [vmem:[%s8039_s3 + $0xb4] ss:$8 sps:$4 sm:$0xff]  }
 0x253   : > { %1594 = vadd.xlane.f32.xlu0 %v1593_v43  ;;  %v1596_v44 = vadd.f32 %v6073_v37, %v6069_v29  ;;  %2522 = vmatprep.subr.bf16.mxu1 %v5105_v19 }
 0x254   : > { %v1790_v34 = vadd.f32 %v1721_v42, %v1720_v40  ;;  %v1722_v46 = vmul.f32 %v6087_v5, %v6087_v5  ;;  %v1723_v4 = vmul.f32 %v6090_v63, %v6090_v63  ;;  %v6121_v40 = vadd.f32 %v5899_v49, %v5678_v7  ;;  %2523 = vmatpush1.bf16.msra.mxu1 %v5107_v47 }
 0x255   : > { %v1541_v28 = vpop.xlane.xlu0 %1540  ;;  %v1599_v49 = vadd.f32 %v6111_v11, %v6107_v51  ;;  %2524 = vmatprep.subr.bf16.mxu1 %v5108_v39  ;;  %v6159_v47 = vadd.f32 %v5912_v33, %v5678_v7  ;;  %v5113_v39 = vld [vmem:[%s8039_s3 + $0xd0] ss:$8 sps:$4 sm:$0xff]   ;;  %v6177_v33 = vadd.f32 %v5924_v45, %v5681_v8 }
 0x256   : > { %v1620_v43 = vmul.f32 0.00390625, %v1541_v28  ;;  %1597 = vadd.xlane.f32.xlu1 %v1596_v44  ;;  %v1793_v28 = vadd.f32 %v1723_v4, %v1722_v46  ;;  %v5110_v46 = vld [vmem:[%s8039_s3 + $0xc0] ss:$8 sps:$4 sm:$0xff]  }
 0x257   : > { %1791 = vadd.xlane.f32.xlu0 %v1790_v34  ;;  %v1544_v3 = vpop.xlane.xlu1 %1543 }
 0x258   : > { %v6128_v42 = vsub.f32 %v5748_v50, %v1620_v43  ;;  %v6131_v58 = vsub.f32 %v5751_v52, %v1620_v43  ;;  %v1621_v44 = vmul.f32 0.00390625, %v1544_v3  ;;  %2525 = vmatpush1.bf16.msra.mxu1 %v5110_v46  ;;  %v6163_v3 = vadd.f32 %v5914_v23, %v5681_v8  ;;  %v5114_v8 = vld [vmem:[%s8039_s3 + $0xe4] ss:$8 sps:$4 sm:$0xff]  }
 0x25a   : > { %v6139_v34 = vsub.f32 %v5754_v54, %v1621_v44  ;;  %v6142_v19 = vsub.f32 %v5757_v56, %v1621_v44  ;;  %1794 = vadd.xlane.f32.xlu1 %v1793_v28  ;;  %v1724_v50 = vmul.f32 %v6128_v42, %v6128_v42  ;;  %v1725_v52 = vmul.f32 %v6131_v58, %v6131_v58  ;;  %v5111_v28 = vld [vmem:[%s8039_s3 + $0xd4] ss:$8 sps:$4 sm:$0xff]  }
 0x25b   : > { %1600 = vadd.xlane.f32.xlu0 %v1599_v49  ;;  %v1602_v54 = vadd.f32 %v6125_v2, %v6121_v40  ;;  %2526 = vmatprep.subr.bf16.mxu1 %v5111_v28 }
 0x25c   : > { %v1796_v4 = vadd.f32 %v1725_v52, %v1724_v50  ;;  %v1726_v56 = vmul.f32 %v6139_v34, %v6139_v34  ;;  %v1727_v43 = vmul.f32 %v6142_v19, %v6142_v19  ;;  %v6173_v50 = vadd.f32 %v5919_v17, %v5678_v7  ;;  %2527 = vmatpush1.bf16.msra.mxu1 %v5113_v39 }
 0x25d   : > { %v1547_v44 = vpop.xlane.xlu0 %1546  ;;  %v1605_v7 = vadd.f32 %v6163_v3, %v6159_v47  ;;  %2528 = vmatprep.subr.bf16.mxu1 %v5114_v8 }
 0x25e   : > { %v1622_v49 = vmul.f32 0.00390625, %v1547_v44  ;;  %1603 = vadd.xlane.f32.xlu1 %v1602_v54  ;;  %v1799_v44 = vadd.f32 %v1727_v43, %v1726_v56 }
 0x25f   : > { %1797 = vadd.xlane.f32.xlu0 %v1796_v4  ;;  %v1550_v23 = vpop.xlane.xlu1 %1549  ;;  %v5116_v4 = vld [vmem:[%s8039_s3 + $0xe0] ss:$8 sps:$4 sm:$0xff]  }
 0x260   : > { %v6180_v52 = vsub.f32 %v5764_v60, %v1622_v49  ;;  %v6183_v46 = vsub.f32 %v5767_v62, %v1622_v49  ;;  %v1623_v54 = vmul.f32 0.00390625, %v1550_v23  ;;  %2529 = vmatpush1.bf16.msra.mxu1 %v5116_v4  ;;  %v5117_v49 = vld [vmem:[%s8039_s3 + $0xf4] ss:$8 sps:$4 sm:$0xff]   ;;  %v5119_v23 = vld [vmem:[%s8039_s3 + $0xf0] ss:$8 sps:$4 sm:$0xff]  }
 0x261   : > { %2530 = vmatprep.subr.bf16.mxu1 %v5117_v49 }
 0x262   : > { %v6191_v17 = vsub.f32 %v5770_v0, %v1623_v54  ;;  %v6194_v45 = vsub.f32 %v5773_v6, %v1623_v54  ;;  %1800 = vadd.xlane.f32.xlu1 %v1799_v44  ;;  %v1728_v60 = vmul.f32 %v6180_v52, %v6180_v52  ;;  %v1729_v62 = vmul.f32 %v6183_v46, %v6183_v46 }
 0x263   : > { %1606 = vadd.xlane.f32.xlu0 %v1605_v7  ;;  %v1608_v0 = vadd.f32 %v6177_v33, %v6173_v50 }
 0x264   : > { %v1802_v56 = vadd.f32 %v1729_v62, %v1728_v60  ;;  %v1730_v6 = vmul.f32 %v6191_v17, %v6191_v17  ;;  %v1731_v43 = vmul.f32 %v6194_v45, %v6194_v45  ;;  %2531 = vmatpush1.bf16.msra.mxu1 %v5119_v23 }
 0x265   : > { %v1553_v28 = vpop.xlane.xlu0 %1552 }
 0x266   : > { %v1624_v39 = vmul.f32 0.00390625, %v1553_v28  ;;  %1609 = vadd.xlane.f32.xlu1 %v1608_v0  ;;  %v1805_v60 = vadd.f32 %v1731_v43, %v1730_v6 }
 0x267   : > { %1803 = vadd.xlane.f32.xlu0 %v1802_v56  ;;  %v1556_v54 = vpop.xlane.xlu1 %1555 }
 0x268   : > { %v6216_v44 = vsub.f32 %v5780_v14, %v1624_v39  ;;  %v6219_v7 = vsub.f32 %v5783_v18, %v1624_v39  ;;  %v1625_v8 = vmul.f32 0.00390625, %v1556_v54 }
 0x26a   : > { %v6222_v62 = vsub.f32 %v5786_v21, %v1625_v8  ;;  %v6225_v4 = vsub.f32 %v5789_v24, %v1625_v8  ;;  %1806 = vadd.xlane.f32.xlu1 %v1805_v60  ;;  %v1732_v0 = vmul.f32 %v6216_v44, %v6216_v44  ;;  %v1733_v14 = vmul.f32 %v6219_v7, %v6219_v7 }
 0x26c   : > { %v1808_v56 = vadd.f32 %v1733_v14, %v1732_v0  ;;  %v1734_v18 = vmul.f32 %v6222_v62, %v6222_v62  ;;  %v1735_v6 = vmul.f32 %v6225_v4, %v6225_v4 }
 0x26d   : > { %v1559_v43 = vpop.xlane.xlu0 %1558 }
 0x26e   : > { %v1626_v21 = vmul.f32 0.00390625, %v1559_v43  ;;  %1809 = vadd.xlane.f32.xlu0 %v1808_v56  ;;  %v1811_v28 = vadd.f32 %v1735_v6, %v1734_v18 }
 0x26f   : > { %v1562_v24 = vpop.xlane.xlu1 %1561 }
 0x270   : > { %v6236_v49 = vsub.f32 %v5796_v31, %v1626_v21  ;;  %v6239_v39 = vsub.f32 %v5799_v35, %v1626_v21  ;;  %v1627_v23 = vmul.f32 0.00390625, %v1562_v24  ;;  %1812 = vadd.xlane.f32.xlu1 %v1811_v28  ;;  %v8152_v21 = vld [vmem:[#allocation7_spill] sm:$0xff] }
 0x272   : > { %8146 = vst [vmem:[#allocation21_spill] sm:$0xff] %v6236_v49  ;;  %8147 = vst [vmem:[#allocation22_spill] sm:$0xff] %v6239_v39  ;;  %v6242_v54 = vsub.f32 %v5802_v38, %v1627_v23  ;;  %v6245_v8 = vsub.f32 %v5805_v41, %v1627_v23  ;;  %v1736_v60 = vmul.f32 %v6236_v49, %v6236_v49  ;;  %v8150_v41 = vld [vmem:[#allocation6_spill] sm:$0xff]  ;;  %v8154_v23 = vld [vmem:[#allocation8_spill] sm:$0xff] }
 0x273   : > { %v1737_v0 = vmul.f32 %v6239_v39, %v6239_v39 }
 0x274   : > { %8148 = vst [vmem:[#allocation23_spill] sm:$0xff] %v6242_v54  ;;  %8149 = vst [vmem:[#allocation24_spill] sm:$0xff] %v6245_v8  ;;  %v1738_v31 = vmul.f32 %v6242_v54, %v6242_v54  ;;  %v1739_v35 = vmul.f32 %v6245_v8, %v6245_v8 }
 0x275   : > { %v1814_v14 = vadd.f32 %v1737_v0, %v1736_v60  ;;  %v1565_v56 = vpop.xlane.xlu0 %1564  ;;  %v8156_v0 = vld [vmem:[#allocation9_spill] sm:$0xff] }
 0x276   : > { %v1628_v18 = vmul.f32 0.00390625, %v1565_v56  ;;  %v1817_v38 = vadd.f32 %v1739_v35, %v1738_v31 }
 0x277   : > { %1815 = vadd.xlane.f32.xlu0 %v1814_v14  ;;  %v1568_v6 = vpop.xlane.xlu1 %1567 }
 0x278   : > { %v6256_v43 = vsub.f32 %v8150_v41, %v1628_v18  ;;  %v6259_v28 = vsub.f32 %v8152_v21, %v1628_v18  ;;  %v1629_v24 = vmul.f32 0.00390625, %v1568_v6  ;;  %1818 = vadd.xlane.f32.xlu1 %v1817_v38 }
 0x27a   : > { %8151 = vst [vmem:[#allocation6_spill] sm:$0xff] %v6256_v43  ;;  %8153 = vst [vmem:[#allocation7_spill] sm:$0xff] %v6259_v28  ;;  %v6262_v60 = vsub.f32 %v8154_v23, %v1629_v24  ;;  %v6265_v54 = vsub.f32 %v8156_v0, %v1629_v24  ;;  %v1740_v56 = vmul.f32 %v6256_v43, %v6256_v43  ;;  %v8158_v24 = vld [vmem:[#allocation10_spill] sm:$0xff]  ;;  %v8160_v0 = vld [vmem:[#allocation11_spill] sm:$0xff] }
 0x27b   : > { %v1741_v14 = vmul.f32 %v6259_v28, %v6259_v28 }
 0x27c   : > { %8155 = vst [vmem:[#allocation8_spill] sm:$0xff] %v6262_v60  ;;  %8157 = vst [vmem:[#allocation9_spill] sm:$0xff] %v6265_v54  ;;  %v1742_v35 = vmul.f32 %v6262_v60, %v6262_v60  ;;  %v1743_v18 = vmul.f32 %v6265_v54, %v6265_v54  ;;  %v8164_v60 = vld [vmem:[#allocation13_spill] sm:$0xff] }
 0x27d   : > { %v1820_v31 = vadd.f32 %v1741_v14, %v1740_v56  ;;  %v1571_v38 = vpop.xlane.xlu0 %1570  ;;  %v8162_v56 = vld [vmem:[#allocation12_spill] sm:$0xff] }
 0x27e   : > { %v1630_v6 = vmul.f32 0.00390625, %v1571_v38  ;;  %v1823_v41 = vadd.f32 %v1743_v18, %v1742_v35 }
 0x27f   : > { %1821 = vadd.xlane.f32.xlu0 %v1820_v31  ;;  %v1574_v21 = vpop.xlane.xlu1 %1573 }
 0x280   : > { %v6276_v23 = vsub.f32 %v8158_v24, %v1630_v6  ;;  %v6279_v43 = vsub.f32 %v8160_v0, %v1630_v6  ;;  %v1631_v8 = vmul.f32 0.00390625, %v1574_v21  ;;  %1824 = vadd.xlane.f32.xlu1 %v1823_v41 }
 0x282   : > { %8159 = vst [vmem:[#allocation10_spill] sm:$0xff] %v6276_v23  ;;  %8161 = vst [vmem:[#allocation11_spill] sm:$0xff] %v6279_v43  ;;  %v6282_v14 = vsub.f32 %v8162_v56, %v1631_v8  ;;  %v6285_v28 = vsub.f32 %v8164_v60, %v1631_v8  ;;  %v1744_v38 = vmul.f32 %v6276_v23, %v6276_v23  ;;  %v8166_v8 = vld [vmem:[#allocation14_spill] sm:$0xff]  ;;  %v8168_v56 = vld [vmem:[#allocation15_spill] sm:$0xff] }
 0x283   : > { %v1745_v31 = vmul.f32 %v6279_v43, %v6279_v43 }
 0x284   : > { %8163 = vst [vmem:[#allocation12_spill] sm:$0xff] %v6282_v14  ;;  %8165 = vst [vmem:[#allocation13_spill] sm:$0xff] %v6285_v28  ;;  %v1746_v18 = vmul.f32 %v6282_v14, %v6282_v14  ;;  %v1747_v6 = vmul.f32 %v6285_v28, %v6285_v28  ;;  %v8172_v14 = vld [vmem:[#allocation17_spill] sm:$0xff]  ;;  %v8174_v28 = vld [vmem:[#allocation3_spill] sm:$0xff] }
 0x285   : > { %v1826_v35 = vadd.f32 %v1745_v31, %v1744_v38  ;;  %v1577_v41 = vpop.xlane.xlu0 %1576  ;;  %v8170_v38 = vld [vmem:[#allocation16_spill] sm:$0xff] }
 0x286   : > { %v1632_v21 = vmul.f32 0.00390625, %v1577_v41  ;;  %v1829_v24 = vadd.f32 %v1747_v6, %v1746_v18 }
 0x287   : > { %1827 = vadd.xlane.f32.xlu0 %v1826_v35  ;;  %v1580_v0 = vpop.xlane.xlu1 %1579 }
 0x288   : > { %v6296_v60 = vsub.f32 %v8166_v8, %v1632_v21  ;;  %v6299_v23 = vsub.f32 %v8168_v56, %v1632_v21  ;;  %v1633_v54 = vmul.f32 0.00390625, %v1580_v0  ;;  %1830 = vadd.xlane.f32.xlu1 %v1829_v24 }
 0x28a   : > { %8167 = vst [vmem:[#allocation14_spill] sm:$0xff] %v6296_v60  ;;  %8169 = vst [vmem:[#allocation15_spill] sm:$0xff] %v6299_v23  ;;  %v6302_v31 = vsub.f32 %v8170_v38, %v1633_v54  ;;  %v6305_v43 = vsub.f32 %v8172_v14, %v1633_v54  ;;  %v1748_v41 = vmul.f32 %v6296_v60, %v6296_v60 }
 0x28b   : > { %v1749_v35 = vmul.f32 %v6299_v23, %v6299_v23  ;;  %v6316_v23 = vsub.s32 1, %v8174_v28 }
 0x28c   : > { %8171 = vst [vmem:[#allocation16_spill] sm:$0xff] %v6302_v31  ;;  %8173 = vst [vmem:[#allocation17_spill] sm:$0xff] %v6305_v43  ;;  %v1750_v6 = vmul.f32 %v6302_v31, %v6302_v31  ;;  %v1751_v21 = vmul.f32 %v6305_v43, %v6305_v43 }
 0x28d   : > { %v1832_v18 = vadd.f32 %v1749_v35, %v1748_v41  ;;  %8175 = vst [vmem:[#allocation25_spill] sm:$0xff] %v6316_v23  ;;  %v8084_v41 = vsub.s32 5, %v8174_v28 }
 0x28e   : > { %v1835_v24 = vadd.f32 %v1751_v21, %v1750_v6  ;;  %v8087_v6 = vsub.s32 6, %v8174_v28 }
 0x28f   : > { %1833 = vadd.xlane.f32.xlu0 %v1832_v18 }
 0x290   : > { %1836 = vadd.xlane.f32.xlu1 %v1835_v24 }
 0x2cb   : > { %v1774_v0 = vpop.xlane.xlu0 %1773 }
 0x2cc   : > { %v1868_v8 = vmul.f32 0.00390625, %v1774_v0  ;;  %v6327_v0 = vsub.s32 2, %v8174_v28 }
 0x2ce   : > { %v1900_v54 = vadd.f32 1e-05, %v1868_v8  ;;  %8178 = vst [vmem:[#allocation28_spill] sm:$0xff] %v6327_v0 }
 0x2cf   : > { %v1777_v14 = vpop.xlane.xlu1 %1776  ;;  %v1583_v56 = vpop.xlane.xlu0 %1582 }
 0x2d0   : > { %5136 = vrsqrt.f32 %v1900_v54  ;;  %v1869_v38 = vmul.f32 0.00390625, %v1777_v14  ;;  %v1634_v60 = vmul.f32 0.00390625, %v1583_v56 }
 0x2d2   : > { %v1901_v35 = vadd.f32 1e-05, %v1869_v38  ;;  %v6320_v31 = vsub.f32 %v5965_v53, %v1634_v60  ;;  %v6323_v18 = vsub.f32 %v5969_v57, %v1634_v60  ;;  %v8179_v57 = vld [vmem:[#allocation5_spill] sm:$0xff] }
 0x2d3   : > { %v1586_v21 = vpop.xlane.xlu1 %1585  ;;  %v1780_v24 = vpop.xlane.xlu0 %1779  ;;  %v2035_v60 = vrot.slane %v8179_v57, %v8084_v41  ;;  %v2031_v56 = vrot.slane %v8179_v57, %v6316_v23  ;;  %v2113_v41 = vrot.slane %v8179_v57, %v6327_v0 }
 0x2d4   : > { %8176 = vst [vmem:[#allocation26_spill] sm:$0xff] %v6320_v31  ;;  %8177 = vst [vmem:[#allocation27_spill] sm:$0xff] %v6323_v18  ;;  %5138 = vrsqrt.f32 %v1901_v35  ;;  %v1635_v8 = vmul.f32 0.00390625, %v1586_v21  ;;  %v1870_v54 = vmul.f32 0.00390625, %v1780_v24  ;;  %v1752_v14 = vmul.f32 %v6320_v31, %v6320_v31 }
 0x2d5   : > { %v1753_v53 = vmul.f32 %v6323_v18, %v6323_v18  ;;  %v2117_v24 = vrot.slane %v8179_v57, %v8087_v6 }
 0x2d6   : > { %v6339_v38 = vsub.f32 %v5983_v61, %v1635_v8  ;;  %v6342_v35 = vsub.f32 %v5987_v15, %v1635_v8  ;;  %v1902_v21 = vadd.f32 1e-05, %v1870_v54  ;;  %v6354_v8 = vrot.slane %v2035_v60, %v6316_v23  ;;  %v8180_v60 = vld [vmem:[#allocation18_spill] sm:$0xff] }
 0x2d7   : > { %v1783_v31 = vpop.xlane.xlu1 %1782  ;;  %v1589_v18 = vpop.xlane.xlu0 %1588  ;;  %v1838_v43 = vadd.f32 %v1753_v53, %v1752_v14  ;;  %v6357_v54 = vrot.slane %v2031_v56, %v6316_v23  ;;  %v6371_v56 = vrot.slane %v2113_v41, %v6327_v0 }
 0x2d8   : > { %5140 = vrsqrt.f32 %v1902_v21  ;;  %v1871_v49 = vmul.f32 0.00390625, %v1783_v31  ;;  %v1636_v39 = vmul.f32 0.00390625, %v1589_v18  ;;  %v1754_v61 = vmul.f32 %v6339_v38, %v6339_v38 }
 0x2d9   : > { %1839 = vadd.xlane.f32.xlu0 %v1838_v43  ;;  %v1755_v15 = vmul.f32 %v6342_v35, %v6342_v35  ;;  %v6366_v18 = vrot.slane %v2117_v24, %v6327_v0 }
 0x2da   : > { %v5137_v14 = vpop.eup %5136  ;;  %v1903_v53 = vadd.f32 1e-05, %v1871_v49  ;;  %v6360_v57 = vsub.f32 %v6003_v20, %v1636_v39  ;;  %v6363_v31 = vsub.f32 %v6007_v22, %v1636_v39 }
 0x2db   : > { %v1592_v43 = vpop.xlane.xlu1 %1591  ;;  %v1841_v21 = vadd.f32 %v1755_v15, %v1754_v61  ;;  %v1965_v6 = vmul.f32 %v5137_v14, %v5957_v55  ;;  %v1964_v28 = vmul.f32 %v5137_v14, %v8180_v60 }
 0x2dc   : > { %5142 = vrsqrt.f32 %v1903_v53  ;;  %v1637_v49 = vmul.f32 0.00390625, %v1592_v43  ;;  %v1786_v23 = vpop.xlane.xlu0 %1785  ;;  %v1756_v20 = vmul.f32 %v6360_v57, %v6360_v57  ;;  %v1757_v22 = vmul.f32 %v6363_v31, %v6363_v31 }
 0x2dd   : > { %v1872_v39 = vmul.f32 0.00390625, %v1786_v23  ;;  %1842 = vadd.xlane.f32.xlu1 %v1841_v21  ;;  %v2047_v24 = vmul.f32 %v6354_v8, %v1965_v6  ;;  %v2046_v55 = vmul.f32 %v6357_v54, %v1964_v28 }
 0x2de   : > { %v5139_v61 = vpop.eup %5138  ;;  %v6380_v15 = vsub.f32 %v6023_v25, %v1637_v49  ;;  %v6383_v41 = vsub.f32 %v6027_v26, %v1637_v49  ;;  %v1844_v14 = vadd.f32 %v1757_v22, %v1756_v20 }
 0x2df   : > { %v1904_v53 = vadd.f32 1e-05, %v1872_v39  ;;  %v1789_v43 = vpop.xlane.xlu1 %1788  ;;  %v1967_v60 = vmul.f32 %v5139_v61, %v5975_v12  ;;  %v2129_v0 = vadd.f32 %v6366_v18, %v2047_v24  ;;  %v1966_v23 = vmul.f32 %v5139_v61, %v5972_v10 }
 0x2e0   : > { %8181 = vst [vmem:[#allocation5_spill] sm:$0xff] %v6380_v15  ;;  %v1873_v21 = vmul.f32 0.00390625, %v1789_v43  ;;  %v1595_v6 = vpop.xlane.xlu0 %1594  ;;  %1845 = vadd.xlane.f32.xlu0 %v1844_v14  ;;  %v1758_v28 = vmul.f32 %v6380_v15, %v6380_v15  ;;  %v1759_v25 = vmul.f32 %v6383_v41, %v6383_v41  ;;  %v2128_v26 = vadd.f32 %v6371_v56, %v2046_v55 }
 0x2e1   : > { %5144 = vrsqrt.f32 %v1904_v53  ;;  %v1638_v49 = vmul.f32 0.00390625, %v1595_v6  ;;  %v2049_v20 = vmul.f32 %v6354_v8, %v1967_v60  ;;  %v2193_v12 = vmax.f32 %v2129_v0, 0.0 }
 0x2e2   : > { %v5141_v22 = vpop.eup %5140  ;;  %v1905_v39 = vadd.f32 1e-05, %v1873_v21  ;;  %v1847_v24 = vadd.f32 %v1759_v25, %v1758_v28  ;;  %v2048_v10 = vmul.f32 %v6357_v54, %v1966_v23  ;;  %v2192_v61 = vmax.f32 %v2128_v26, 0.0 }
 0x2e3   : > { %v6396_v14 = vsub.f32 %v6055_v36, %v1638_v49  ;;  %v6399_v43 = vsub.f32 %v6059_v13, %v1638_v49  ;;  %v1598_v15 = vpop.xlane.xlu1 %1597  ;;  %v2131_v55 = vadd.f32 %v6366_v18, %v2049_v20  ;;  %v1969_v53 = vmul.f32 %v5141_v22, %v5993_v48 }
 0x2e4   : > { %5146 = vrsqrt.f32 %v1905_v39  ;;  %v1639_v60 = vmul.f32 0.00390625, %v1598_v15  ;;  %v1792_v0 = vpop.xlane.xlu0 %1791  ;;  %1848 = vadd.xlane.f32.xlu1 %v1847_v24  ;;  %v2130_v21 = vadd.f32 %v6371_v56, %v2048_v10  ;;  %v1968_v23 = vmul.f32 %v5141_v22, %v5990_v16 }
 0x2e5   : > { %8182 = vst [vmem:[#allocation18_spill] sm:$0xff] %v6396_v14  ;;  %v1874_v6 = vmul.f32 0.00390625, %v1792_v0  ;;  %v1760_v36 = vmul.f32 %v6396_v14, %v6396_v14  ;;  %v1761_v13 = vmul.f32 %v6399_v43, %v6399_v43  ;;  %v2195_v28 = vmax.f32 %v2131_v55, 0.0 }
 0x2e6   : > { %v5143_v25 = vpop.eup %5142  ;;  %v6410_v26 = vsub.f32 %v6069_v29, %v1639_v60  ;;  %v6413_v48 = vsub.f32 %v6073_v37, %v1639_v60  ;;  %v2194_v15 = vmax.f32 %v2130_v21, 0.0  ;;  %v2051_v49 = vmul.f32 %v6354_v8, %v1969_v53  ;;  %v8183_v21 = vld [vmem:[#allocation19_spill] sm:$0xff] }
 0x2e7   : > { %v1906_v20 = vadd.f32 1e-05, %v1874_v6  ;;  %v1795_v16 = vpop.xlane.xlu1 %1794  ;;  %v1850_v22 = vadd.f32 %v1761_v13, %v1760_v36  ;;  %v2257_v39 = vpack.c.bf16 %v2195_v28, %v2193_v12  ;;  %v1971_v24 = vmul.f32 %v5143_v25, %v6013_v1 }
 0x2e8   : > { %v1875_v10 = vmul.f32 0.00390625, %v1795_v16  ;;  %v1601_v0 = vpop.xlane.xlu0 %1600  ;;  %v2256_v14 = vpack.c.bf16 %v2194_v15, %v2192_v61  ;;  %v1762_v55 = vmul.f32 %v6410_v26, %v6410_v26  ;;  %v1763_v29 = vmul.f32 %v6413_v48, %v6413_v48 }
 0x2e9   : > { %5148 = vrsqrt.f32 %v1906_v20  ;;  %v1640_v37 = vmul.f32 0.00390625, %v1601_v0  ;;  %1851 = vadd.xlane.f32.xlu0 %v1850_v22  ;;  %2532 = vmatprep.mubr.bf16.mxu1 %v2257_v39  ;;  %v2053_v53 = vmul.f32 %v6354_v8, %v1971_v24  ;;  %v2133_v60 = vadd.f32 %v6366_v18, %v2051_v49 }
 0x2ea   : > { %v1907_v12 = vadd.f32 1e-05, %v1875_v10  ;;  %2533 = vmatmul.mubr.bf16.vlgmr.msra.gmra.mrb[0].mxu1 %v2256_v14  ;;  %v1853_v1 = vadd.f32 %v1763_v29, %v1762_v55  ;;  %v1970_v6 = vmul.f32 %v5143_v25, %v8183_v21  ;;  %v2050_v61 = vmul.f32 %v6357_v54, %v1968_v23 }
 0x2eb   : > { %v5145_v36 = vpop.eup %5144  ;;  %v6426_v13 = vsub.f32 %v6107_v51, %v1640_v37  ;;  %v6429_v28 = vsub.f32 %v6111_v11, %v1640_v37  ;;  %v1604_v15 = vpop.xlane.xlu1 %1603  ;;  %v2135_v20 = vadd.f32 %v6366_v18, %v2053_v53  ;;  %v2197_v16 = vmax.f32 %v2133_v60, 0.0 }
 0x2ec   : > { %5150 = vrsqrt.f32 %v1907_v12  ;;  %v1641_v49 = vmul.f32 0.00390625, %v1604_v15  ;;  %v1798_v22 = vpop.xlane.xlu0 %1797  ;;  %1854 = vadd.xlane.f32.xlu1 %v1853_v1  ;;  %v2052_v14 = vmul.f32 %v6357_v54, %v1970_v6  ;;  %v2132_v25 = vadd.f32 %v6371_v56, %v2050_v61 }
 0x2ed   : > { %v1876_v23 = vmul.f32 0.00390625, %v1798_v22  ;;  %v1764_v51 = vmul.f32 %v6426_v13, %v6426_v13  ;;  %v1765_v11 = vmul.f32 %v6429_v28, %v6429_v28  ;;  %v2199_v39 = vmax.f32 %v2135_v20, 0.0 }
 0x2ee   : > { %v5147_v24 = vpop.eup %5146  ;;  %v6439_v10 = vsub.f32 %v6121_v40, %v1641_v49  ;;  %v6442_v0 = vsub.f32 %v6125_v2, %v1641_v49  ;;  %v2134_v55 = vadd.f32 %v6371_v56, %v2052_v14  ;;  %v2196_v29 = vmax.f32 %v2132_v25, 0.0 }
 0x2ef   : > { %v1908_v37 = vadd.f32 1e-05, %v1876_v23  ;;  %v1801_v53 = vpop.xlane.xlu1 %1800  ;;  %v1856_v60 = vadd.f32 %v1765_v11, %v1764_v51  ;;  %v2259_v12 = vpack.c.bf16 %v2199_v39, %v2197_v16  ;;  %v1973_v1 = vmul.f32 %v5145_v36, %v6035_v59 }
 0x2f0   : > { %v1877_v21 = vmul.f32 0.00390625, %v1801_v53  ;;  %v1607_v6 = vpop.xlane.xlu0 %1606  ;;  %v2198_v61 = vmax.f32 %v2134_v55, 0.0  ;;  %v1766_v15 = vmul.f32 %v6439_v10, %v6439_v10  ;;  %v1767_v40 = vmul.f32 %v6442_v0, %v6442_v0 }
 0x2f1   : > { %5152 = vrsqrt.f32 %v1908_v37  ;;  %v1642_v2 = vmul.f32 0.00390625, %v1607_v6  ;;  %1857 = vadd.xlane.f32.xlu0 %v1856_v60  ;;  %2542 = vmatprep.mubr.bf16.mxu1 %v2259_v12  ;;  %v1975_v20 = vmul.f32 %v5147_v24, %v6041_v27  ;;  %v2055_v49 = vmul.f32 %v6354_v8, %v1973_v1 }
 0x2f2   : > { %v1909_v16 = vadd.f32 1e-05, %v1877_v21  ;;  %v2258_v22 = vpack.c.bf16 %v2198_v61, %v2196_v29  ;;  %v1859_v59 = vadd.f32 %v1767_v40, %v1766_v15  ;;  %v1972_v14 = vmul.f32 %v5145_v36, %v6032_v9  ;;  %v8184_v29 = vld [vmem:[#allocation20_spill] sm:$0xff] }
 0x2f3   : > { %v5149_v25 = vpop.eup %5148  ;;  %v6454_v23 = vsub.f32 %v6159_v47, %v1642_v2  ;;  %v6457_v51 = vsub.f32 %v6163_v3, %v1642_v2  ;;  %v1610_v11 = vpop.xlane.xlu1 %1609  ;;  %v2057_v39 = vmul.f32 %v6354_v8, %v1975_v20  ;;  %v2137_v55 = vadd.f32 %v6366_v18, %v2055_v49 }
 0x2f4   : > { %5154 = vrsqrt.f32 %v1909_v16  ;;  %2543 = vmatmul.mubr.bf16.gmra.mrb[4].mxu1 %v2258_v22  ;;  %v1643_v27 = vmul.f32 0.00390625, %v1610_v11  ;;  %v1804_v37 = vpop.xlane.xlu0 %1803  ;;  %1860 = vadd.xlane.f32.xlu1 %v1859_v59  ;;  %v1974_v53 = vmul.f32 %v5147_v24, %v8184_v29  ;;  %v2054_v9 = vmul.f32 %v6357_v54, %v1972_v14 }
 0x2f5   : > { %v1878_v36 = vmul.f32 0.00390625, %v1804_v37  ;;  %v1768_v47 = vmul.f32 %v6454_v23, %v6454_v23  ;;  %v1769_v3 = vmul.f32 %v6457_v51, %v6457_v51  ;;  %v2139_v60 = vadd.f32 %v6366_v18, %v2057_v39 }
 0x2f6   : > { %v5151_v12 = vpop.eup %5150  ;;  %v6469_v1 = vsub.f32 %v6173_v50, %v1643_v27  ;;  %v6472_v21 = vsub.f32 %v6177_v33, %v1643_v27  ;;  %v2201_v6 = vmax.f32 %v2137_v55, 0.0  ;;  %v2056_v24 = vmul.f32 %v6357_v54, %v1974_v53 }
 0x2f7   : > { %v1910_v61 = vadd.f32 1e-05, %v1878_v36  ;;  %v1807_v15 = vpop.xlane.xlu1 %1806  ;;  %v1862_v40 = vadd.f32 %v1769_v3, %v1768_v47  ;;  %v2203_v2 = vmax.f32 %v2139_v60, 0.0  ;;  %v2136_v20 = vadd.f32 %v6371_v56, %v2054_v9 }
 0x2f8   : > { %v1879_v49 = vmul.f32 0.00390625, %v1807_v15  ;;  %v2138_v16 = vadd.f32 %v6371_v56, %v2056_v24  ;;  %v1770_v22 = vmul.f32 %v6469_v1, %v6469_v1  ;;  %v1771_v50 = vmul.f32 %v6472_v21, %v6472_v21 }
 0x2f9   : > { %5156 = vrsqrt.f32 %v1910_v61  ;;  %1863 = vadd.xlane.f32.xlu0 %v1862_v40  ;;  %v2261_v33 = vpack.c.bf16 %v2203_v2, %v2201_v6  ;;  %v2200_v59 = vmax.f32 %v2136_v20, 0.0  ;;  %v1977_v14 = vmul.f32 %v5149_v25, %v6079_v32 }
 0x2fa   : > { %v1911_v11 = vadd.f32 1e-05, %v1879_v49  ;;  %v2202_v39 = vmax.f32 %v2138_v16, 0.0  ;;  %v1865_v55 = vadd.f32 %v1771_v50, %v1770_v22  ;;  %v1979_v27 = vmul.f32 %v5151_v12, %v6090_v63 }
 0x2fb   : > { %v5153_v37 = vpop.eup %5152  ;;  %2552 = vmatprep.mubr.bf16.mxu1 %v2261_v33  ;;  %v1810_v29 = vpop.xlane.xlu0 %1809  ;;  %v2059_v53 = vmul.f32 %v6354_v8, %v1977_v14  ;;  %v1976_v9 = vmul.f32 %v5149_v25, %v6076_v30  ;;  %v1978_v36 = vmul.f32 %v5151_v12, %v6087_v5 }
 0x2fc   : > { %5158 = vrsqrt.f32 %v1911_v11  ;;  %v2260_v47 = vpack.c.bf16 %v2202_v39, %v2200_v59  ;;  %v1880_v3 = vmul.f32 0.00390625, %v1810_v29  ;;  %1866 = vadd.xlane.f32.xlu1 %v1865_v55  ;;  %v2061_v32 = vmul.f32 %v6354_v8, %v1979_v27 }
 0x2fd   : > { %v1813_v60 = vpop.xlane.xlu1 %1812  ;;  %v2141_v6 = vadd.f32 %v6366_v18, %v2059_v53  ;;  %v2058_v63 = vmul.f32 %v6357_v54, %v1976_v9  ;;  %v2060_v24 = vmul.f32 %v6357_v54, %v1978_v36  ;;  %v1981_v61 = vmul.f32 %v5153_v37, %v6131_v58 }
 0x2fe   : > { %v5155_v15 = vpop.eup %5154  ;;  %2553 = vmatmul.mubr.bf16.gmra.mrb[8].mxu1 %v2260_v47  ;;  %v1912_v30 = vadd.f32 1e-05, %v1880_v3  ;;  %v1881_v25 = vmul.f32 0.00390625, %v1813_v60  ;;  %v2143_v5 = vadd.f32 %v6366_v18, %v2061_v32  ;;  %v1980_v12 = vmul.f32 %v5153_v37, %v6128_v42 }
 0x2ff   : > { %v2205_v40 = vmax.f32 %v2141_v6, 0.0  ;;  %v2140_v2 = vadd.f32 %v6371_v56, %v2058_v63  ;;  %v2142_v20 = vadd.f32 %v6371_v56, %v2060_v24  ;;  %v1983_v49 = vmul.f32 %v5155_v15, %v6142_v19 }
 0x300   : > { %5160 = vrsqrt.f32 %v1912_v30  ;;  %v1913_v16 = vadd.f32 1e-05, %v1881_v25  ;;  %v2207_v22 = vmax.f32 %v2143_v5, 0.0  ;;  %v2063_v58 = vmul.f32 %v6354_v8, %v1981_v61 }
 0x301   : > { %v2204_v50 = vmax.f32 %v2140_v2, 0.0  ;;  %v2206_v33 = vmax.f32 %v2142_v20, 0.0  ;;  %v2065_v59 = vmul.f32 %v6354_v8, %v1983_v49  ;;  %v1982_v14 = vmul.f32 %v5155_v15, %v6139_v34 }
 0x302   : > { %5162 = vrsqrt.f32 %v1913_v16  ;;  %v2263_v42 = vpack.c.bf16 %v2207_v22, %v2205_v40  ;;  %v2145_v11 = vadd.f32 %v6366_v18, %v2063_v58  ;;  %v2062_v39 = vmul.f32 %v6357_v54, %v1980_v12 }
 0x303   : > { %v5157_v55 = vpop.eup %5156  ;;  %v2262_v27 = vpack.c.bf16 %v2206_v33, %v2204_v50  ;;  %v2147_v37 = vadd.f32 %v6366_v18, %v2065_v59  ;;  %v2064_v29 = vmul.f32 %v6357_v54, %v1982_v14 }
 0x304   : > { %v1816_v19 = vpop.xlane.xlu0 %1815  ;;  %2562 = vmatprep.mubr.bf16.mxu1 %v2263_v42  ;;  %v2144_v9 = vadd.f32 %v6371_v56, %v2062_v39  ;;  %v1985_v36 = vmul.f32 %v5157_v55, %v6183_v46  ;;  %v2209_v47 = vmax.f32 %v2145_v11, 0.0  ;;  %v1984_v60 = vmul.f32 %v5157_v55, %v6180_v52 }
 0x305   : > { %v1882_v53 = vmul.f32 0.00390625, %v1816_v19  ;;  %v1819_v34 = vpop.xlane.xlu1 %1818  ;;  %v2211_v3 = vmax.f32 %v2147_v37, 0.0  ;;  %v2146_v32 = vadd.f32 %v6371_v56, %v2064_v29 }
 0x306   : > { %v5159_v6 = vpop.eup %5158  ;;  %2563 = vmatmul.mubr.bf16.gmra.mrb[12].mxu1 %v2262_v27  ;;  %v1883_v24 = vmul.f32 0.00390625, %v1819_v34  ;;  %v2208_v61 = vmax.f32 %v2144_v9, 0.0  ;;  %v2067_v15 = vmul.f32 %v6354_v8, %v1985_v36  ;;  %v2066_v2 = vmul.f32 %v6357_v54, %v1984_v60 }
 0x307   : > { %v1914_v63 = vadd.f32 1e-05, %v1882_v53  ;;  %v2265_v30 = vpack.c.bf16 %v2211_v3, %v2209_v47  ;;  %v2210_v25 = vmax.f32 %v2146_v32, 0.0  ;;  %v1987_v5 = vmul.f32 %v5159_v6, %v6194_v45 }
 0x308   : > { %v1986_v46 = vmul.f32 %v5159_v6, %v6191_v17  ;;  %v1915_v12 = vadd.f32 1e-05, %v1883_v24  ;;  %v2149_v40 = vadd.f32 %v6366_v18, %v2067_v15  ;;  %v2148_v14 = vadd.f32 %v6371_v56, %v2066_v2  ;;  %v8185_v24 = vld [vmem:[#allocation22_spill] sm:$0xff]  ;;  %v8187_v2 = vld [vmem:[#allocation24_spill] sm:$0xff] }
 0x309   : > { %5164 = vrsqrt.f32 %v1914_v63  ;;  %2572 = vmatprep.mubr.bf16.mxu1 %v2265_v30  ;;  %v2069_v52 = vmul.f32 %v6354_v8, %v1987_v5  ;;  %v2264_v16 = vpack.c.bf16 %v2210_v25, %v2208_v61  ;;  %v8186_v5 = vld [vmem:[#allocation21_spill] sm:$0xff] }
 0x30a   : > { %v2068_v20 = vmul.f32 %v6357_v54, %v1986_v46  ;;  %v5161_v49 = vpop.eup %5160  ;;  %5166 = vrsqrt.f32 %v1915_v12  ;;  %v2213_v59 = vmax.f32 %v2149_v40, 0.0  ;;  %v2212_v47 = vmax.f32 %v2148_v14, 0.0 }
 0x30b   : > { %v2151_v58 = vadd.f32 %v6366_v18, %v2069_v52  ;;  %v1989_v17 = vmul.f32 %v5161_v49, %v6219_v7  ;;  %v1988_v27 = vmul.f32 %v5161_v49, %v6216_v44  ;;  %v8188_v49 = vld [vmem:[#allocation23_spill] sm:$0xff] }
 0x30c   : > { %v1822_v22 = vpop.xlane.xlu0 %1821  ;;  %v2150_v45 = vadd.f32 %v6371_v56, %v2068_v20  ;;  %v5163_v50 = vpop.eup %5162 }
 0x30d   : > { %v1884_v33 = vmul.f32 0.00390625, %v1822_v22  ;;  %v1825_v42 = vpop.xlane.xlu1 %1824  ;;  %v2215_v11 = vmax.f32 %v2151_v58, 0.0  ;;  %v1991_v39 = vmul.f32 %v5163_v50, %v6225_v4  ;;  %v2071_v55 = vmul.f32 %v6354_v8, %v1989_v17 }
 0x30e   : > { %2573 = vmatmul.mubr.bf16.gmra.mrb[16].mxu1 %v2264_v16  ;;  %v1885_v37 = vmul.f32 0.00390625, %v1825_v42  ;;  %v2214_v29 = vmax.f32 %v2150_v45, 0.0  ;;  %v1990_v53 = vmul.f32 %v5163_v50, %v6222_v62  ;;  %v2070_v60 = vmul.f32 %v6357_v54, %v1988_v27 }
 0x30f   : > { %v1916_v19 = vadd.f32 1e-05, %v1884_v33  ;;  %v2267_v7 = vpack.c.bf16 %v2215_v11, %v2213_v59  ;;  %v2073_v9 = vmul.f32 %v6354_v8, %v1991_v39  ;;  %v2153_v36 = vadd.f32 %v6366_v18, %v2071_v55 }
 0x310   : > { %v1917_v34 = vadd.f32 1e-05, %v1885_v37  ;;  %v2072_v4 = vmul.f32 %v6357_v54, %v1990_v53  ;;  %v2266_v32 = vpack.c.bf16 %v2214_v29, %v2212_v47  ;;  %v2152_v45 = vadd.f32 %v6371_v56, %v2070_v60  ;;  %v8189_v29 = vld [vmem:[#allocation7_spill] sm:$0xff] }
 0x311   : > { %5168 = vrsqrt.f32 %v1916_v19  ;;  %2582 = vmatprep.mubr.bf16.mxu1 %v2267_v7  ;;  %v2155_v3 = vadd.f32 %v6366_v18, %v2073_v9  ;;  %v2217_v62 = vmax.f32 %v2153_v36, 0.0 }
 0x312   : > { %5170 = vrsqrt.f32 %v1917_v34  ;;  %v2154_v25 = vadd.f32 %v6371_v56, %v2072_v4  ;;  %v2216_v55 = vmax.f32 %v2152_v45, 0.0 }
 0x313   : > { %v5165_v44 = vpop.eup %5164  ;;  %v2219_v63 = vmax.f32 %v2155_v3, 0.0 }
 0x314   : > { %v1828_v6 = vpop.xlane.xlu0 %1827  ;;  %v1993_v61 = vmul.f32 %v5165_v44, %v8185_v24  ;;  %v5167_v15 = vpop.eup %5166  ;;  %v1992_v46 = vmul.f32 %v5165_v44, %v8186_v5  ;;  %v2218_v59 = vmax.f32 %v2154_v25, 0.0  ;;  %v8190_v44 = vld [vmem:[#allocation9_spill] sm:$0xff] }
 0x315   : > { %v1886_v30 = vmul.f32 0.00390625, %v1828_v6  ;;  %v1831_v12 = vpop.xlane.xlu1 %1830  ;;  %v2269_v40 = vpack.c.bf16 %v2219_v63, %v2217_v62  ;;  %v1995_v52 = vmul.f32 %v5167_v15, %v8187_v2  ;;  %v1994_v16 = vmul.f32 %v5167_v15, %v8188_v49  ;;  %v8191_v63 = vld [vmem:[#allocation6_spill] sm:$0xff] }
 0x316   : > { %v2075_v20 = vmul.f32 %v6354_v8, %v1993_v61  ;;  %2583 = vmatmul.mubr.bf16.gmra.mrb[20].mxu1 %v2266_v32  ;;  %v1887_v58 = vmul.f32 0.00390625, %v1831_v12  ;;  %v2074_v11 = vmul.f32 %v6357_v54, %v1992_v46  ;;  %v2268_v9 = vpack.c.bf16 %v2218_v59, %v2216_v55  ;;  %v8192_v61 = vld [vmem:[#allocation8_spill] sm:$0xff]  ;;  %v8194_v59 = vld [vmem:[#allocation13_spill] sm:$0xff] }
 0x317   : > { %v1918_v22 = vadd.f32 1e-05, %v1886_v30  ;;  %2592 = vmatprep.mubr.bf16.mxu1 %v2269_v40  ;;  %v2077_v17 = vmul.f32 %v6354_v8, %v1995_v52  ;;  %v2076_v14 = vmul.f32 %v6357_v54, %v1994_v16 }
 0x318   : > { %v2157_v50 = vadd.f32 %v6366_v18, %v2075_v20  ;;  %v1919_v33 = vadd.f32 1e-05, %v1887_v58  ;;  %v2156_v3 = vadd.f32 %v6371_v56, %v2074_v11  ;;  %v8195_v11 = vld [vmem:[#allocation12_spill] sm:$0xff] }
 0x319   : > { %5172 = vrsqrt.f32 %v1918_v22  ;;  %v2159_v42 = vadd.f32 %v6366_v18, %v2077_v17  ;;  %v2158_v34 = vadd.f32 %v6371_v56, %v2076_v14  ;;  %v8193_v22 = vld [vmem:[#allocation11_spill] sm:$0xff] }
 0x31a   : > { %5174 = vrsqrt.f32 %v1919_v33  ;;  %v2221_v19 = vmax.f32 %v2157_v50, 0.0  ;;  %v2220_v52 = vmax.f32 %v2156_v3, 0.0 }
 0x31b   : > { %v5169_v39 = vpop.eup %5168  ;;  %v2223_v37 = vmax.f32 %v2159_v42, 0.0  ;;  %v2222_v46 = vmax.f32 %v2158_v34, 0.0 }
 0x31c   : > { %v1834_v27 = vpop.xlane.xlu0 %1833  ;;  %v1997_v53 = vmul.f32 %v5169_v39, %v8189_v29  ;;  %v5171_v7 = vpop.eup %5170  ;;  %v1996_v24 = vmul.f32 %v5169_v39, %v8191_v63 }
 0x31d   : > { %v1888_v36 = vmul.f32 0.00390625, %v1834_v27  ;;  %v1837_v47 = vpop.xlane.xlu1 %1836  ;;  %v2271_v4 = vpack.c.bf16 %v2223_v37, %v2221_v19  ;;  %v1999_v32 = vmul.f32 %v5171_v7, %v8190_v44  ;;  %v1998_v15 = vmul.f32 %v5171_v7, %v8192_v61  ;;  %v8196_v27 = vld [vmem:[#allocation10_spill] sm:$0xff]  ;;  %v8197_v44 = vld [vmem:[#allocation15_spill] sm:$0xff] }
 0x31e   : > { %v2079_v60 = vmul.f32 %v6354_v8, %v1997_v53  ;;  %2593 = vmatmul.mubr.bf16.gmra.mrb[24].mxu1 %v2268_v9  ;;  %v1889_v62 = vmul.f32 0.00390625, %v1837_v47  ;;  %v2078_v20 = vmul.f32 %v6357_v54, %v1996_v24  ;;  %v2270_v17 = vpack.c.bf16 %v2222_v46, %v2220_v52  ;;  %v8198_v24 = vld [vmem:[#allocation17_spill] sm:$0xff]  ;;  %v8200_v46 = vld [vmem:[#allocation16_spill] sm:$0xff] }
 0x31f   : > { %v1920_v6 = vadd.f32 1e-05, %v1888_v36  ;;  %2602 = vmatprep.mubr.bf16.mxu1 %v2271_v4  ;;  %v2081_v30 = vmul.f32 %v6354_v8, %v1999_v32  ;;  %v2080_v12 = vmul.f32 %v6357_v54, %v1998_v15 }
 0x320   : > { %v2161_v25 = vadd.f32 %v6366_v18, %v2079_v60  ;;  %v1921_v5 = vadd.f32 1e-05, %v1889_v62  ;;  %v2160_v55 = vadd.f32 %v6371_v56, %v2078_v20 }
 0x321   : > { %5176 = vrsqrt.f32 %v1920_v6  ;;  %v2163_v40 = vadd.f32 %v6366_v18, %v2081_v30  ;;  %v2162_v50 = vadd.f32 %v6371_v56, %v2080_v12 }
 0x322   : > { %5178 = vrsqrt.f32 %v1921_v5  ;;  %v2225_v49 = vmax.f32 %v2161_v25, 0.0  ;;  %v2224_v34 = vmax.f32 %v2160_v55, 0.0  ;;  %v8199_v25 = vld [vmem:[#allocation14_spill] sm:$0xff] }
 0x323   : > { %v5173_v2 = vpop.eup %5172  ;;  %v2227_v16 = vmax.f32 %v2163_v40, 0.0  ;;  %v2226_v53 = vmax.f32 %v2162_v50, 0.0 }
 0x324   : > { %v2001_v58 = vmul.f32 %v5173_v2, %v8193_v22  ;;  %v5175_v45 = vpop.eup %5174  ;;  %v2000_v19 = vmul.f32 %v5173_v2, %v8196_v27 }
 0x325   : > { %v2273_v33 = vpack.c.bf16 %v2227_v16, %v2225_v49  ;;  %v2003_v14 = vmul.f32 %v5175_v45, %v8194_v59  ;;  %v2002_v39 = vmul.f32 %v5175_v45, %v8195_v11  ;;  %v2272_v6 = vpack.c.bf16 %v2226_v53, %v2224_v34 }
 0x326   : > { %v2083_v42 = vmul.f32 %v6354_v8, %v2001_v58  ;;  %2603 = vmatmul.mubr.bf16.gmra.mrb[28].mxu1 %v2270_v17  ;;  %v2082_v47 = vmul.f32 %v6357_v54, %v2000_v19 }
 0x327   : > { %2612 = vmatprep.mubr.bf16.mxu1 %v2273_v33  ;;  %v2085_v37 = vmul.f32 %v6354_v8, %v2003_v14  ;;  %v2084_v7 = vmul.f32 %v6357_v54, %v2002_v39 }
 0x328   : > { %v2165_v29 = vadd.f32 %v6366_v18, %v2083_v42  ;;  %v2164_v30 = vadd.f32 %v6371_v56, %v2082_v47 }
 0x329   : > { %v2167_v9 = vadd.f32 %v6366_v18, %v2085_v37  ;;  %v2166_v62 = vadd.f32 %v6371_v56, %v2084_v7 }
 0x32a   : > { %v2229_v4 = vmax.f32 %v2165_v29, 0.0  ;;  %v2228_v16 = vmax.f32 %v2164_v30, 0.0 }
 0x32b   : > { %v5177_v36 = vpop.eup %5176  ;;  %v2231_v3 = vmax.f32 %v2167_v9, 0.0  ;;  %v2230_v52 = vmax.f32 %v2166_v62, 0.0 }
 0x32c   : > { %v2005_v32 = vmul.f32 %v5177_v36, %v8197_v44  ;;  %v5179_v60 = vpop.eup %5178  ;;  %v2004_v5 = vmul.f32 %v5177_v36, %v8199_v25  ;;  %v8201_v44 = vld [vmem:[#allocation27_spill] sm:$0xff] }
 0x32d   : > { %v2275_v63 = vpack.c.bf16 %v2231_v3, %v2229_v4  ;;  %v2007_v61 = vmul.f32 %v5179_v60, %v8198_v24  ;;  %v2006_v12 = vmul.f32 %v5179_v60, %v8200_v46  ;;  %v2274_v17 = vpack.c.bf16 %v2230_v52, %v2228_v16  ;;  %v8202_v60 = vld [vmem:[#allocation26_spill] sm:$0xff] }
 0x32e   : > { %v2087_v15 = vmul.f32 %v6354_v8, %v2005_v32  ;;  %2613 = vmatmul.mubr.bf16.gmra.mrb[32].mxu1 %v2272_v6  ;;  %v2086_v22 = vmul.f32 %v6357_v54, %v2004_v5 }
 0x32f   : > { %2622 = vmatprep.mubr.bf16.mxu1 %v2275_v63  ;;  %v2089_v40 = vmul.f32 %v6354_v8, %v2007_v61  ;;  %v2088_v20 = vmul.f32 %v6357_v54, %v2006_v12 }
 0x330   : > { %v2169_v2 = vadd.f32 %v6366_v18, %v2087_v15  ;;  %v2168_v59 = vadd.f32 %v6371_v56, %v2086_v22 }
 0x331   : > { %v2171_v49 = vadd.f32 %v6366_v18, %v2089_v40  ;;  %v2170_v50 = vadd.f32 %v6371_v56, %v2088_v20 }
 0x332   : > { %v2233_v58 = vmax.f32 %v2169_v2, 0.0  ;;  %v2232_v42 = vmax.f32 %v2168_v59, 0.0 }
 0x333   : > { %v2235_v45 = vmax.f32 %v2171_v49, 0.0  ;;  %v2234_v14 = vmax.f32 %v2170_v50, 0.0 }
 0x335   : > { %v2277_v33 = vpack.c.bf16 %v2235_v45, %v2233_v58  ;;  %v2276_v11 = vpack.c.bf16 %v2234_v14, %v2232_v42 }
 0x336   : > { %2623 = vmatmul.mubr.bf16.gmra.mrb[36].mxu1 %v2274_v17 }
 0x337   : > { %2632 = vmatprep.mubr.bf16.mxu1 %v2277_v33 }
 0x33e   : > { %2633 = vmatmul.mubr.bf16.gmra.mrb[40].mxu1 %v2276_v11 }
 0x366   : > { %v1840_v39 = vpop.xlane.xlu0 %1839 }
 0x367   : > { %v1890_v55 = vmul.f32 0.00390625, %v1840_v39 }
 0x369   : > { %v1922_v27 = vadd.f32 1e-05, %v1890_v55  ;;  %v8203_v55 = vld [vmem:[#allocation5_spill] sm:$0xff] }
 0x36a   : > { %v1843_v19 = vpop.xlane.xlu1 %1842 }
 0x36b   : > { %5180 = vrsqrt.f32 %v1922_v27  ;;  %v1891_v37 = vmul.f32 0.00390625, %v1843_v19 }
 0x36d   : > { %v1923_v29 = vadd.f32 1e-05, %v1891_v37  ;;  %v1846_v53 = vpop.xlane.xlu0 %1845 }
 0x36e   : > { %v1892_v7 = vmul.f32 0.00390625, %v1846_v53 }
 0x36f   : > { %5182 = vrsqrt.f32 %v1923_v29 }
 0x370   : > { %v1924_v9 = vadd.f32 1e-05, %v1892_v7 }
 0x371   : > { %v1849_v36 = vpop.xlane.xlu1 %1848 }
 0x372   : > { %5184 = vrsqrt.f32 %v1924_v9  ;;  %v1893_v34 = vmul.f32 0.00390625, %v1849_v36 }
 0x374   : > { %v1925_v47 = vadd.f32 1e-05, %v1893_v34 }
 0x375   : > { %v5181_v4 = vpop.eup %5180 }
 0x376   : > { %5186 = vrsqrt.f32 %v1925_v47  ;;  %v1852_v3 = vpop.xlane.xlu0 %1851  ;;  %v2009_v32 = vmul.f32 %v5181_v4, %v8201_v44  ;;  %v2008_v6 = vmul.f32 %v5181_v4, %v8202_v60  ;;  %v8204_v60 = vld [vmem:[#allocation18_spill] sm:$0xff] }
 0x377   : > { %v1894_v62 = vmul.f32 0.00390625, %v1852_v3 }
 0x378   : > { %v2091_v63 = vmul.f32 %v6354_v8, %v2009_v32  ;;  %v2090_v24 = vmul.f32 %v6357_v54, %v2008_v6 }
 0x379   : > { %v5183_v61 = vpop.eup %5182  ;;  %v1926_v15 = vadd.f32 1e-05, %v1894_v62  ;;  %v1855_v30 = vpop.xlane.xlu1 %1854 }
 0x37a   : > { %v1895_v25 = vmul.f32 0.00390625, %v1855_v30  ;;  %v2011_v5 = vmul.f32 %v5183_v61, %v6342_v35  ;;  %v2010_v46 = vmul.f32 %v5183_v61, %v6339_v38  ;;  %v2173_v12 = vadd.f32 %v6366_v18, %v2091_v63 }
 0x37b   : > { %5188 = vrsqrt.f32 %v1926_v15  ;;  %v2172_v49 = vadd.f32 %v6371_v56, %v2090_v24 }
 0x37c   : > { %v5185_v40 = vpop.eup %5184  ;;  %v1927_v2 = vadd.f32 1e-05, %v1895_v25  ;;  %v2093_v52 = vmul.f32 %v6354_v8, %v2011_v5  ;;  %v2092_v20 = vmul.f32 %v6357_v54, %v2010_v46  ;;  %v2237_v59 = vmax.f32 %v2173_v12, 0.0 }
 0x37d   : > { %v2013_v16 = vmul.f32 %v5185_v40, %v6363_v31  ;;  %v2012_v22 = vmul.f32 %v5185_v40, %v6360_v57  ;;  %v2236_v42 = vmax.f32 %v2172_v49, 0.0 }
 0x37e   : > { %5190 = vrsqrt.f32 %v1927_v2  ;;  %v1858_v58 = vpop.xlane.xlu0 %1857  ;;  %v2175_v35 = vadd.f32 %v6366_v18, %v2093_v52  ;;  %v2174_v38 = vadd.f32 %v6371_v56, %v2092_v20 }
 0x37f   : > { %v1896_v45 = vmul.f32 0.00390625, %v1858_v58  ;;  %v2095_v17 = vmul.f32 %v6354_v8, %v2013_v16  ;;  %v2094_v50 = vmul.f32 %v6357_v54, %v2012_v22 }
 0x380   : > { %v5187_v33 = vpop.eup %5186  ;;  %v2239_v14 = vmax.f32 %v2175_v35, 0.0  ;;  %v2238_v11 = vmax.f32 %v2174_v38, 0.0 }
 0x381   : > { %v1928_v39 = vadd.f32 1e-05, %v1896_v45  ;;  %v1861_v31 = vpop.xlane.xlu1 %1860  ;;  %v2015_v57 = vmul.f32 %v5187_v33, %v6383_v41  ;;  %v2014_v27 = vmul.f32 %v5187_v33, %v8203_v55  ;;  %v2177_v53 = vadd.f32 %v6366_v18, %v2095_v17 }
 0x382   : > { %v1897_v19 = vmul.f32 0.00390625, %v1861_v31  ;;  %v2279_v37 = vpack.c.bf16 %v2239_v14, %v2237_v59  ;;  %v2278_v29 = vpack.c.bf16 %v2238_v11, %v2236_v42  ;;  %v2176_v36 = vadd.f32 %v6371_v56, %v2094_v50 }
 0x383   : > { %5192 = vrsqrt.f32 %v1928_v39  ;;  %v2097_v7 = vmul.f32 %v6354_v8, %v2015_v57  ;;  %v2096_v9 = vmul.f32 %v6357_v54, %v2014_v27  ;;  %v2241_v44 = vmax.f32 %v2177_v53, 0.0 }
 0x384   : > { %v1929_v34 = vadd.f32 1e-05, %v1897_v19  ;;  %2642 = vmatprep.mubr.bf16.mxu1 %v2279_v37  ;;  %v2240_v24 = vmax.f32 %v2176_v36, 0.0 }
 0x385   : > { %v5189_v47 = vpop.eup %5188  ;;  %2643 = vmatmul.mubr.bf16.gmra.mrb[44].mxu1 %v2278_v29  ;;  %v2179_v41 = vadd.f32 %v6366_v18, %v2097_v7  ;;  %v2178_v4 = vadd.f32 %v6371_v56, %v2096_v9 }
 0x386   : > { %5194 = vrsqrt.f32 %v1929_v34  ;;  %v1864_v3 = vpop.xlane.xlu0 %1863  ;;  %v2017_v32 = vmul.f32 %v5189_v47, %v6399_v43  ;;  %v2016_v6 = vmul.f32 %v5189_v47, %v8204_v60 }
 0x387   : > { %v1898_v62 = vmul.f32 0.00390625, %v1864_v3  ;;  %v2243_v63 = vmax.f32 %v2179_v41, 0.0  ;;  %v2242_v61 = vmax.f32 %v2178_v4, 0.0 }
 0x388   : > { %v5191_v15 = vpop.eup %5190  ;;  %v2099_v30 = vmul.f32 %v6354_v8, %v2017_v32  ;;  %v2098_v25 = vmul.f32 %v6357_v54, %v2016_v6 }
 0x389   : > { %v1930_v5 = vadd.f32 1e-05, %v1898_v62  ;;  %v1867_v46 = vpop.xlane.xlu1 %1866  ;;  %v2281_v12 = vpack.c.bf16 %v2243_v63, %v2241_v44  ;;  %v2280_v40 = vpack.c.bf16 %v2242_v61, %v2240_v24  ;;  %v2019_v2 = vmul.f32 %v5191_v15, %v6413_v48 }
 0x38a   : > { %v1899_v52 = vmul.f32 0.00390625, %v1867_v46  ;;  %v2018_v43 = vmul.f32 %v5191_v15, %v6410_v26  ;;  %v2181_v49 = vadd.f32 %v6366_v18, %v2099_v30  ;;  %v2180_v58 = vadd.f32 %v6371_v56, %v2098_v25  ;;  %v8206_v46 = vld [vmem:[#allocation3_spill] sm:$0xff] }
 0x38b   : > { %5196 = vrsqrt.f32 %v1930_v5  ;;  %2652 = vmatprep.mubr.bf16.mxu1 %v2281_v12  ;;  %v2101_v20 = vmul.f32 %v6354_v8, %v2019_v2 }
 0x38c   : > { %v1931_v16 = vadd.f32 1e-05, %v1899_v52  ;;  %v2100_v22 = vmul.f32 %v6357_v54, %v2018_v43  ;;  %v2245_v17 = vmax.f32 %v2181_v49, 0.0  ;;  %v2244_v59 = vmax.f32 %v2180_v58, 0.0 }
 0x38d   : > { %v5193_v35 = vpop.eup %5192  ;;  %2653 = vmatmul.mubr.bf16.gmra.mrb[48].mxu1 %v2280_v40  ;;  %v2183_v38 = vadd.f32 %v6366_v18, %v2101_v20 }
 0x38e   : > { %5198 = vrsqrt.f32 %v1931_v16  ;;  %v2182_v48 = vadd.f32 %v6371_v56, %v2100_v22  ;;  %v2021_v26 = vmul.f32 %v5193_v35, %v6429_v28  ;;  %v2020_v45 = vmul.f32 %v5193_v35, %v6426_v13 }
 0x38f   : > { %v2247_v50 = vmax.f32 %v2183_v38, 0.0 }
 0x390   : > { %v5195_v33 = vpop.eup %5194  ;;  %v2246_v14 = vmax.f32 %v2182_v48, 0.0  ;;  %v2103_v42 = vmul.f32 %v6354_v8, %v2021_v26  ;;  %v2102_v11 = vmul.f32 %v6357_v54, %v2020_v45 }
 0x391   : > { %v2283_v39 = vpack.c.bf16 %v2247_v50, %v2245_v17  ;;  %v2023_v31 = vmul.f32 %v5195_v33, %v6442_v0  ;;  %v2022_v57 = vmul.f32 %v5195_v33, %v6439_v10 }
 0x392   : > { %v2282_v55 = vpack.c.bf16 %v2246_v14, %v2244_v59  ;;  %v2185_v13 = vadd.f32 %v6366_v18, %v2103_v42  ;;  %v2184_v19 = vadd.f32 %v6371_v56, %v2102_v11 }
 0x393   : > { %2662 = vmatprep.mubr.bf16.mxu1 %v2283_v39  ;;  %v2105_v28 = vmul.f32 %v6354_v8, %v2023_v31  ;;  %v2104_v27 = vmul.f32 %v6357_v54, %v2022_v57 }
 0x394   : > { %v2249_v7 = vmax.f32 %v2185_v13, 0.0  ;;  %v2248_v36 = vmax.f32 %v2184_v19, 0.0 }
 0x395   : > { %v5197_v37 = vpop.eup %5196  ;;  %2663 = vmatmul.mubr.bf16.gmra.mrb[52].mxu1 %v2282_v55  ;;  %v2187_v29 = vadd.f32 %v6366_v18, %v2105_v28  ;;  %v2186_v53 = vadd.f32 %v6371_v56, %v2104_v27 }
 0x396   : > { %v2025_v0 = vmul.f32 %v5197_v37, %v6457_v51  ;;  %v2024_v10 = vmul.f32 %v5197_v37, %v6454_v23 }
 0x397   : > { %v2251_v9 = vmax.f32 %v2187_v29, 0.0  ;;  %v2250_v34 = vmax.f32 %v2186_v53, 0.0 }
 0x398   : > { %v5199_v47 = vpop.eup %5198  ;;  %v2107_v41 = vmul.f32 %v6354_v8, %v2025_v0  ;;  %v2106_v4 = vmul.f32 %v6357_v54, %v2024_v10 }
 0x399   : > { %v2285_v3 = vpack.c.bf16 %v2251_v9, %v2249_v7  ;;  %v2284_v44 = vpack.c.bf16 %v2250_v34, %v2248_v36  ;;  %v2027_v32 = vmul.f32 %v5199_v47, %v6472_v21  ;;  %v2026_v60 = vmul.f32 %v5199_v47, %v6469_v1 }
 0x39a   : > { %v2189_v23 = vadd.f32 %v6366_v18, %v2107_v41  ;;  %v2188_v62 = vadd.f32 %v6371_v56, %v2106_v4 }
 0x39b   : > { %2672 = vmatprep.mubr.bf16.mxu1 %v2285_v3  ;;  %v2109_v51 = vmul.f32 %v6354_v8, %v2027_v32  ;;  %v2108_v6 = vmul.f32 %v6357_v54, %v2026_v60  ;;  %v6640_v8 = vld [vmem:[%s8040_s4] sm:$0x77]  ;;  %v8205_v54 = vld [vmem:[#allocation4_spill] sm:$0xff] }
 0x39c   : > { %v2253_v61 = vmax.f32 %v2189_v23, 0.0  ;;  %v2252_v30 = vmax.f32 %v2188_v62, 0.0  ;;  %v2325_v5 = vrot.slane %v6640_v8, %v8205_v54 }
 0x39d   : > { %2673 = vmatmul.mubr.bf16.gmra.mrb[56].mxu1 %v2284_v44  ;;  %v2191_v63 = vadd.f32 %v6366_v18, %v2109_v51  ;;  %v2190_v24 = vadd.f32 %v6371_v56, %v2108_v6  ;;  %v8207_v18 = vsub.s32 4, %v8206_v46 }
 0x39e   : > { %v6648_v12 = vrot.slane %v2325_v5, %v8205_v54 }
 0x39f   : > { %v2255_v15 = vmax.f32 %v2191_v63, 0.0  ;;  %v2254_v21 = vmax.f32 %v2190_v24, 0.0  ;;  %v2329_v56 = vrot.slane %v6640_v8, %v8207_v18 }
 0x3a1   : > { %v2287_v25 = vpack.c.bf16 %v2255_v15, %v2253_v61  ;;  %v2286_v1 = vpack.c.bf16 %v2254_v21, %v2252_v30  ;;  %v6651_v40 = vrot.slane %v2329_v56, %v8205_v54 }
 0x3a3   : > { %2682 = vmatprep.mubr.bf16.mxu1 %v2287_v25 }
 0x3a5   : > { %2683 = vmatmul.mubr.bf16.gmra.mrb[60].mxu1 %v2286_v1 }
 0x3bd   : > { %v2534_v2 = vpop.f32.mrb[0].mxu1 }
 0x3be   : > { %v6654_v52 = vadd.f32 %v2534_v2, %v6648_v12  ;;  %v2536_v43 = vpop.f32.mrb[1].mxu1 }
 0x3bf   : > { %v6657_v20 = vadd.f32 %v2536_v43, %v6651_v40  ;;  %v2538_v49 = vpop.f32.mrb[2].mxu1 }
 0x3c0   : > { %v6660_v16 = vadd.f32 %v2538_v49, %v6648_v12  ;;  %v2540_v22 = vpop.f32.mrb[3].mxu1 }
 0x3c1   : > { %v6663_v58 = vadd.f32 %v2540_v22, %v6651_v40  ;;  %v2693_v35 = vadd.f32 %v6657_v20, %v6654_v52 }
 0x3c3   : > { %2694 = vadd.xlane.f32.xlu0 %v2693_v35  ;;  %v2696_v38 = vadd.f32 %v6663_v58, %v6660_v16 }
 0x3c5   : > { %2697 = vadd.xlane.f32.xlu1 %v2696_v38 }
 0x3c7   : > { %v2544_v48 = vpop.f32.mrb[4].mxu1 }
 0x3c8   : > { %v6670_v26 = vadd.f32 %v2544_v48, %v6648_v12  ;;  %v2546_v45 = vpop.f32.mrb[5].mxu1 }
 0x3c9   : > { %v6673_v17 = vadd.f32 %v2546_v45, %v6651_v40  ;;  %v2548_v50 = vpop.f32.mrb[6].mxu1 }
 0x3ca   : > { %v6676_v33 = vadd.f32 %v2548_v50, %v6648_v12  ;;  %v2550_v59 = vpop.f32.mrb[7].mxu1 }
 0x3cb   : > { %v6679_v14 = vadd.f32 %v2550_v59, %v6651_v40  ;;  %v2699_v42 = vadd.f32 %v6673_v17, %v6670_v26 }
 0x3cd   : > { %2700 = vadd.xlane.f32.xlu0 %v2699_v42  ;;  %v2702_v11 = vadd.f32 %v6679_v14, %v6676_v33 }
 0x3cf   : > { %2703 = vadd.xlane.f32.xlu1 %v2702_v11 }
 0x3d1   : > { %v2554_v39 = vpop.f32.mrb[8].mxu1 }
 0x3d2   : > { %v6686_v31 = vadd.f32 %v2554_v39, %v6648_v12  ;;  %v2556_v57 = vpop.f32.mrb[9].mxu1 }
 0x3d3   : > { %v6689_v55 = vadd.f32 %v2556_v57, %v6651_v40  ;;  %v2558_v28 = vpop.f32.mrb[10].mxu1 }
 0x3d4   : > { %v6692_v13 = vadd.f32 %v2558_v28, %v6648_v12  ;;  %v2560_v27 = vpop.f32.mrb[11].mxu1 }
 0x3d5   : > { %v6695_v19 = vadd.f32 %v2560_v27, %v6651_v40  ;;  %v2705_v37 = vadd.f32 %v6689_v55, %v6686_v31 }
 0x3d7   : > { %2706 = vadd.xlane.f32.xlu0 %v2705_v37  ;;  %v2708_v29 = vadd.f32 %v6695_v19, %v6692_v13 }
 0x3d9   : > { %2709 = vadd.xlane.f32.xlu1 %v2708_v29  ;;  %v2564_v53 = vpop.f32.mrb[12].mxu1 }
 0x3da   : > { %v6702_v0 = vadd.f32 %v2564_v53, %v6648_v12  ;;  %v2566_v10 = vpop.f32.mrb[13].mxu1 }
 0x3db   : > { %v6705_v7 = vadd.f32 %v2566_v10, %v6651_v40  ;;  %v2568_v9 = vpop.f32.mrb[14].mxu1 }
 0x3dc   : > { %v6708_v36 = vadd.f32 %v2568_v9, %v6648_v12  ;;  %v2570_v34 = vpop.f32.mrb[15].mxu1 }
 0x3dd   : > { %v6711_v47 = vadd.f32 %v2570_v34, %v6651_v40  ;;  %v2711_v41 = vadd.f32 %v6705_v7, %v6702_v0 }
 0x3df   : > { %2712 = vadd.xlane.f32.xlu0 %v2711_v41  ;;  %v2714_v4 = vadd.f32 %v6711_v47, %v6708_v36 }
 0x3e1   : > { %2715 = vadd.xlane.f32.xlu1 %v2714_v4  ;;  %v2574_v3 = vpop.f32.mrb[16].mxu1 }
 0x3e2   : > { %v6718_v44 = vadd.f32 %v2574_v3, %v6648_v12  ;;  %v2576_v32 = vpop.f32.mrb[17].mxu1 }
 0x3e3   : > { %v6721_v60 = vadd.f32 %v2576_v32, %v6651_v40  ;;  %v2578_v51 = vpop.f32.mrb[18].mxu1 }
 0x3e4   : > { %v6724_v23 = vadd.f32 %v2578_v51, %v6648_v12  ;;  %v2580_v6 = vpop.f32.mrb[19].mxu1 }
 0x3e5   : > { %v6727_v62 = vadd.f32 %v2580_v6, %v6651_v40  ;;  %v2717_v63 = vadd.f32 %v6721_v60, %v6718_v44 }
 0x3e7   : > { %2718 = vadd.xlane.f32.xlu0 %v2717_v63  ;;  %v2720_v24 = vadd.f32 %v6727_v62, %v6724_v23 }
 0x3e9   : > { %2721 = vadd.xlane.f32.xlu1 %v2720_v24  ;;  %v2584_v61 = vpop.f32.mrb[20].mxu1 }
 0x3ea   : > { %v6734_v15 = vadd.f32 %v2584_v61, %v6648_v12  ;;  %v2586_v30 = vpop.f32.mrb[21].mxu1 }
 0x3eb   : > { %v6737_v21 = vadd.f32 %v2586_v30, %v6651_v40  ;;  %v2588_v25 = vpop.f32.mrb[22].mxu1 }
 0x3ec   : > { %v6740_v1 = vadd.f32 %v2588_v25, %v6648_v12  ;;  %v2590_v5 = vpop.f32.mrb[23].mxu1 }
 0x3ed   : > { %v6743_v18 = vadd.f32 %v2590_v5, %v6651_v40  ;;  %v2723_v56 = vadd.f32 %v6737_v21, %v6734_v15 }
 0x3ef   : > { %2724 = vadd.xlane.f32.xlu0 %v2723_v56  ;;  %v2726_v2 = vadd.f32 %v6743_v18, %v6740_v1 }
 0x3f1   : > { %2727 = vadd.xlane.f32.xlu1 %v2726_v2  ;;  %v2594_v43 = vpop.f32.mrb[24].mxu1 }
 0x3f2   : > { %v6750_v49 = vadd.f32 %v2594_v43, %v6648_v12  ;;  %v2596_v22 = vpop.f32.mrb[25].mxu1 }
 0x3f3   : > { %v6753_v35 = vadd.f32 %v2596_v22, %v6651_v40  ;;  %v2598_v38 = vpop.f32.mrb[26].mxu1 }
 0x3f4   : > { %v6756_v48 = vadd.f32 %v2598_v38, %v6648_v12  ;;  %v2600_v45 = vpop.f32.mrb[27].mxu1 }
 0x3f5   : > { %v6759_v50 = vadd.f32 %v2600_v45, %v6651_v40  ;;  %v2729_v59 = vadd.f32 %v6753_v35, %v6750_v49 }
 0x3f7   : > { %2730 = vadd.xlane.f32.xlu0 %v2729_v59  ;;  %v2732_v42 = vadd.f32 %v6759_v50, %v6756_v48 }
 0x3f9   : > { %2733 = vadd.xlane.f32.xlu1 %v2732_v42  ;;  %v2604_v11 = vpop.f32.mrb[28].mxu1 }
 0x3fa   : > { %v6766_v39 = vadd.f32 %v2604_v11, %v6648_v12  ;;  %v2606_v57 = vpop.f32.mrb[29].mxu1 }
 0x3fb   : > { %v6769_v28 = vadd.f32 %v2606_v57, %v6651_v40  ;;  %v2608_v27 = vpop.f32.mrb[30].mxu1 }
 0x3fc   : > { %v6772_v37 = vadd.f32 %v2608_v27, %v6648_v12  ;;  %v2610_v29 = vpop.f32.mrb[31].mxu1 }
 0x3fd   : > { %v6775_v53 = vadd.f32 %v2610_v29, %v6651_v40  ;;  %v2735_v10 = vadd.f32 %v6769_v28, %v6766_v39 }
 0x3ff   : > { %2736 = vadd.xlane.f32.xlu0 %v2735_v10  ;;  %v2738_v9 = vadd.f32 %v6775_v53, %v6772_v37 }
 0x401   : > { %2739 = vadd.xlane.f32.xlu1 %v2738_v9  ;;  %v2614_v34 = vpop.f32.mrb[32].mxu1 }
 0x402   : > { %v6782_v41 = vadd.f32 %v2614_v34, %v6648_v12  ;;  %v2616_v4 = vpop.f32.mrb[33].mxu1 }
 0x403   : > { %v6785_v3 = vadd.f32 %v2616_v4, %v6651_v40  ;;  %v2618_v32 = vpop.f32.mrb[34].mxu1 }
 0x404   : > { %v6788_v51 = vadd.f32 %v2618_v32, %v6648_v12  ;;  %v2620_v6 = vpop.f32.mrb[35].mxu1 }
 0x405   : > { %v6791_v63 = vadd.f32 %v2620_v6, %v6651_v40  ;;  %v2741_v24 = vadd.f32 %v6785_v3, %v6782_v41  ;;  %v5120_v6 = vld [vmem:[%s8041_s5 + $0x40] sm:$0xff]  }
 0x406   : > { %4632 = vmatprep.subr.bf16.mxu1 %v5120_v6 }
 0x407   : > { %2742 = vadd.xlane.f32.xlu0 %v2741_v24  ;;  %v2744_v61 = vadd.f32 %v6791_v63, %v6788_v51  ;;  %v5121_v24 = vld [vmem:[%s8041_s5] sm:$0xff]  }
 0x408   : > { %4633 = vmatpush3.bf16.msra.mxu1 %v5121_v24 }
 0x409   : > { %2745 = vadd.xlane.f32.xlu1 %v2744_v61  ;;  %v2624_v30 = vpop.f32.mrb[36].mxu1  ;;  %v5122_v61 = vld [vmem:[%s8041_s5 + $0x48] sm:$0xff]  }
 0x40a   : > { %v6798_v25 = vadd.f32 %v2624_v30, %v6648_v12  ;;  %v2626_v5 = vpop.f32.mrb[37].mxu1  ;;  %v5123_v30 = vld [vmem:[%s8041_s5 + $0x8] sm:$0xff]   ;;  %4634 = vmatprep.subr.bf16.mxu1 %v5122_v61 }
 0x40b   : > { %v6801_v56 = vadd.f32 %v2626_v5, %v6651_v40  ;;  %v2628_v2 = vpop.f32.mrb[38].mxu1  ;;  %v5124_v5 = vld [vmem:[%s8041_s5 + $0x50] sm:$0xff]  }
 0x40c   : > { %v6804_v43 = vadd.f32 %v2628_v2, %v6648_v12  ;;  %v2630_v22 = vpop.f32.mrb[39].mxu1  ;;  %4635 = vmatpush3.bf16.msra.mxu1 %v5123_v30  ;;  %v5125_v2 = vld [vmem:[%s8041_s5 + $0x10] sm:$0xff]  }
 0x40d   : > { %v6807_v38 = vadd.f32 %v2630_v22, %v6651_v40  ;;  %v2747_v45 = vadd.f32 %v6801_v56, %v6798_v25  ;;  %4636 = vmatprep.subr.bf16.mxu1 %v5124_v5 }
 0x40f   : > { %2748 = vadd.xlane.f32.xlu0 %v2747_v45  ;;  %v2750_v59 = vadd.f32 %v6807_v38, %v6804_v43 }
 0x410   : > { %4637 = vmatpush3.bf16.msra.mxu1 %v5125_v2 }
 0x411   : > { %2751 = vadd.xlane.f32.xlu1 %v2750_v59  ;;  %v2634_v42 = vpop.f32.mrb[40].mxu1 }
 0x412   : > { %v6814_v11 = vadd.f32 %v2634_v42, %v6648_v12  ;;  %v2636_v57 = vpop.f32.mrb[41].mxu1 }
 0x413   : > { %v6817_v27 = vadd.f32 %v2636_v57, %v6651_v40  ;;  %v2638_v29 = vpop.f32.mrb[42].mxu1 }
 0x414   : > { %v6820_v10 = vadd.f32 %v2638_v29, %v6648_v12  ;;  %v2640_v9 = vpop.f32.mrb[43].mxu1 }
 0x415   : > { %v6823_v34 = vadd.f32 %v2640_v9, %v6651_v40  ;;  %v2753_v4 = vadd.f32 %v6817_v27, %v6814_v11 }
 0x417   : > { %2754 = vadd.xlane.f32.xlu0 %v2753_v4  ;;  %v2756_v32 = vadd.f32 %v6823_v34, %v6820_v10 }
 0x419   : > { %2757 = vadd.xlane.f32.xlu1 %v2756_v32 }
 0x450   : > { %v2695_v22 = vpop.xlane.xlu0 %2694 }
 0x451   : > { %v2789_v45 = vmul.f32 0.00390625, %v2695_v22 }
 0x452   : > { %v2698_v59 = vpop.xlane.xlu1 %2697 }
 0x453   : > { %v6848_v42 = vsub.f32 %v6654_v52, %v2789_v45  ;;  %v6851_v57 = vsub.f32 %v6657_v20, %v2789_v45  ;;  %v2790_v29 = vmul.f32 0.00390625, %v2698_v59 }
 0x455   : > { %v6854_v9 = vsub.f32 %v6660_v16, %v2790_v29  ;;  %v6857_v4 = vsub.f32 %v6663_v58, %v2790_v29  ;;  %v2885_v32 = vmul.f32 %v6848_v42, %v6848_v42  ;;  %v2886_v6 = vmul.f32 %v6851_v57, %v6851_v57 }
 0x457   : > { %8208 = vst [vmem:[#allocation19_spill] sm:$0xff] %v6857_v4  ;;  %v2949_v24 = vadd.f32 %v2886_v6, %v2885_v32  ;;  %v2887_v52 = vmul.f32 %v6854_v9, %v6854_v9  ;;  %v2888_v20 = vmul.f32 %v6857_v4, %v6857_v4 }
 0x458   : > { %v2644_v61 = vpop.f32.mrb[44].mxu1 }
 0x459   : > { %v6868_v16 = vadd.f32 %v2644_v61, %v6648_v12  ;;  %v2646_v30 = vpop.f32.mrb[45].mxu1  ;;  %2950 = vadd.xlane.f32.xlu0 %v2949_v24  ;;  %v2952_v58 = vadd.f32 %v2888_v20, %v2887_v52 }
 0x45a   : > { %v6871_v5 = vadd.f32 %v2646_v30, %v6651_v40  ;;  %v2701_v2 = vpop.xlane.xlu0 %2700  ;;  %v2648_v22 = vpop.f32.mrb[46].mxu1 }
 0x45b   : > { %v2791_v45 = vmul.f32 0.00390625, %v2701_v2  ;;  %v6874_v59 = vadd.f32 %v2648_v22, %v6648_v12  ;;  %v2650_v29 = vpop.f32.mrb[47].mxu1  ;;  %2953 = vadd.xlane.f32.xlu1 %v2952_v58 }
 0x45c   : > { %v2704_v32 = vpop.xlane.xlu1 %2703  ;;  %v6877_v6 = vadd.f32 %v2650_v29, %v6651_v40  ;;  %v2759_v61 = vadd.f32 %v6871_v5, %v6868_v16 }
 0x45d   : > { %v6882_v24 = vsub.f32 %v6670_v26, %v2791_v45  ;;  %v6885_v52 = vsub.f32 %v6673_v17, %v2791_v45  ;;  %v2792_v20 = vmul.f32 0.00390625, %v2704_v32 }
 0x45e   : > { %2760 = vadd.xlane.f32.xlu0 %v2759_v61  ;;  %v2762_v30 = vadd.f32 %v6877_v6, %v6874_v59 }
 0x45f   : > { %8209 = vst [vmem:[#allocation20_spill] sm:$0xff] %v6882_v24  ;;  %8210 = vst [vmem:[#allocation22_spill] sm:$0xff] %v6885_v52  ;;  %v6890_v58 = vsub.f32 %v6676_v33, %v2792_v20  ;;  %v6893_v2 = vsub.f32 %v6679_v14, %v2792_v20  ;;  %v2889_v22 = vmul.f32 %v6882_v24, %v6882_v24 }
 0x460   : > { %v2890_v26 = vmul.f32 %v6885_v52, %v6885_v52  ;;  %2763 = vadd.xlane.f32.xlu1 %v2762_v30  ;;  %v2654_v17 = vpop.f32.mrb[48].mxu1 }
 0x461   : > { %8211 = vst [vmem:[#allocation21_spill] sm:$0xff] %v6890_v58  ;;  %8212 = vst [vmem:[#allocation24_spill] sm:$0xff] %v6893_v2  ;;  %v6900_v45 = vadd.f32 %v2654_v17, %v6648_v12  ;;  %v2656_v29 = vpop.f32.mrb[49].mxu1  ;;  %v2891_v33 = vmul.f32 %v6890_v58, %v6890_v58  ;;  %v2892_v14 = vmul.f32 %v6893_v2, %v6893_v2 }
 0x462   : > { %v2955_v32 = vadd.f32 %v2890_v26, %v2889_v22  ;;  %v6907_v61 = vadd.f32 %v2656_v29, %v6651_v40  ;;  %v2658_v20 = vpop.f32.mrb[50].mxu1 }
 0x463   : > { %v6910_v54 = vadd.f32 %v2658_v20, %v6648_v12  ;;  %v2660_v30 = vpop.f32.mrb[51].mxu1  ;;  %v2958_v24 = vadd.f32 %v2892_v14, %v2891_v33 }
 0x464   : > { %2956 = vadd.xlane.f32.xlu0 %v2955_v32  ;;  %v2707_v17 = vpop.xlane.xlu0 %2706  ;;  %v6913_v52 = vadd.f32 %v2660_v30, %v6651_v40  ;;  %v2765_v22 = vadd.f32 %v6907_v61, %v6900_v45 }
 0x465   : > { %8213 = vst [vmem:[#allocation23_spill] sm:$0xff] %v6910_v54  ;;  %v2793_v26 = vmul.f32 0.00390625, %v2707_v17  ;;  %2959 = vadd.xlane.f32.xlu1 %v2958_v24 }
 0x466   : > { %8214 = vst [vmem:[#allocation7_spill] sm:$0xff] %v6913_v52  ;;  %v2710_v58 = vpop.xlane.xlu1 %2709  ;;  %v2768_v29 = vadd.f32 %v6913_v52, %v6910_v54 }
 0x467   : > { %v6920_v2 = vsub.f32 %v6686_v31, %v2793_v26  ;;  %v6923_v32 = vsub.f32 %v6689_v55, %v2793_v26  ;;  %v2794_v33 = vmul.f32 0.00390625, %v2710_v58 }
 0x468   : > { %2766 = vadd.xlane.f32.xlu0 %v2765_v22  ;;  %v2664_v14 = vpop.f32.mrb[52].mxu1 }
 0x469   : > { %8215 = vst [vmem:[#allocation9_spill] sm:$0xff] %v6920_v2  ;;  %8216 = vst [vmem:[#allocation6_spill] sm:$0xff] %v6923_v32  ;;  %v6926_v20 = vsub.f32 %v6692_v13, %v2794_v33  ;;  %v6929_v30 = vsub.f32 %v6695_v19, %v2794_v33  ;;  %2769 = vadd.xlane.f32.xlu1 %v2768_v29  ;;  %v2666_v24 = vpop.f32.mrb[53].mxu1  ;;  %v2893_v17 = vmul.f32 %v6920_v2, %v6920_v2 }
 0x46a   : > { %v6934_v31 = vadd.f32 %v2664_v14, %v6648_v12  ;;  %v6937_v55 = vadd.f32 %v2666_v24, %v6651_v40  ;;  %v2668_v58 = vpop.f32.mrb[54].mxu1  ;;  %v2894_v22 = vmul.f32 %v6923_v32, %v6923_v32 }
 0x46b   : > { %8217 = vst [vmem:[#allocation8_spill] sm:$0xff] %v6926_v20  ;;  %8218 = vst [vmem:[#allocation11_spill] sm:$0xff] %v6929_v30  ;;  %v6942_v13 = vadd.f32 %v2668_v58, %v6648_v12  ;;  %v2670_v19 = vpop.f32.mrb[55].mxu1  ;;  %v2895_v26 = vmul.f32 %v6926_v20, %v6926_v20  ;;  %v2896_v29 = vmul.f32 %v6929_v30, %v6929_v30 }
 0x46c   : > { %v2713_v33 = vpop.xlane.xlu0 %2712  ;;  %v2961_v14 = vadd.f32 %v2894_v22, %v2893_v17  ;;  %v6949_v2 = vadd.f32 %v2670_v19, %v6651_v40  ;;  %v2771_v58 = vadd.f32 %v6937_v55, %v6934_v31 }
 0x46d   : > { %v2795_v24 = vmul.f32 0.00390625, %v2713_v33  ;;  %v2964_v52 = vadd.f32 %v2896_v29, %v2895_v26 }
 0x46e   : > { %2962 = vadd.xlane.f32.xlu0 %v2961_v14  ;;  %v2716_v54 = vpop.xlane.xlu1 %2715  ;;  %v2774_v17 = vadd.f32 %v6949_v2, %v6942_v13 }
 0x46f   : > { %v6954_v32 = vsub.f32 %v6702_v0, %v2795_v24  ;;  %v6957_v20 = vsub.f32 %v6705_v7, %v2795_v24  ;;  %v2796_v4 = vmul.f32 0.00390625, %v2716_v54  ;;  %2965 = vadd.xlane.f32.xlu1 %v2964_v52 }
 0x470   : > { %v2674_v22 = vpop.f32.mrb[56].mxu1 }
 0x471   : > { %8219 = vst [vmem:[#allocation13_spill] sm:$0xff] %v6954_v32  ;;  %8220 = vst [vmem:[#allocation12_spill] sm:$0xff] %v6957_v20  ;;  %v2897_v19 = vmul.f32 %v6954_v32, %v6954_v32  ;;  %v2898_v26 = vmul.f32 %v6957_v20, %v6957_v20  ;;  %v6966_v29 = vsub.f32 %v6708_v36, %v2796_v4  ;;  %v2676_v7 = vpop.f32.mrb[57].mxu1  ;;  %v5126_v20 = vld [vmem:[%s8041_s5 + $0x58] sm:$0xff]  }
 0x472   : > { %v6969_v0 = vsub.f32 %v6711_v47, %v2796_v4  ;;  %2772 = vadd.xlane.f32.xlu0 %v2771_v58  ;;  %v6972_v54 = vadd.f32 %v2674_v22, %v6648_v12  ;;  %v6975_v52 = vadd.f32 %v2676_v7, %v6651_v40  ;;  %v2678_v33 = vpop.f32.mrb[58].mxu1  ;;  %4638 = vmatprep.subr.bf16.mxu1 %v5126_v20 }
 0x473   : > { %8221 = vst [vmem:[#allocation10_spill] sm:$0xff] %v6966_v29  ;;  %v2899_v14 = vmul.f32 %v6966_v29, %v6966_v29  ;;  %2775 = vadd.xlane.f32.xlu1 %v2774_v17  ;;  %v6982_v36 = vadd.f32 %v2678_v33, %v6648_v12  ;;  %v2967_v47 = vadd.f32 %v2898_v26, %v2897_v19  ;;  %v2680_v4 = vpop.f32.mrb[59].mxu1  ;;  %v5127_v19 = vld [vmem:[%s8041_s5 + $0x18] sm:$0xff]  }
 0x474   : > { %8222 = vst [vmem:[#allocation15_spill] sm:$0xff] %v6969_v0  ;;  %v2900_v24 = vmul.f32 %v6969_v0, %v6969_v0  ;;  %v2719_v58 = vpop.xlane.xlu0 %2718  ;;  %v6985_v22 = vadd.f32 %v2680_v4, %v6651_v40  ;;  %v2777_v29 = vadd.f32 %v6975_v52, %v6972_v54  ;;  %4639 = vmatpush3.bf16.msra.mxu1 %v5127_v19 }
 0x475   : > { %v2797_v32 = vmul.f32 0.00390625, %v2719_v58 }
 0x476   : > { %v2970_v7 = vadd.f32 %v2900_v24, %v2899_v14  ;;  %2968 = vadd.xlane.f32.xlu0 %v2967_v47  ;;  %v2722_v17 = vpop.xlane.xlu1 %2721  ;;  %v2780_v24 = vadd.f32 %v6985_v22, %v6982_v36 }
 0x477   : > { %v6996_v26 = vsub.f32 %v6718_v44, %v2797_v32  ;;  %v6999_v33 = vsub.f32 %v6721_v60, %v2797_v32  ;;  %v2798_v14 = vmul.f32 0.00390625, %v2722_v17 }
 0x478   : > { %2971 = vadd.xlane.f32.xlu1 %v2970_v7  ;;  %v2684_v4 = vpop.f32.mrb[60].mxu1  ;;  %v5128_v7 = vld [vmem:[%s8041_s5 + $0x60] sm:$0xff]  }
 0x479   : > { %8223 = vst [vmem:[#allocation17_spill] sm:$0xff] %v6996_v26  ;;  %8224 = vst [vmem:[#allocation14_spill] sm:$0xff] %v6999_v33  ;;  %v2901_v47 = vmul.f32 %v6996_v26, %v6996_v26  ;;  %v2902_v58 = vmul.f32 %v6999_v33, %v6999_v33  ;;  %v7008_v44 = vsub.f32 %v6724_v23, %v2798_v14  ;;  %v2686_v32 = vpop.f32.mrb[61].mxu1  ;;  %v5129_v23 = vld [vmem:[%s8041_s5 + $0x20] sm:$0xff]   ;;  %4640 = vmatprep.subr.bf16.mxu1 %v5128_v7 }
 0x47a   : > { %v7011_v60 = vsub.f32 %v6727_v62, %v2798_v14  ;;  %2778 = vadd.xlane.f32.xlu0 %v2777_v29  ;;  %v7017_v20 = vadd.f32 %v2684_v4, %v6648_v12  ;;  %v7020_v17 = vadd.f32 %v2686_v32, %v6651_v40  ;;  %v2688_v19 = vpop.f32.mrb[62].mxu1  ;;  %4641 = vmatpush3.bf16.msra.mxu1 %v5129_v23 }
 0x47b   : > { %8225 = vst [vmem:[#allocation16_spill] sm:$0xff] %v7008_v44  ;;  %v2903_v62 = vmul.f32 %v7008_v44, %v7008_v44  ;;  %v7030_v29 = vadd.f32 %v2688_v19, %v6648_v12  ;;  %v2973_v4 = vadd.f32 %v2902_v58, %v2901_v47  ;;  %v2690_v26 = vpop.f32.mrb[63].mxu1  ;;  %v5130_v44 = vld [vmem:[%s8041_s5 + $0x68] sm:$0xff]  }
 0x47c   : > { %v2904_v14 = vmul.f32 %v7011_v60, %v7011_v60  ;;  %2781 = vadd.xlane.f32.xlu1 %v2780_v24  ;;  %v2725_v33 = vpop.xlane.xlu0 %2724  ;;  %v7033_v32 = vadd.f32 %v2690_v26, %v6651_v40  ;;  %v2783_v24 = vadd.f32 %v7020_v17, %v7017_v20  ;;  %v5131_v47 = vld [vmem:[%s8041_s5 + $0x28] sm:$0xff]   ;;  %4642 = vmatprep.subr.bf16.mxu1 %v5130_v44 }
 0x47d   : > { %v2799_v0 = vmul.f32 0.00390625, %v2725_v33 }
 0x47e   : > { %v2976_v30 = vadd.f32 %v2904_v14, %v2903_v62  ;;  %2974 = vadd.xlane.f32.xlu0 %v2973_v4  ;;  %v2728_v12 = vpop.xlane.xlu1 %2727  ;;  %v2786_v58 = vadd.f32 %v7033_v32, %v7030_v29  ;;  %4643 = vmatpush3.bf16.msra.mxu1 %v5131_v47  ;;  %v5134_v4 = vld [vmem:[%s8041_s5 + $0x78] sm:$0xff]  }
 0x47f   : > { %v7044_v40 = vsub.f32 %v6734_v15, %v2799_v0  ;;  %v7047_v26 = vsub.f32 %v6737_v21, %v2799_v0  ;;  %v2800_v33 = vmul.f32 0.00390625, %v2728_v12  ;;  %v5132_v21 = vld [vmem:[%s8041_s5 + $0x70] sm:$0xff]   ;;  %v5135_v12 = vld [vmem:[%s8041_s5 + $0x38] sm:$0xff]  }
 0x480   : > { %2977 = vadd.xlane.f32.xlu1 %v2976_v30  ;;  %v5133_v30 = vld [vmem:[%s8041_s5 + $0x30] sm:$0xff]   ;;  %4644 = vmatprep.subr.bf16.mxu1 %v5132_v21 }
 0x481   : > { %v2905_v7 = vmul.f32 %v7044_v40, %v7044_v40  ;;  %v2906_v19 = vmul.f32 %v7047_v26, %v7047_v26  ;;  %v7056_v23 = vsub.f32 %v6740_v1, %v2800_v33  ;;  %v7059_v15 = vsub.f32 %v6743_v18, %v2800_v33 }
 0x482   : > { %2784 = vadd.xlane.f32.xlu0 %v2783_v24  ;;  %4645 = vmatpush3.bf16.msra.mxu1 %v5133_v30 }
 0x483   : > { %v2907_v0 = vmul.f32 %v7056_v23, %v7056_v23  ;;  %v2908_v1 = vmul.f32 %v7059_v15, %v7059_v15  ;;  %v2979_v44 = vadd.f32 %v2906_v19, %v2905_v7  ;;  %4646 = vmatprep.subr.bf16.mxu1 %v5134_v4 }
 0x484   : > { %2787 = vadd.xlane.f32.xlu1 %v2786_v58  ;;  %v2731_v18 = vpop.xlane.xlu0 %2730 }
 0x485   : > { %v2801_v62 = vmul.f32 0.00390625, %v2731_v18  ;;  %v2982_v14 = vadd.f32 %v2908_v1, %v2907_v0 }
 0x486   : > { %2980 = vadd.xlane.f32.xlu0 %v2979_v44  ;;  %v2734_v24 = vpop.xlane.xlu1 %2733  ;;  %4647 = vmatpush3.bf16.msra.mxu1 %v5135_v12 }
 0x487   : > { %v7078_v47 = vsub.f32 %v6750_v49, %v2801_v62  ;;  %v7081_v33 = vsub.f32 %v6753_v35, %v2801_v62  ;;  %v2802_v58 = vmul.f32 0.00390625, %v2734_v24 }
 0x488   : > { %2983 = vadd.xlane.f32.xlu1 %v2982_v14 }
 0x489   : > { %v2909_v7 = vmul.f32 %v7078_v47, %v7078_v47  ;;  %v2910_v19 = vmul.f32 %v7081_v33, %v7081_v33  ;;  %v7088_v21 = vsub.f32 %v6756_v48, %v2802_v58  ;;  %v7091_v30 = vsub.f32 %v6759_v50, %v2802_v58 }
 0x48b   : > { %v2911_v49 = vmul.f32 %v7088_v21, %v7088_v21  ;;  %v2912_v35 = vmul.f32 %v7091_v30, %v7091_v30  ;;  %v2985_v0 = vadd.f32 %v2910_v19, %v2909_v7 }
 0x48c   : > { %v2737_v1 = vpop.xlane.xlu0 %2736 }
 0x48d   : > { %v2803_v44 = vmul.f32 0.00390625, %v2737_v1  ;;  %2986 = vadd.xlane.f32.xlu0 %v2985_v0  ;;  %v2988_v18 = vadd.f32 %v2912_v35, %v2911_v49 }
 0x48e   : > { %v2740_v62 = vpop.xlane.xlu1 %2739 }
 0x48f   : > { %v7098_v14 = vsub.f32 %v6766_v39, %v2803_v44  ;;  %v7101_v48 = vsub.f32 %v6769_v28, %v2803_v44  ;;  %v2804_v50 = vmul.f32 0.00390625, %v2740_v62  ;;  %2989 = vadd.xlane.f32.xlu1 %v2988_v18 }
 0x491   : > { %v2913_v4 = vmul.f32 %v7098_v14, %v7098_v14  ;;  %v2914_v24 = vmul.f32 %v7101_v48, %v7101_v48  ;;  %v7108_v12 = vsub.f32 %v6772_v37, %v2804_v50  ;;  %v7111_v58 = vsub.f32 %v6775_v53, %v2804_v50 }
 0x493   : > { %v2915_v39 = vmul.f32 %v7108_v12, %v7108_v12  ;;  %v2916_v28 = vmul.f32 %v7111_v58, %v7111_v58  ;;  %v2991_v7 = vadd.f32 %v2914_v24, %v2913_v4 }
 0x494   : > { %v2743_v19 = vpop.xlane.xlu0 %2742 }
 0x495   : > { %v2805_v49 = vmul.f32 0.00390625, %v2743_v19  ;;  %2992 = vadd.xlane.f32.xlu0 %v2991_v7  ;;  %v2994_v35 = vadd.f32 %v2916_v28, %v2915_v39 }
 0x496   : > { %v2746_v0 = vpop.xlane.xlu1 %2745 }
 0x497   : > { %v7118_v1 = vsub.f32 %v6782_v41, %v2805_v49  ;;  %v7121_v37 = vsub.f32 %v6785_v3, %v2805_v49  ;;  %v2806_v53 = vmul.f32 0.00390625, %v2746_v0  ;;  %2995 = vadd.xlane.f32.xlu1 %v2994_v35 }
 0x499   : > { %v2917_v44 = vmul.f32 %v7118_v1, %v7118_v1  ;;  %v2918_v18 = vmul.f32 %v7121_v37, %v7121_v37  ;;  %v7128_v62 = vsub.f32 %v6788_v51, %v2806_v53  ;;  %v7131_v50 = vsub.f32 %v6791_v63, %v2806_v53 }
 0x49b   : > { %v2919_v41 = vmul.f32 %v7128_v62, %v7128_v62  ;;  %v2920_v3 = vmul.f32 %v7131_v50, %v7131_v50  ;;  %v2997_v4 = vadd.f32 %v2918_v18, %v2917_v44 }
 0x49c   : > { %v2749_v24 = vpop.xlane.xlu0 %2748 }
 0x49d   : > { %v2807_v39 = vmul.f32 0.00390625, %v2749_v24  ;;  %2998 = vadd.xlane.f32.xlu0 %v2997_v4  ;;  %v3000_v28 = vadd.f32 %v2920_v3, %v2919_v41 }
 0x49e   : > { %v2752_v7 = vpop.xlane.xlu1 %2751 }
 0x49f   : > { %v7138_v19 = vsub.f32 %v6798_v25, %v2807_v39  ;;  %v7141_v51 = vsub.f32 %v6801_v56, %v2807_v39  ;;  %v2808_v63 = vmul.f32 0.00390625, %v2752_v7  ;;  %3001 = vadd.xlane.f32.xlu1 %v3000_v28 }
 0x4a1   : > { %v2921_v49 = vmul.f32 %v7138_v19, %v7138_v19  ;;  %v2922_v35 = vmul.f32 %v7141_v51, %v7141_v51  ;;  %v7148_v0 = vsub.f32 %v6804_v43, %v2808_v63  ;;  %v7151_v53 = vsub.f32 %v6807_v38, %v2808_v63 }
 0x4a3   : > { %v2923_v25 = vmul.f32 %v7148_v0, %v7148_v0  ;;  %v2924_v56 = vmul.f32 %v7151_v53, %v7151_v53  ;;  %v3003_v44 = vadd.f32 %v2922_v35, %v2921_v49 }
 0x4a4   : > { %v2755_v18 = vpop.xlane.xlu0 %2754 }
 0x4a5   : > { %v2809_v41 = vmul.f32 0.00390625, %v2755_v18  ;;  %3004 = vadd.xlane.f32.xlu0 %v3003_v44  ;;  %v3006_v3 = vadd.f32 %v2924_v56, %v2923_v25 }
 0x4a6   : > { %v2758_v4 = vpop.xlane.xlu1 %2757 }
 0x4a7   : > { %v7158_v24 = vsub.f32 %v6814_v11, %v2809_v41  ;;  %v7161_v43 = vsub.f32 %v6817_v27, %v2809_v41  ;;  %v2810_v38 = vmul.f32 0.00390625, %v2758_v4  ;;  %3007 = vadd.xlane.f32.xlu1 %v3006_v3 }
 0x4a9   : > { %v2925_v39 = vmul.f32 %v7158_v24, %v7158_v24  ;;  %v2926_v28 = vmul.f32 %v7161_v43, %v7161_v43  ;;  %v7168_v7 = vsub.f32 %v6820_v10, %v2810_v38  ;;  %v7171_v63 = vsub.f32 %v6823_v34, %v2810_v38 }
 0x4ab   : > { %8226 = vst [vmem:[#allocation27_spill] sm:$0xff] %v7168_v7  ;;  %8227 = vst [vmem:[#allocation26_spill] sm:$0xff] %v7171_v63  ;;  %v2927_v11 = vmul.f32 %v7168_v7, %v7168_v7  ;;  %v2928_v27 = vmul.f32 %v7171_v63, %v7171_v63  ;;  %v3009_v49 = vadd.f32 %v2926_v28, %v2925_v39  ;;  %v8230_v28 = vld [vmem:[#allocation25_spill] sm:$0xff] }
 0x4ad   : > { %3010 = vadd.xlane.f32.xlu0 %v3009_v49  ;;  %v3012_v35 = vadd.f32 %v2928_v27, %v2927_v11  ;;  %v3208_v11 = vrot.slane %v6640_v8, %v8230_v28  ;;  %v8231_v27 = vsub.s32 5, %v8206_v46 }
 0x4af   : > { %3013 = vadd.xlane.f32.xlu1 %v3012_v35  ;;  %v3212_v49 = vrot.slane %v6640_v8, %v8231_v27  ;;  %v8235_v27 = vld [vmem:[#allocation28_spill] sm:$0xff] }
 0x4e6   : > { %v2951_v25 = vpop.xlane.xlu0 %2950 }
 0x4e7   : > { %v3045_v56 = vmul.f32 0.00390625, %v2951_v25 }
 0x4e8   : > { %v2954_v44 = vpop.xlane.xlu1 %2953 }
 0x4e9   : > { %v3077_v18 = vadd.f32 1e-05, %v3045_v56  ;;  %v3046_v41 = vmul.f32 0.00390625, %v2954_v44 }
 0x4eb   : > { %5200 = vrsqrt.f32 %v3077_v18  ;;  %v3078_v10 = vadd.f32 1e-05, %v3046_v41  ;;  %v2761_v3 = vpop.xlane.xlu0 %2760  ;;  %v8234_v18 = vsub.s32 6, %v8206_v46 }
 0x4ec   : > { %v2811_v34 = vmul.f32 0.00390625, %v2761_v3 }
 0x4ed   : > { %5202 = vrsqrt.f32 %v3078_v10  ;;  %v2764_v4 = vpop.xlane.xlu1 %2763  ;;  %v3294_v41 = vrot.slane %v6640_v8, %v8234_v18  ;;  %v7211_v18 = vrot.slane %v3212_v49, %v8230_v28 }
 0x4ee   : > { %v7178_v38 = vsub.f32 %v6868_v16, %v2811_v34  ;;  %v7181_v7 = vsub.f32 %v6871_v5, %v2811_v34  ;;  %v2812_v39 = vmul.f32 0.00390625, %v2764_v4 }
 0x4f0   : > { %8228 = vst [vmem:[#allocation5_spill] sm:$0xff] %v7178_v38  ;;  %8229 = vst [vmem:[#allocation18_spill] sm:$0xff] %v7181_v7  ;;  %v2929_v35 = vmul.f32 %v7178_v38, %v7178_v38  ;;  %v2930_v25 = vmul.f32 %v7181_v7, %v7181_v7  ;;  %v7193_v16 = vsub.f32 %v6874_v59, %v2812_v39 }
 0x4f1   : > { %v7196_v5 = vsub.f32 %v6877_v6, %v2812_v39  ;;  %v2957_v56 = vpop.xlane.xlu0 %2956  ;;  %v3290_v59 = vrot.slane %v6640_v8, %v8235_v27  ;;  %v7208_v39 = vrot.slane %v3208_v11, %v8230_v28 }
 0x4f2   : > { %8232 = vst [vmem:[#allocation3_spill] sm:$0xff] %v7193_v16  ;;  %v3047_v44 = vmul.f32 0.00390625, %v2957_v56  ;;  %v2931_v10 = vmul.f32 %v7193_v16, %v7193_v16  ;;  %v2960_v34 = vpop.xlane.xlu1 %2959  ;;  %v3015_v4 = vadd.f32 %v2930_v25, %v2929_v35 }
 0x4f3   : > { %8233 = vst [vmem:[#allocation29_spill] sm:$0xff] %v7196_v5  ;;  %v2932_v3 = vmul.f32 %v7196_v5, %v7196_v5  ;;  %v3048_v6 = vmul.f32 0.00390625, %v2960_v34  ;;  %v7219_v11 = vrot.slane %v3290_v59, %v8235_v27 }
 0x4f4   : > { %v3079_v38 = vadd.f32 1e-05, %v3047_v44  ;;  %3016 = vadd.xlane.f32.xlu0 %v3015_v4  ;;  %v7216_v44 = vrot.slane %v3294_v41, %v8235_v27 }
 0x4f5   : > { %v2767_v56 = vpop.xlane.xlu0 %2766  ;;  %v3018_v46 = vadd.f32 %v2932_v3, %v2931_v10  ;;  %v5201_v16 = vpop.eup %5200  ;;  %v3080_v7 = vadd.f32 1e-05, %v3048_v6 }
 0x4f6   : > { %5204 = vrsqrt.f32 %v3079_v38  ;;  %v2813_v5 = vmul.f32 0.00390625, %v2767_v56  ;;  %v3141_v35 = vmul.f32 %v5201_v16, %v6848_v42  ;;  %v2770_v25 = vpop.xlane.xlu1 %2769  ;;  %v3142_v8 = vmul.f32 %v5201_v16, %v6851_v57  ;;  %v8238_v57 = vld [vmem:[#allocation19_spill] sm:$0xff] }
 0x4f7   : > { %3019 = vadd.xlane.f32.xlu1 %v3018_v46  ;;  %v5203_v10 = vpop.eup %5202  ;;  %5206 = vrsqrt.f32 %v3080_v7  ;;  %v2814_v3 = vmul.f32 0.00390625, %v2770_v25 }
 0x4f8   : > { %v7222_v49 = vsub.f32 %v6900_v45, %v2813_v5  ;;  %v7225_v38 = vsub.f32 %v6907_v61, %v2813_v5  ;;  %v3223_v42 = vmul.f32 %v7208_v39, %v3141_v35  ;;  %v3143_v34 = vmul.f32 %v5203_v10, %v6854_v9  ;;  %v8239_v45 = vld [vmem:[#allocation23_spill] sm:$0xff] }
 0x4f9   : > { %v3144_v16 = vmul.f32 %v5203_v10, %v8238_v57  ;;  %v3224_v41 = vmul.f32 %v7211_v18, %v3142_v8  ;;  %v7236_v59 = vsub.f32 %v8239_v45, %v2814_v3  ;;  %v8241_v61 = vld [vmem:[#allocation7_spill] sm:$0xff] }
 0x4fa   : > { %8236 = vst [vmem:[#allocation30_spill] sm:$0xff] %v7222_v49  ;;  %8237 = vst [vmem:[#allocation31_spill] sm:$0xff] %v7225_v38  ;;  %v2933_v4 = vmul.f32 %v7222_v49, %v7222_v49  ;;  %v2934_v7 = vmul.f32 %v7225_v38, %v7225_v38  ;;  %v7239_v5 = vsub.f32 %v8241_v61, %v2814_v3 }
 0x4fb   : > { %8240 = vst [vmem:[#allocation19_spill] sm:$0xff] %v7236_v59  ;;  %v3225_v6 = vmul.f32 %v7208_v39, %v3143_v34  ;;  %v3226_v9 = vmul.f32 %v7211_v18, %v3144_v16  ;;  %v3306_v56 = vadd.f32 %v7216_v44, %v3224_v41  ;;  %v3305_v46 = vadd.f32 %v7219_v11, %v3223_v42  ;;  %v2963_v8 = vpop.xlane.xlu0 %2962 }
 0x4fc   : > { %8242 = vst [vmem:[#allocation23_spill] sm:$0xff] %v7239_v5  ;;  %v2935_v35 = vmul.f32 %v7236_v59, %v7236_v59  ;;  %v2936_v25 = vmul.f32 %v7239_v5, %v7239_v5  ;;  %v3021_v10 = vadd.f32 %v2934_v7, %v2933_v4  ;;  %v3049_v57 = vmul.f32 0.00390625, %v2963_v8  ;;  %v2966_v45 = vpop.xlane.xlu1 %2965 }
 0x4fd   : > { %v3308_v3 = vadd.f32 %v7216_v44, %v3226_v9  ;;  %v3307_v34 = vadd.f32 %v7219_v11, %v3225_v6  ;;  %v3050_v61 = vmul.f32 0.00390625, %v2966_v45  ;;  %v3370_v41 = vmax.f32 %v3306_v56, 0.0  ;;  %v8243_v45 = vld [vmem:[#allocation22_spill] sm:$0xff] }
 0x4fe   : > { %3022 = vadd.xlane.f32.xlu0 %v3021_v10  ;;  %v3024_v16 = vadd.f32 %v2936_v25, %v2935_v35  ;;  %v3081_v27 = vadd.f32 1e-05, %v3049_v57  ;;  %v3369_v28 = vmax.f32 %v3305_v46, 0.0  ;;  %v8244_v35 = vld [vmem:[#allocation20_spill] sm:$0xff] }
 0x4ff   : > { %v3372_v42 = vmax.f32 %v3308_v3, 0.0  ;;  %v3371_v49 = vmax.f32 %v3307_v34, 0.0  ;;  %v3082_v38 = vadd.f32 1e-05, %v3050_v61  ;;  %v2773_v63 = vpop.xlane.xlu0 %2772  ;;  %v8245_v57 = vld [vmem:[#allocation24_spill] sm:$0xff] }
 0x500   : > { %v5205_v59 = vpop.eup %5204  ;;  %3025 = vadd.xlane.f32.xlu1 %v3024_v16  ;;  %5208 = vrsqrt.f32 %v3081_v27  ;;  %v2815_v4 = vmul.f32 0.00390625, %v2773_v63  ;;  %v2776_v7 = vpop.xlane.xlu1 %2775  ;;  %v8246_v63 = vld [vmem:[#allocation21_spill] sm:$0xff] }
 0x501   : > { %v3434_v8 = vpack.c.bf16 %v3372_v42, %v3370_v41  ;;  %v3433_v5 = vpack.c.bf16 %v3371_v49, %v3369_v28  ;;  %v5207_v9 = vpop.eup %5206  ;;  %5210 = vrsqrt.f32 %v3082_v38  ;;  %v2816_v6 = vmul.f32 0.00390625, %v2776_v7 }
 0x502   : > { %v3146_v10 = vmul.f32 %v5205_v59, %v8243_v45  ;;  %v3145_v56 = vmul.f32 %v5205_v59, %v8244_v35  ;;  %v7254_v25 = vsub.f32 %v6934_v31, %v2815_v4  ;;  %v7257_v46 = vsub.f32 %v6937_v55, %v2815_v4 }
 0x503   : > { %3630 = vmatprep.mubr.bf16.mxu1 %v3434_v8  ;;  %v3148_v27 = vmul.f32 %v5207_v9, %v8245_v57  ;;  %v3147_v3 = vmul.f32 %v5207_v9, %v8246_v63  ;;  %v7262_v28 = vsub.f32 %v6942_v13, %v2816_v6  ;;  %v7265_v49 = vsub.f32 %v6949_v2, %v2816_v6  ;;  %v2969_v38 = vpop.xlane.xlu0 %2968 }
 0x504   : > { %3631 = vmatmul.mubr.bf16.vlgmr.msra.gmra.mrb[64].mxu1 %v3433_v5  ;;  %v3228_v59 = vmul.f32 %v7211_v18, %v3146_v10  ;;  %v3227_v31 = vmul.f32 %v7208_v39, %v3145_v56  ;;  %v2937_v55 = vmul.f32 %v7254_v25, %v7254_v25  ;;  %v2938_v34 = vmul.f32 %v7257_v46, %v7257_v46 }
 0x505   : > { %v3051_v61 = vmul.f32 0.00390625, %v2969_v38  ;;  %v2972_v16 = vpop.xlane.xlu1 %2971  ;;  %v3230_v13 = vmul.f32 %v7211_v18, %v3148_v27  ;;  %v2939_v2 = vmul.f32 %v7262_v28, %v7262_v28  ;;  %v2940_v5 = vmul.f32 %v7265_v49, %v7265_v49 }
 0x506   : > { %v3052_v41 = vmul.f32 0.00390625, %v2972_v16  ;;  %v3310_v42 = vadd.f32 %v7216_v44, %v3228_v59  ;;  %v3027_v7 = vadd.f32 %v2938_v34, %v2937_v55  ;;  %v3229_v9 = vmul.f32 %v7208_v39, %v3147_v3 }
 0x507   : > { %v3083_v4 = vadd.f32 1e-05, %v3051_v61  ;;  %v3312_v8 = vadd.f32 %v7216_v44, %v3230_v13  ;;  %v2779_v45 = vpop.xlane.xlu0 %2778  ;;  %v3030_v10 = vadd.f32 %v2940_v5, %v2939_v2  ;;  %v3309_v56 = vadd.f32 %v7219_v11, %v3227_v31 }
 0x508   : > { %v3084_v6 = vadd.f32 1e-05, %v3052_v41  ;;  %v3374_v35 = vmax.f32 %v3310_v42, 0.0  ;;  %v2817_v57 = vmul.f32 0.00390625, %v2779_v45  ;;  %3028 = vadd.xlane.f32.xlu0 %v3027_v7  ;;  %v3311_v38 = vadd.f32 %v7219_v11, %v3229_v9  ;;  %v8247_v42 = vld [vmem:[#allocation6_spill] sm:$0xff]  ;;  %v8248_v7 = vld [vmem:[#allocation9_spill] sm:$0xff] }
 0x509   : > { %5212 = vrsqrt.f32 %v3083_v4  ;;  %v2782_v27 = vpop.xlane.xlu1 %2781  ;;  %v3376_v63 = vmax.f32 %v3312_v8, 0.0  ;;  %3031 = vadd.xlane.f32.xlu1 %v3030_v10  ;;  %v3373_v55 = vmax.f32 %v3309_v56, 0.0 }
 0x50a   : > { %5214 = vrsqrt.f32 %v3084_v6  ;;  %v2818_v59 = vmul.f32 0.00390625, %v2782_v27  ;;  %v5209_v34 = vpop.eup %5208  ;;  %v7284_v3 = vsub.f32 %v6972_v54, %v2817_v57  ;;  %v7287_v61 = vsub.f32 %v6975_v52, %v2817_v57 }
 0x50b   : > { %v3436_v16 = vpack.c.bf16 %v3376_v63, %v3374_v35  ;;  %v3375_v31 = vmax.f32 %v3311_v38, 0.0  ;;  %v5211_v13 = vpop.eup %5210  ;;  %v2975_v41 = vpop.xlane.xlu0 %2974  ;;  %v3150_v4 = vmul.f32 %v5209_v34, %v8247_v42  ;;  %v3149_v8 = vmul.f32 %v5209_v34, %v8248_v7  ;;  %v8249_v35 = vld [vmem:[#allocation11_spill] sm:$0xff]  ;;  %v8250_v38 = vld [vmem:[#allocation8_spill] sm:$0xff] }
 0x50c   : > { %v7290_v2 = vsub.f32 %v6982_v36, %v2818_v59  ;;  %v7293_v5 = vsub.f32 %v6985_v22, %v2818_v59  ;;  %v2941_v54 = vmul.f32 %v7284_v3, %v7284_v3  ;;  %v2942_v52 = vmul.f32 %v7287_v61, %v7287_v61 }
 0x50d   : > { %v3053_v9 = vmul.f32 0.00390625, %v2975_v41  ;;  %v2978_v6 = vpop.xlane.xlu1 %2977  ;;  %3638 = vmatprep.mubr.bf16.mxu1 %v3436_v16  ;;  %v3435_v45 = vpack.c.bf16 %v3375_v31, %v3373_v55  ;;  %v3152_v56 = vmul.f32 %v5211_v13, %v8249_v35  ;;  %v3232_v63 = vmul.f32 %v7211_v18, %v3150_v4 }
 0x50e   : > { %v2943_v36 = vmul.f32 %v7290_v2, %v7290_v2  ;;  %v2944_v22 = vmul.f32 %v7293_v5, %v7293_v5  ;;  %v3054_v10 = vmul.f32 0.00390625, %v2978_v6  ;;  %v3033_v27 = vadd.f32 %v2942_v52, %v2941_v54 }
 0x50f   : > { %v3085_v57 = vadd.f32 1e-05, %v3053_v9  ;;  %3639 = vmatmul.mubr.bf16.gmra.mrb[68].mxu1 %v3435_v45  ;;  %v3151_v59 = vmul.f32 %v5211_v13, %v8250_v38  ;;  %v2785_v41 = vpop.xlane.xlu0 %2784  ;;  %v3234_v55 = vmul.f32 %v7211_v18, %v3152_v56  ;;  %v3231_v31 = vmul.f32 %v7208_v39, %v3149_v8 }
 0x510   : > { %v3086_v34 = vadd.f32 1e-05, %v3054_v10  ;;  %v3036_v16 = vadd.f32 %v2944_v22, %v2943_v36  ;;  %v2819_v42 = vmul.f32 0.00390625, %v2785_v41  ;;  %3034 = vadd.xlane.f32.xlu0 %v3033_v27  ;;  %v3314_v6 = vadd.f32 %v7216_v44, %v3232_v63 }
 0x511   : > { %5216 = vrsqrt.f32 %v3085_v57  ;;  %v2788_v7 = vpop.xlane.xlu1 %2787  ;;  %v3233_v9 = vmul.f32 %v7208_v39, %v3151_v59  ;;  %v3316_v13 = vadd.f32 %v7216_v44, %v3234_v55  ;;  %v3313_v4 = vadd.f32 %v7219_v11, %v3231_v31 }
 0x512   : > { %5218 = vrsqrt.f32 %v3086_v34  ;;  %v2820_v54 = vmul.f32 0.00390625, %v2788_v7  ;;  %3037 = vadd.xlane.f32.xlu1 %v3036_v16  ;;  %v7315_v45 = vsub.f32 %v7017_v20, %v2819_v42  ;;  %v7318_v8 = vsub.f32 %v7020_v17, %v2819_v42  ;;  %v8253_v7 = vld [vmem:[#allocation12_spill] sm:$0xff] }
 0x513   : > { %v5213_v52 = vpop.eup %5212  ;;  %v3378_v36 = vmax.f32 %v3314_v6, 0.0  ;;  %v3315_v22 = vadd.f32 %v7219_v11, %v3233_v9  ;;  %v2981_v57 = vpop.xlane.xlu0 %2980  ;;  %v3380_v27 = vmax.f32 %v3316_v13, 0.0  ;;  %v3377_v63 = vmax.f32 %v3313_v4, 0.0  ;;  %v8254_v13 = vld [vmem:[#allocation15_spill] sm:$0xff] }
 0x514   : > { %v5215_v10 = vpop.eup %5214  ;;  %v7322_v35 = vsub.f32 %v7030_v29, %v2820_v54  ;;  %v7325_v56 = vsub.f32 %v7033_v32, %v2820_v54  ;;  %v2945_v20 = vmul.f32 %v7315_v45, %v7315_v45  ;;  %v2946_v17 = vmul.f32 %v7318_v8, %v7318_v8 }
 0x515   : > { %v3055_v38 = vmul.f32 0.00390625, %v2981_v57  ;;  %v2984_v59 = vpop.xlane.xlu1 %2983  ;;  %v3379_v34 = vmax.f32 %v3315_v22, 0.0  ;;  %v3438_v16 = vpack.c.bf16 %v3380_v27, %v3378_v36  ;;  %v3154_v6 = vmul.f32 %v5213_v52, %v8253_v7  ;;  %v8255_v57 = vld [vmem:[#allocation13_spill] sm:$0xff] }
 0x516   : > { %8251 = vst [vmem:[#allocation7_spill] sm:$0xff] %v7322_v35  ;;  %8252 = vst [vmem:[#allocation22_spill] sm:$0xff] %v7325_v56  ;;  %v2947_v41 = vmul.f32 %v7322_v35, %v7322_v35  ;;  %v2948_v29 = vmul.f32 %v7325_v56, %v7325_v56  ;;  %v3056_v32 = vmul.f32 0.00390625, %v2984_v59  ;;  %v3039_v42 = vadd.f32 %v2946_v17, %v2945_v20  ;;  %v8256_v56 = vld [vmem:[#allocation10_spill] sm:$0xff] }
 0x517   : > { %v3087_v55 = vadd.f32 1e-05, %v3055_v38  ;;  %v3437_v31 = vpack.c.bf16 %v3379_v34, %v3377_v63  ;;  %3646 = vmatprep.mubr.bf16.mxu1 %v3438_v16  ;;  %v3156_v4 = vmul.f32 %v5215_v10, %v8254_v13  ;;  %v3153_v22 = vmul.f32 %v5213_v52, %v8255_v57 }
 0x518   : > { %v3088_v9 = vadd.f32 1e-05, %v3056_v32  ;;  %v3042_v54 = vadd.f32 %v2948_v29, %v2947_v41  ;;  %3040 = vadd.xlane.f32.xlu0 %v3039_v42  ;;  %v3236_v35 = vmul.f32 %v7211_v18, %v3154_v6  ;;  %v3155_v59 = vmul.f32 %v5215_v10, %v8256_v56  ;;  %v8257_v32 = vld [vmem:[#allocation14_spill] sm:$0xff]  ;;  %v8258_v42 = vld [vmem:[#allocation17_spill] sm:$0xff] }
 0x519   : > { %5220 = vrsqrt.f32 %v3087_v55  ;;  %3647 = vmatmul.mubr.bf16.gmra.mrb[72].mxu1 %v3437_v31  ;;  %v3238_v36 = vmul.f32 %v7211_v18, %v3156_v4  ;;  %v3235_v27 = vmul.f32 %v7208_v39, %v3153_v22  ;;  %v8259_v22 = vld [vmem:[#allocation16_spill] sm:$0xff] }
 0x51a   : > { %5222 = vrsqrt.f32 %v3088_v9  ;;  %3043 = vadd.xlane.f32.xlu1 %v3042_v54  ;;  %v2987_v20 = vpop.xlane.xlu0 %2986  ;;  %v3318_v17 = vadd.f32 %v7216_v44, %v3236_v35  ;;  %v3237_v38 = vmul.f32 %v7208_v39, %v3155_v59 }
 0x51b   : > { %v5217_v63 = vpop.eup %5216  ;;  %v3057_v34 = vmul.f32 0.00390625, %v2987_v20  ;;  %v3320_v41 = vadd.f32 %v7216_v44, %v3238_v36  ;;  %v3317_v29 = vadd.f32 %v7219_v11, %v3235_v27 }
 0x51c   : > { %v5219_v52 = vpop.eup %5218  ;;  %v3158_v10 = vmul.f32 %v5217_v63, %v8257_v32  ;;  %v2990_v56 = vpop.xlane.xlu1 %2989  ;;  %v3382_v16 = vmax.f32 %v3318_v17, 0.0  ;;  %v3319_v55 = vadd.f32 %v7219_v11, %v3237_v38  ;;  %v3157_v7 = vmul.f32 %v5217_v63, %v8258_v42 }
 0x51d   : > { %v3160_v31 = vmul.f32 %v5219_v52, %v7011_v60  ;;  %v3089_v6 = vadd.f32 1e-05, %v3057_v34  ;;  %v3058_v35 = vmul.f32 0.00390625, %v2990_v56  ;;  %v3384_v9 = vmax.f32 %v3320_v41, 0.0 }
 0x51e   : > { %v3381_v54 = vmax.f32 %v3317_v29, 0.0  ;;  %v3383_v13 = vmax.f32 %v3319_v55, 0.0  ;;  %v3240_v4 = vmul.f32 %v7211_v18, %v3158_v10  ;;  %v3159_v59 = vmul.f32 %v5219_v52, %v8259_v22 }
 0x51f   : > { %v3242_v57 = vmul.f32 %v7211_v18, %v3160_v31  ;;  %5224 = vrsqrt.f32 %v3089_v6  ;;  %v3090_v36 = vadd.f32 1e-05, %v3058_v35  ;;  %v3440_v27 = vpack.c.bf16 %v3384_v9, %v3382_v16 }
 0x520   : > { %v3239_v20 = vmul.f32 %v7208_v39, %v3157_v7  ;;  %v3439_v17 = vpack.c.bf16 %v3383_v13, %v3381_v54  ;;  %v3322_v60 = vadd.f32 %v7216_v44, %v3240_v4  ;;  %v3241_v38 = vmul.f32 %v7208_v39, %v3159_v59 }
 0x521   : > { %v3324_v63 = vadd.f32 %v7216_v44, %v3242_v57  ;;  %5226 = vrsqrt.f32 %v3090_v36  ;;  %3654 = vmatprep.mubr.bf16.mxu1 %v3440_v27 }
 0x522   : > { %v3321_v34 = vadd.f32 %v7219_v11, %v3239_v20  ;;  %3655 = vmatmul.mubr.bf16.gmra.mrb[76].mxu1 %v3439_v17  ;;  %v2993_v29 = vpop.xlane.xlu0 %2992  ;;  %v3386_v52 = vmax.f32 %v3322_v60, 0.0  ;;  %v3323_v10 = vadd.f32 %v7219_v11, %v3241_v38 }
 0x523   : > { %v5221_v41 = vpop.eup %5220  ;;  %v3388_v32 = vmax.f32 %v3324_v63, 0.0  ;;  %v3059_v16 = vmul.f32 0.00390625, %v2993_v29 }
 0x524   : > { %v5223_v56 = vpop.eup %5222  ;;  %v3385_v55 = vmax.f32 %v3321_v34, 0.0  ;;  %v3162_v31 = vmul.f32 %v5221_v41, %v7047_v26  ;;  %v3161_v42 = vmul.f32 %v5221_v41, %v7044_v40  ;;  %v2996_v7 = vpop.xlane.xlu1 %2995  ;;  %v3387_v35 = vmax.f32 %v3323_v10, 0.0 }
 0x525   : > { %v3442_v6 = vpack.c.bf16 %v3388_v32, %v3386_v52  ;;  %v3164_v9 = vmul.f32 %v5223_v56, %v7059_v15  ;;  %v3163_v54 = vmul.f32 %v5223_v56, %v7056_v23  ;;  %v3091_v13 = vadd.f32 1e-05, %v3059_v16 }
 0x526   : > { %v3060_v4 = vmul.f32 0.00390625, %v2996_v7  ;;  %v3244_v57 = vmul.f32 %v7211_v18, %v3162_v31  ;;  %v3243_v22 = vmul.f32 %v7208_v39, %v3161_v42  ;;  %v3441_v59 = vpack.c.bf16 %v3387_v35, %v3385_v55 }
 0x527   : > { %3662 = vmatprep.mubr.bf16.mxu1 %v3442_v6  ;;  %v3246_v36 = vmul.f32 %v7211_v18, %v3164_v9  ;;  %v3245_v26 = vmul.f32 %v7208_v39, %v3163_v54  ;;  %5228 = vrsqrt.f32 %v3091_v13 }
 0x528   : > { %v3092_v40 = vadd.f32 1e-05, %v3060_v4  ;;  %v3326_v27 = vadd.f32 %v7216_v44, %v3244_v57  ;;  %v3325_v23 = vadd.f32 %v7219_v11, %v3243_v22 }
 0x529   : > { %v3328_v15 = vadd.f32 %v7216_v44, %v3246_v36  ;;  %v3327_v20 = vadd.f32 %v7219_v11, %v3245_v26  ;;  %v5225_v17 = vpop.eup %5224 }
 0x52a   : > { %5230 = vrsqrt.f32 %v3092_v40  ;;  %v3390_v60 = vmax.f32 %v3326_v27, 0.0  ;;  %3663 = vmatmul.mubr.bf16.gmra.mrb[80].mxu1 %v3441_v59  ;;  %v2999_v63 = vpop.xlane.xlu0 %2998  ;;  %v3166_v41 = vmul.f32 %v5225_v17, %v7081_v33  ;;  %v3165_v29 = vmul.f32 %v5225_v17, %v7078_v47 }
 0x52b   : > { %v3392_v38 = vmax.f32 %v3328_v15, 0.0  ;;  %v3391_v34 = vmax.f32 %v3327_v20, 0.0  ;;  %v5227_v52 = vpop.eup %5226  ;;  %v3061_v32 = vmul.f32 0.00390625, %v2999_v63  ;;  %v3389_v16 = vmax.f32 %v3325_v23, 0.0 }
 0x52c   : > { %v3002_v10 = vpop.xlane.xlu1 %3001  ;;  %v3168_v55 = vmul.f32 %v5227_v52, %v7091_v30  ;;  %v3248_v31 = vmul.f32 %v7211_v18, %v3166_v41  ;;  %v3167_v6 = vmul.f32 %v5227_v52, %v7088_v21  ;;  %v3247_v35 = vmul.f32 %v7208_v39, %v3165_v29 }
 0x52d   : > { %v3444_v56 = vpack.c.bf16 %v3392_v38, %v3390_v60  ;;  %v3093_v42 = vadd.f32 1e-05, %v3061_v32  ;;  %v3062_v7 = vmul.f32 0.00390625, %v3002_v10  ;;  %v3443_v9 = vpack.c.bf16 %v3391_v34, %v3389_v16 }
 0x52e   : > { %v3250_v33 = vmul.f32 %v7211_v18, %v3168_v55  ;;  %v3330_v47 = vadd.f32 %v7216_v44, %v3248_v31  ;;  %v3249_v13 = vmul.f32 %v7208_v39, %v3167_v6  ;;  %v3329_v30 = vadd.f32 %v7219_v11, %v3247_v35 }
 0x52f   : > { %3670 = vmatprep.mubr.bf16.mxu1 %v3444_v56  ;;  %5232 = vrsqrt.f32 %v3093_v42  ;;  %v3094_v54 = vadd.f32 1e-05, %v3062_v7 }
 0x530   : > { %v3332_v4 = vadd.f32 %v7216_v44, %v3250_v33  ;;  %v3331_v21 = vadd.f32 %v7219_v11, %v3249_v13  ;;  %v3394_v59 = vmax.f32 %v3330_v47, 0.0  ;;  %v3393_v23 = vmax.f32 %v3329_v30, 0.0 }
 0x531   : > { %v5229_v57 = vpop.eup %5228  ;;  %5234 = vrsqrt.f32 %v3094_v54 }
 0x532   : > { %3671 = vmatmul.mubr.bf16.gmra.mrb[84].mxu1 %v3443_v9  ;;  %v3005_v22 = vpop.xlane.xlu0 %3004  ;;  %v3396_v36 = vmax.f32 %v3332_v4, 0.0  ;;  %v3170_v26 = vmul.f32 %v5229_v57, %v7101_v48  ;;  %v3169_v40 = vmul.f32 %v5229_v57, %v7098_v14  ;;  %v3395_v20 = vmax.f32 %v3331_v21, 0.0 }
 0x533   : > { %v3063_v15 = vmul.f32 0.00390625, %v3005_v22 }
 0x534   : > { %v5231_v27 = vpop.eup %5230  ;;  %v3008_v17 = vpop.xlane.xlu1 %3007  ;;  %v3446_v60 = vpack.c.bf16 %v3396_v36, %v3394_v59  ;;  %v3252_v38 = vmul.f32 %v7211_v18, %v3170_v26  ;;  %v3251_v52 = vmul.f32 %v7208_v39, %v3169_v40  ;;  %v3445_v48 = vpack.c.bf16 %v3395_v20, %v3393_v23 }
 0x535   : > { %v3172_v63 = vmul.f32 %v5231_v27, %v7111_v58  ;;  %v3171_v34 = vmul.f32 %v5231_v27, %v7108_v12  ;;  %v3095_v41 = vadd.f32 1e-05, %v3063_v15  ;;  %v3064_v29 = vmul.f32 0.00390625, %v3008_v17 }
 0x536   : > { %3678 = vmatprep.mubr.bf16.mxu1 %v3446_v60  ;;  %v3334_v32 = vadd.f32 %v7216_v44, %v3252_v38  ;;  %v3333_v16 = vadd.f32 %v7219_v11, %v3251_v52 }
 0x537   : > { %v3254_v14 = vmul.f32 %v7211_v18, %v3172_v63  ;;  %v3253_v10 = vmul.f32 %v7208_v39, %v3171_v34  ;;  %5236 = vrsqrt.f32 %v3095_v41  ;;  %v3096_v56 = vadd.f32 1e-05, %v3064_v29 }
 0x538   : > { %v3398_v31 = vmax.f32 %v3334_v32, 0.0  ;;  %v3397_v30 = vmax.f32 %v3333_v16, 0.0 }
 0x539   : > { %v3336_v58 = vadd.f32 %v7216_v44, %v3254_v14  ;;  %v3335_v12 = vadd.f32 %v7219_v11, %v3253_v10  ;;  %v5233_v55 = vpop.eup %5232  ;;  %5238 = vrsqrt.f32 %v3096_v56 }
 0x53a   : > { %3679 = vmatmul.mubr.bf16.gmra.mrb[88].mxu1 %v3445_v48  ;;  %v3011_v42 = vpop.xlane.xlu0 %3010  ;;  %v3174_v35 = vmul.f32 %v5233_v55, %v7121_v37  ;;  %v3173_v9 = vmul.f32 %v5233_v55, %v7118_v1 }
 0x53b   : > { %v3400_v7 = vmax.f32 %v3336_v58, 0.0  ;;  %v3399_v6 = vmax.f32 %v3335_v12, 0.0  ;;  %v5235_v33 = vpop.eup %5234  ;;  %v3065_v47 = vmul.f32 0.00390625, %v3011_v42 }
 0x53c   : > { %v3014_v54 = vpop.xlane.xlu1 %3013  ;;  %v3176_v4 = vmul.f32 %v5235_v33, %v7131_v50  ;;  %v3256_v57 = vmul.f32 %v7211_v18, %v3174_v35  ;;  %v3175_v59 = vmul.f32 %v5235_v33, %v7128_v62  ;;  %v3255_v36 = vmul.f32 %v7208_v39, %v3173_v9  ;;  %v8260_v33 = vld [vmem:[#allocation26_spill] sm:$0xff] }
 0x53d   : > { %v3448_v13 = vpack.c.bf16 %v3400_v7, %v3398_v31  ;;  %v3097_v21 = vadd.f32 1e-05, %v3065_v47  ;;  %v3066_v22 = vmul.f32 0.00390625, %v3014_v54  ;;  %v3447_v26 = vpack.c.bf16 %v3399_v6, %v3397_v30 }
 0x53e   : > { %v3258_v37 = vmul.f32 %v7211_v18, %v3176_v4  ;;  %v3338_v1 = vadd.f32 %v7216_v44, %v3256_v57  ;;  %v3257_v27 = vmul.f32 %v7208_v39, %v3175_v59  ;;  %v3337_v50 = vadd.f32 %v7219_v11, %v3255_v36 }
 0x53f   : > { %3686 = vmatprep.mubr.bf16.mxu1 %v3448_v13  ;;  %5240 = vrsqrt.f32 %v3097_v21  ;;  %v3098_v40 = vadd.f32 1e-05, %v3066_v22  ;;  %v8261_v13 = vld [vmem:[#allocation27_spill] sm:$0xff] }
 0x540   : > { %v3340_v15 = vadd.f32 %v7216_v44, %v3258_v37  ;;  %v3339_v62 = vadd.f32 %v7219_v11, %v3257_v27  ;;  %v3402_v20 = vmax.f32 %v3338_v1, 0.0  ;;  %v3401_v34 = vmax.f32 %v3337_v50, 0.0 }
 0x541   : > { %v5237_v23 = vpop.eup %5236  ;;  %5242 = vrsqrt.f32 %v3098_v40 }
 0x542   : > { %3687 = vmatmul.mubr.bf16.gmra.mrb[92].mxu1 %v3447_v26  ;;  %v3404_v17 = vmax.f32 %v3340_v15, 0.0  ;;  %v3178_v60 = vmul.f32 %v5237_v23, %v7141_v51  ;;  %v3177_v63 = vmul.f32 %v5237_v23, %v7138_v19  ;;  %v3403_v41 = vmax.f32 %v3339_v62, 0.0 }
 0x543   : > { %v5239_v38 = vpop.eup %5238 }
 0x544   : > { %v3450_v29 = vpack.c.bf16 %v3404_v17, %v3402_v20  ;;  %v3180_v52 = vmul.f32 %v5239_v38, %v7151_v53  ;;  %v3260_v48 = vmul.f32 %v7211_v18, %v3178_v60  ;;  %v3179_v14 = vmul.f32 %v5239_v38, %v7148_v0 }
 0x545   : > { %v3259_v32 = vmul.f32 %v7208_v39, %v3177_v63  ;;  %v3449_v10 = vpack.c.bf16 %v3403_v41, %v3401_v34 }
 0x546   : > { %3694 = vmatprep.mubr.bf16.mxu1 %v3450_v29  ;;  %v3262_v56 = vmul.f32 %v7211_v18, %v3180_v52  ;;  %v3342_v51 = vadd.f32 %v7216_v44, %v3260_v48  ;;  %v3261_v19 = vmul.f32 %v7208_v39, %v3179_v14  ;;  %v8262_v14 = vld [vmem:[#allocation18_spill] sm:$0xff] }
 0x547   : > { %v3341_v16 = vadd.f32 %v7219_v11, %v3259_v32 }
 0x548   : > { %v3344_v58 = vadd.f32 %v7216_v44, %v3262_v56  ;;  %v3343_v53 = vadd.f32 %v7219_v11, %v3261_v19  ;;  %v3406_v55 = vmax.f32 %v3342_v51, 0.0  ;;  %v8264_v19 = vld [vmem:[#allocation29_spill] sm:$0xff] }
 0x549   : > { %v5241_v12 = vpop.eup %5240  ;;  %v3405_v9 = vmax.f32 %v3341_v16, 0.0 }
 0x54a   : > { %3695 = vmatmul.mubr.bf16.gmra.mrb[96].mxu1 %v3449_v10  ;;  %v3408_v0 = vmax.f32 %v3344_v58, 0.0  ;;  %v3407_v31 = vmax.f32 %v3343_v53, 0.0  ;;  %v3182_v42 = vmul.f32 %v5241_v12, %v7161_v43  ;;  %v3181_v7 = vmul.f32 %v5241_v12, %v7158_v24  ;;  %v8263_v10 = vld [vmem:[#allocation5_spill] sm:$0xff]  ;;  %v8265_v53 = vld [vmem:[#allocation3_spill] sm:$0xff] }
 0x54b   : > { %v5243_v6 = vpop.eup %5242 }
 0x54c   : > { %v3452_v35 = vpack.c.bf16 %v3408_v0, %v3406_v55  ;;  %v3184_v47 = vmul.f32 %v5243_v6, %v8260_v33  ;;  %v3264_v54 = vmul.f32 %v7211_v18, %v3182_v42  ;;  %v3183_v30 = vmul.f32 %v5243_v6, %v8261_v13 }
 0x54d   : > { %v3263_v4 = vmul.f32 %v7208_v39, %v3181_v7  ;;  %v3451_v57 = vpack.c.bf16 %v3407_v31, %v3405_v9 }
 0x54e   : > { %3702 = vmatprep.mubr.bf16.mxu1 %v3452_v35  ;;  %v3266_v21 = vmul.f32 %v7211_v18, %v3184_v47  ;;  %v3346_v22 = vadd.f32 %v7216_v44, %v3264_v54  ;;  %v3265_v43 = vmul.f32 %v7208_v39, %v3183_v30 }
 0x54f   : > { %v3345_v59 = vadd.f32 %v7219_v11, %v3263_v4 }
 0x550   : > { %v3348_v24 = vadd.f32 %v7216_v44, %v3266_v21  ;;  %v3347_v36 = vadd.f32 %v7219_v11, %v3265_v43  ;;  %v3410_v26 = vmax.f32 %v3346_v22, 0.0 }
 0x551   : > { %v3409_v27 = vmax.f32 %v3345_v59, 0.0 }
 0x552   : > { %3703 = vmatmul.mubr.bf16.gmra.mrb[100].mxu1 %v3451_v57  ;;  %v3412_v37 = vmax.f32 %v3348_v24, 0.0  ;;  %v3411_v1 = vmax.f32 %v3347_v36, 0.0  ;;  %v8266_v24 = vld [vmem:[#allocation31_spill] sm:$0xff]  ;;  %v8267_v36 = vld [vmem:[#allocation30_spill] sm:$0xff] }
 0x554   : > { %v3454_v40 = vpack.c.bf16 %v3412_v37, %v3410_v26  ;;  %v3453_v50 = vpack.c.bf16 %v3411_v1, %v3409_v27  ;;  %v8268_v27 = vld [vmem:[#allocation23_spill] sm:$0xff] }
 0x556   : > { %3710 = vmatprep.mubr.bf16.mxu1 %v3454_v40 }
 0x55a   : > { %3711 = vmatmul.mubr.bf16.gmra.mrb[104].mxu1 %v3453_v50 }
 0x581   : > { %v3017_v15 = vpop.xlane.xlu0 %3016 }
 0x582   : > { %v3067_v23 = vmul.f32 0.00390625, %v3017_v15 }
 0x584   : > { %v3020_v62 = vpop.xlane.xlu1 %3019  ;;  %v3099_v20 = vadd.f32 1e-05, %v3067_v23  ;;  %v8269_v23 = vld [vmem:[#allocation19_spill] sm:$0xff] }
 0x585   : > { %v3068_v17 = vmul.f32 0.00390625, %v3020_v62 }
 0x586   : > { %5244 = vrsqrt.f32 %v3099_v20 }
 0x587   : > { %v3100_v60 = vadd.f32 1e-05, %v3068_v17 }
 0x589   : > { %5246 = vrsqrt.f32 %v3100_v60 }
 0x58b   : > { %v3023_v63 = vpop.xlane.xlu0 %3022 }
 0x58c   : > { %v3069_v38 = vmul.f32 0.00390625, %v3023_v63 }
 0x58d   : > { %v3026_v34 = vpop.xlane.xlu1 %3025 }
 0x58e   : > { %v3101_v41 = vadd.f32 1e-05, %v3069_v38  ;;  %v3070_v29 = vmul.f32 0.00390625, %v3026_v34 }
 0x590   : > { %5248 = vrsqrt.f32 %v3101_v41  ;;  %v3102_v52 = vadd.f32 1e-05, %v3070_v29  ;;  %v5245_v48 = vpop.eup %5244 }
 0x591   : > { %v3186_v32 = vmul.f32 %v5245_v48, %v8262_v14  ;;  %v3185_v56 = vmul.f32 %v5245_v48, %v8263_v10 }
 0x592   : > { %5250 = vrsqrt.f32 %v3102_v52 }
 0x593   : > { %v5247_v51 = vpop.eup %5246  ;;  %v3268_v16 = vmul.f32 %v7211_v18, %v3186_v32  ;;  %v3267_v55 = vmul.f32 %v7208_v39, %v3185_v56 }
 0x594   : > { %v3188_v58 = vmul.f32 %v5247_v51, %v8264_v19  ;;  %v3187_v12 = vmul.f32 %v5247_v51, %v8265_v53 }
 0x595   : > { %v3029_v0 = vpop.xlane.xlu0 %3028  ;;  %v3350_v42 = vadd.f32 %v7216_v44, %v3268_v16  ;;  %v3349_v6 = vadd.f32 %v7219_v11, %v3267_v55 }
 0x596   : > { %v3270_v31 = vmul.f32 %v7211_v18, %v3188_v58  ;;  %v3269_v7 = vmul.f32 %v7208_v39, %v3187_v12  ;;  %v3071_v35 = vmul.f32 0.00390625, %v3029_v0  ;;  %v3032_v9 = vpop.xlane.xlu1 %3031 }
 0x597   : > { %v3072_v33 = vmul.f32 0.00390625, %v3032_v9  ;;  %v3414_v30 = vmax.f32 %v3350_v42, 0.0  ;;  %v3413_v22 = vmax.f32 %v3349_v6, 0.0 }
 0x598   : > { %v3352_v47 = vadd.f32 %v7216_v44, %v3270_v31  ;;  %v3351_v54 = vadd.f32 %v7219_v11, %v3269_v7  ;;  %v3103_v13 = vadd.f32 1e-05, %v3071_v35 }
 0x599   : > { %v3104_v57 = vadd.f32 1e-05, %v3072_v33 }
 0x59a   : > { %v5249_v4 = vpop.eup %5248  ;;  %v3416_v21 = vmax.f32 %v3352_v47, 0.0  ;;  %v3415_v43 = vmax.f32 %v3351_v54, 0.0  ;;  %5252 = vrsqrt.f32 %v3103_v13 }
 0x59b   : > { %v3190_v59 = vmul.f32 %v5249_v4, %v8266_v24  ;;  %v3189_v26 = vmul.f32 %v5249_v4, %v8267_v36  ;;  %5254 = vrsqrt.f32 %v3104_v57 }
 0x59c   : > { %v5251_v37 = vpop.eup %5250  ;;  %v3456_v1 = vpack.c.bf16 %v3416_v21, %v3414_v30  ;;  %v3455_v40 = vpack.c.bf16 %v3415_v43, %v3413_v22 }
 0x59d   : > { %v3192_v50 = vmul.f32 %v5251_v37, %v8268_v27  ;;  %v3272_v15 = vmul.f32 %v7211_v18, %v3190_v59  ;;  %v3191_v62 = vmul.f32 %v5251_v37, %v8269_v23  ;;  %v3271_v20 = vmul.f32 %v7208_v39, %v3189_v26  ;;  %v3035_v17 = vpop.xlane.xlu0 %3034 }
 0x59e   : > { %3718 = vmatprep.mubr.bf16.mxu1 %v3456_v1  ;;  %v3073_v60 = vmul.f32 0.00390625, %v3035_v17 }
 0x59f   : > { %v3038_v63 = vpop.xlane.xlu1 %3037  ;;  %3719 = vmatmul.mubr.bf16.gmra.mrb[108].mxu1 %v3455_v40  ;;  %v3274_v38 = vmul.f32 %v7211_v18, %v3192_v50  ;;  %v3354_v34 = vadd.f32 %v7216_v44, %v3272_v15  ;;  %v3273_v41 = vmul.f32 %v7208_v39, %v3191_v62  ;;  %v3353_v52 = vadd.f32 %v7219_v11, %v3271_v20 }
 0x5a0   : > { %v3074_v29 = vmul.f32 0.00390625, %v3038_v63  ;;  %v3105_v48 = vadd.f32 1e-05, %v3073_v60 }
 0x5a1   : > { %v3356_v14 = vadd.f32 %v7216_v44, %v3274_v38  ;;  %v3355_v32 = vadd.f32 %v7219_v11, %v3273_v41  ;;  %v3418_v56 = vmax.f32 %v3354_v34, 0.0  ;;  %v3417_v19 = vmax.f32 %v3353_v52, 0.0 }
 0x5a2   : > { %v3106_v10 = vadd.f32 1e-05, %v3074_v29  ;;  %5256 = vrsqrt.f32 %v3105_v48 }
 0x5a3   : > { %v3420_v51 = vmax.f32 %v3356_v14, 0.0  ;;  %v3419_v58 = vmax.f32 %v3355_v32, 0.0  ;;  %v8270_v32 = vld [vmem:[#allocation22_spill] sm:$0xff] }
 0x5a4   : > { %5258 = vrsqrt.f32 %v3106_v10  ;;  %v5253_v16 = vpop.eup %5252 }
 0x5a5   : > { %v3458_v53 = vpack.c.bf16 %v3420_v51, %v3418_v56  ;;  %v3457_v12 = vpack.c.bf16 %v3419_v58, %v3417_v19  ;;  %v5255_v55 = vpop.eup %5254  ;;  %v3041_v0 = vpop.xlane.xlu0 %3040  ;;  %v3194_v31 = vmul.f32 %v5253_v16, %v7257_v46  ;;  %v3193_v42 = vmul.f32 %v5253_v16, %v7254_v25  ;;  %v8271_v56 = vld [vmem:[#allocation7_spill] sm:$0xff] }
 0x5a6   : > { %v3075_v7 = vmul.f32 0.00390625, %v3041_v0  ;;  %v3196_v35 = vmul.f32 %v5255_v55, %v7265_v49  ;;  %v3195_v9 = vmul.f32 %v5255_v55, %v7262_v28 }
 0x5a7   : > { %v3044_v6 = vpop.xlane.xlu1 %3043  ;;  %3726 = vmatprep.mubr.bf16.mxu1 %v3458_v53  ;;  %v3276_v47 = vmul.f32 %v7211_v18, %v3194_v31  ;;  %v3275_v54 = vmul.f32 %v7208_v39, %v3193_v42 }
 0x5a8   : > { %v3076_v33 = vmul.f32 0.00390625, %v3044_v6  ;;  %3727 = vmatmul.mubr.bf16.gmra.mrb[112].mxu1 %v3457_v12  ;;  %v3107_v13 = vadd.f32 1e-05, %v3075_v7  ;;  %v3278_v30 = vmul.f32 %v7211_v18, %v3196_v35  ;;  %v3277_v46 = vmul.f32 %v7208_v39, %v3195_v9  ;;  %v8272_v9 = vld [vmem:[#allocation4_spill] sm:$0xff] }
 0x5a9   : > { %v3358_v25 = vadd.f32 %v7216_v44, %v3276_v47  ;;  %v3357_v57 = vadd.f32 %v7219_v11, %v3275_v54 }
 0x5aa   : > { %v3108_v4 = vadd.f32 1e-05, %v3076_v33  ;;  %5260 = vrsqrt.f32 %v3107_v13  ;;  %v3360_v49 = vadd.f32 %v7216_v44, %v3278_v30  ;;  %v3359_v28 = vadd.f32 %v7219_v11, %v3277_v46 }
 0x5ab   : > { %v3422_v22 = vmax.f32 %v3358_v25, 0.0  ;;  %v3421_v24 = vmax.f32 %v3357_v57, 0.0 }
 0x5ac   : > { %5262 = vrsqrt.f32 %v3108_v4  ;;  %v5257_v21 = vpop.eup %5256  ;;  %v3424_v43 = vmax.f32 %v3360_v49, 0.0  ;;  %v3423_v59 = vmax.f32 %v3359_v28, 0.0 }
 0x5ad   : > { %v3198_v26 = vmul.f32 %v5257_v21, %v7287_v61  ;;  %v3197_v37 = vmul.f32 %v5257_v21, %v7284_v3 }
 0x5ae   : > { %v5259_v36 = vpop.eup %5258  ;;  %v3460_v1 = vpack.c.bf16 %v3424_v43, %v3422_v22  ;;  %v3459_v40 = vpack.c.bf16 %v3423_v59, %v3421_v24 }
 0x5af   : > { %v3200_v27 = vmul.f32 %v5259_v36, %v7293_v5  ;;  %v3199_v50 = vmul.f32 %v5259_v36, %v7290_v2  ;;  %v3280_v15 = vmul.f32 %v7211_v18, %v3198_v26  ;;  %v3279_v23 = vmul.f32 %v7208_v39, %v3197_v37 }
 0x5b0   : > { %3734 = vmatprep.mubr.bf16.mxu1 %v3460_v1 }
 0x5b1   : > { %v3282_v62 = vmul.f32 %v7211_v18, %v3200_v27  ;;  %v3281_v20 = vmul.f32 %v7208_v39, %v3199_v50  ;;  %3735 = vmatmul.mubr.bf16.gmra.mrb[116].mxu1 %v3459_v40  ;;  %v3362_v61 = vadd.f32 %v7216_v44, %v3280_v15  ;;  %v3361_v3 = vadd.f32 %v7219_v11, %v3279_v23 }
 0x5b3   : > { %v3364_v17 = vadd.f32 %v7216_v44, %v3282_v62  ;;  %v3363_v5 = vadd.f32 %v7219_v11, %v3281_v20  ;;  %v3426_v2 = vmax.f32 %v3362_v61, 0.0  ;;  %v3425_v38 = vmax.f32 %v3361_v3, 0.0 }
 0x5b4   : > { %v5261_v60 = vpop.eup %5260 }
 0x5b5   : > { %v3428_v63 = vmax.f32 %v3364_v17, 0.0  ;;  %v3427_v34 = vmax.f32 %v3363_v5, 0.0  ;;  %v3202_v29 = vmul.f32 %v5261_v60, %v7318_v8  ;;  %v3201_v52 = vmul.f32 %v5261_v60, %v7315_v45 }
 0x5b6   : > { %v5263_v41 = vpop.eup %5262 }
 0x5b7   : > { %v3462_v48 = vpack.c.bf16 %v3428_v63, %v3426_v2  ;;  %v3461_v14 = vpack.c.bf16 %v3427_v34, %v3425_v38  ;;  %v3204_v10 = vmul.f32 %v5263_v41, %v8270_v32  ;;  %v3203_v51 = vmul.f32 %v5263_v41, %v8271_v56 }
 0x5b8   : > { %v3284_v19 = vmul.f32 %v7211_v18, %v3202_v29  ;;  %v3283_v58 = vmul.f32 %v7208_v39, %v3201_v52 }
 0x5b9   : > { %3742 = vmatprep.mubr.bf16.mxu1 %v3462_v48  ;;  %v3286_v16 = vmul.f32 %v7211_v18, %v3204_v10  ;;  %v3285_v53 = vmul.f32 %v7208_v39, %v3203_v51  ;;  %v7494_v39 = vld [vmem:[%s8042_s6] sm:$0x7] }
 0x5ba   : > { %3743 = vmatmul.mubr.bf16.gmra.mrb[120].mxu1 %v3461_v14  ;;  %v3366_v8 = vadd.f32 %v7216_v44, %v3284_v19  ;;  %v3365_v45 = vadd.f32 %v7219_v11, %v3283_v58  ;;  %v7498_v33 = vrot.slane %v7494_v39, %v8272_v9 }
 0x5bb   : > { %v3368_v12 = vadd.f32 %v7216_v44, %v3286_v16  ;;  %v3367_v55 = vadd.f32 %v7219_v11, %v3285_v53 }
 0x5bc   : > { %v3430_v0 = vmax.f32 %v3366_v8, 0.0  ;;  %v3429_v42 = vmax.f32 %v3365_v45, 0.0 }
 0x5bd   : > { %v3432_v31 = vmax.f32 %v3368_v12, 0.0  ;;  %v3431_v7 = vmax.f32 %v3367_v55, 0.0 }
 0x5bf   : > { %v3464_v6 = vpack.c.bf16 %v3432_v31, %v3430_v0  ;;  %v3463_v35 = vpack.c.bf16 %v3431_v7, %v3429_v42 }
 0x5c1   : > { %3750 = vmatprep.mubr.bf16.mxu1 %v3464_v6 }
 0x5c2   : > { %3751 = vmatmul.mubr.bf16.gmra.mrb[124].mxu1 %v3463_v35 }
 0x5d7   : > { %v4648_v18 = vpop.f32.mrb[64].mxu1 }
 0x5d8   : > { %v4649_v44 = vpop.f32.mrb[65].mxu1 }
 0x5d9   : > { %v4650_v11 = vadd.f32 %v4649_v44, %v4648_v18  ;;  %v4651_v47 = vpop.f32.mrb[66].mxu1 }
 0x5da   : > { %v4652_v54 = vpop.f32.mrb[67].mxu1 }
 0x5db   : > { %v7501_v13 = vadd.f32 %v4650_v11, %v7498_v33  ;;  %v4653_v30 = vadd.f32 %v4652_v54, %v4651_v47 }
 0x5dd   : > { %v7504_v46 = vadd.f32 %v4653_v30, %v7498_v33  ;;  %3759 = vadd.xlane.f32.xlu0 %v7501_v13 }
 0x5df   : > { %3761 = vadd.xlane.f32.xlu1 %v7504_v46 }
 0x5e2   : > { %v4654_v4 = vpop.f32.mrb[68].mxu1 }
 0x5e3   : > { %v4655_v25 = vpop.f32.mrb[69].mxu1 }
 0x5e4   : > { %v4656_v57 = vadd.f32 %v4655_v25, %v4654_v4  ;;  %v4657_v49 = vpop.f32.mrb[70].mxu1 }
 0x5e5   : > { %v4658_v28 = vpop.f32.mrb[71].mxu1 }
 0x5e6   : > { %v7509_v21 = vadd.f32 %v4656_v57, %v7498_v33  ;;  %v4659_v22 = vadd.f32 %v4658_v28, %v4657_v49 }
 0x5e8   : > { %v7512_v43 = vadd.f32 %v4659_v22, %v7498_v33  ;;  %3763 = vadd.xlane.f32.xlu0 %v7509_v21 }
 0x5ea   : > { %3765 = vadd.xlane.f32.xlu1 %v7512_v43 }
 0x5ec   : > { %v4660_v24 = vpop.f32.mrb[72].mxu1 }
 0x5ed   : > { %v4661_v59 = vpop.f32.mrb[73].mxu1 }
 0x5ee   : > { %v4662_v36 = vadd.f32 %v4661_v59, %v4660_v24  ;;  %v4663_v26 = vpop.f32.mrb[74].mxu1 }
 0x5ef   : > { %v4664_v37 = vpop.f32.mrb[75].mxu1 }
 0x5f0   : > { %v7517_v1 = vadd.f32 %v4662_v36, %v7498_v33  ;;  %v4665_v40 = vadd.f32 %v4664_v37, %v4663_v26 }
 0x5f2   : > { %v7520_v27 = vadd.f32 %v4665_v40, %v7498_v33  ;;  %3767 = vadd.xlane.f32.xlu0 %v7517_v1 }
 0x5f4   : > { %3769 = vadd.xlane.f32.xlu1 %v7520_v27 }
 0x5f5   : > { %v4666_v50 = vpop.f32.mrb[76].mxu1 }
 0x5f6   : > { %v4667_v15 = vpop.f32.mrb[77].mxu1 }
 0x5f7   : > { %v4668_v23 = vadd.f32 %v4667_v15, %v4666_v50  ;;  %v4669_v62 = vpop.f32.mrb[78].mxu1 }
 0x5f8   : > { %v4670_v20 = vpop.f32.mrb[79].mxu1 }
 0x5f9   : > { %v7525_v61 = vadd.f32 %v4668_v23, %v7498_v33  ;;  %v4671_v3 = vadd.f32 %v4670_v20, %v4669_v62 }
 0x5fb   : > { %v7528_v17 = vadd.f32 %v4671_v3, %v7498_v33  ;;  %3771 = vadd.xlane.f32.xlu0 %v7525_v61 }
 0x5fd   : > { %3773 = vadd.xlane.f32.xlu1 %v7528_v17  ;;  %v4672_v5 = vpop.f32.mrb[80].mxu1 }
 0x5fe   : > { %v4673_v60 = vpop.f32.mrb[81].mxu1 }
 0x5ff   : > { %v4674_v2 = vadd.f32 %v4673_v60, %v4672_v5  ;;  %v4675_v63 = vpop.f32.mrb[82].mxu1 }
 0x600   : > { %v4676_v38 = vpop.f32.mrb[83].mxu1 }
 0x601   : > { %v7533_v34 = vadd.f32 %v4674_v2, %v7498_v33  ;;  %v4677_v41 = vadd.f32 %v4676_v38, %v4675_v63 }
 0x603   : > { %v7536_v29 = vadd.f32 %v4677_v41, %v7498_v33  ;;  %3775 = vadd.xlane.f32.xlu0 %v7533_v34 }
 0x605   : > { %3777 = vadd.xlane.f32.xlu1 %v7536_v29  ;;  %v4678_v52 = vpop.f32.mrb[84].mxu1 }
 0x606   : > { %v4679_v48 = vpop.f32.mrb[85].mxu1 }
 0x607   : > { %v4680_v14 = vadd.f32 %v4679_v48, %v4678_v52  ;;  %v4681_v32 = vpop.f32.mrb[86].mxu1 }
 0x608   : > { %v4682_v10 = vpop.f32.mrb[87].mxu1 }
 0x609   : > { %v7541_v56 = vadd.f32 %v4680_v14, %v7498_v33  ;;  %v4683_v51 = vadd.f32 %v4682_v10, %v4681_v32 }
 0x60b   : > { %v7544_v19 = vadd.f32 %v4683_v51, %v7498_v33  ;;  %3779 = vadd.xlane.f32.xlu0 %v7541_v56 }
 0x60d   : > { %3781 = vadd.xlane.f32.xlu1 %v7544_v19  ;;  %v4684_v58 = vpop.f32.mrb[88].mxu1 }
 0x60e   : > { %v4685_v16 = vpop.f32.mrb[89].mxu1 }
 0x60f   : > { %v4686_v53 = vadd.f32 %v4685_v16, %v4684_v58  ;;  %v4687_v8 = vpop.f32.mrb[90].mxu1 }
 0x610   : > { %v4688_v45 = vpop.f32.mrb[91].mxu1 }
 0x611   : > { %v7549_v12 = vadd.f32 %v4686_v53, %v7498_v33  ;;  %v4689_v55 = vadd.f32 %v4688_v45, %v4687_v8 }
 0x613   : > { %v7552_v0 = vadd.f32 %v4689_v55, %v7498_v33  ;;  %3783 = vadd.xlane.f32.xlu0 %v7549_v12 }
 0x615   : > { %3785 = vadd.xlane.f32.xlu1 %v7552_v0  ;;  %v4690_v31 = vpop.f32.mrb[92].mxu1 }
 0x616   : > { %v4691_v42 = vpop.f32.mrb[93].mxu1 }
 0x617   : > { %v4692_v7 = vadd.f32 %v4691_v42, %v4690_v31  ;;  %v4693_v6 = vpop.f32.mrb[94].mxu1 }
 0x618   : > { %v4694_v35 = vpop.f32.mrb[95].mxu1 }
 0x619   : > { %v7557_v18 = vadd.f32 %v4692_v7, %v7498_v33  ;;  %v4695_v9 = vadd.f32 %v4694_v35, %v4693_v6 }
 0x61b   : > { %v7560_v44 = vadd.f32 %v4695_v9, %v7498_v33  ;;  %3787 = vadd.xlane.f32.xlu0 %v7557_v18 }
 0x61d   : > { %3789 = vadd.xlane.f32.xlu1 %v7560_v44  ;;  %v4696_v11 = vpop.f32.mrb[96].mxu1 }
 0x61e   : > { %v4697_v47 = vpop.f32.mrb[97].mxu1 }
 0x61f   : > { %v4698_v54 = vadd.f32 %v4697_v47, %v4696_v11  ;;  %v4699_v30 = vpop.f32.mrb[98].mxu1 }
 0x620   : > { %v4700_v4 = vpop.f32.mrb[99].mxu1 }
 0x621   : > { %v7565_v25 = vadd.f32 %v4698_v54, %v7498_v33  ;;  %v4701_v57 = vadd.f32 %v4700_v4, %v4699_v30 }
 0x623   : > { %v7568_v49 = vadd.f32 %v4701_v57, %v7498_v33  ;;  %3791 = vadd.xlane.f32.xlu0 %v7565_v25 }
 0x625   : > { %3793 = vadd.xlane.f32.xlu1 %v7568_v49  ;;  %v4702_v28 = vpop.f32.mrb[100].mxu1 }
 0x626   : > { %v4703_v22 = vpop.f32.mrb[101].mxu1 }
 0x627   : > { %v4704_v24 = vadd.f32 %v4703_v22, %v4702_v28  ;;  %v4705_v59 = vpop.f32.mrb[102].mxu1 }
 0x628   : > { %v4706_v36 = vpop.f32.mrb[103].mxu1 }
 0x629   : > { %v7573_v26 = vadd.f32 %v4704_v24, %v7498_v33  ;;  %v4707_v37 = vadd.f32 %v4706_v36, %v4705_v59 }
 0x62b   : > { %v7576_v40 = vadd.f32 %v4707_v37, %v7498_v33  ;;  %3795 = vadd.xlane.f32.xlu0 %v7573_v26 }
 0x62d   : > { %3797 = vadd.xlane.f32.xlu1 %v7576_v40  ;;  %v4708_v50 = vpop.f32.mrb[104].mxu1 }
 0x62e   : > { %v4709_v15 = vpop.f32.mrb[105].mxu1 }
 0x62f   : > { %v4710_v23 = vadd.f32 %v4709_v15, %v4708_v50  ;;  %v4711_v62 = vpop.f32.mrb[106].mxu1 }
 0x630   : > { %v4712_v20 = vpop.f32.mrb[107].mxu1 }
 0x631   : > { %v7581_v3 = vadd.f32 %v4710_v23, %v7498_v33  ;;  %v4713_v5 = vadd.f32 %v4712_v20, %v4711_v62 }
 0x633   : > { %v7584_v60 = vadd.f32 %v4713_v5, %v7498_v33  ;;  %3799 = vadd.xlane.f32.xlu0 %v7581_v3 }
 0x635   : > { %3801 = vadd.xlane.f32.xlu1 %v7584_v60 }
 0x66a   : > { %v3760_v59 = vpop.xlane.xlu0 %3759 }
 0x66b   : > { %v3824_v50 = vmul.f32 0.0078125, %v3760_v59 }
 0x66c   : > { %v3762_v37 = vpop.xlane.xlu1 %3761 }
 0x66d   : > { %v3825_v20 = vmul.f32 0.0078125, %v3762_v37 }
 0x672   : > { %v4714_v2 = vpop.f32.mrb[108].mxu1 }
 0x673   : > { %v4715_v63 = vpop.f32.mrb[109].mxu1 }
 0x674   : > { %v4716_v38 = vadd.f32 %v4715_v63, %v4714_v2  ;;  %v4717_v41 = vpop.f32.mrb[110].mxu1 }
 0x675   : > { %v4718_v52 = vpop.f32.mrb[111].mxu1  ;;  %v3764_v23 = vpop.xlane.xlu0 %3763 }
 0x676   : > { %v7589_v48 = vadd.f32 %v4716_v38, %v7498_v33  ;;  %v4719_v14 = vadd.f32 %v4718_v52, %v4717_v41  ;;  %v7621_v41 = vsub.f32 %v7501_v13, %v3824_v50  ;;  %v3826_v52 = vmul.f32 0.0078125, %v3764_v23 }
 0x677   : > { %v3766_v63 = vpop.xlane.xlu1 %3765 }
 0x678   : > { %v7592_v32 = vadd.f32 %v4719_v14, %v7498_v33  ;;  %3803 = vadd.xlane.f32.xlu0 %v7589_v48 }
 0x67a   : > { %3805 = vadd.xlane.f32.xlu1 %v7592_v32 }
 0x67b   : > { %v4720_v10 = vpop.f32.mrb[112].mxu1 }
 0x67c   : > { %v4721_v51 = vpop.f32.mrb[113].mxu1 }
 0x67d   : > { %v4722_v58 = vadd.f32 %v4721_v51, %v4720_v10  ;;  %v4723_v16 = vpop.f32.mrb[114].mxu1 }
 0x67e   : > { %v4724_v53 = vpop.f32.mrb[115].mxu1 }
 0x67f   : > { %v7597_v8 = vadd.f32 %v4722_v58, %v7498_v33  ;;  %v4725_v45 = vadd.f32 %v4724_v53, %v4723_v16  ;;  %v3768_v51 = vpop.xlane.xlu0 %3767  ;;  %v7627_v58 = vsub.f32 %v7504_v46, %v3825_v20  ;;  %v3827_v16 = vmul.f32 0.0078125, %v3766_v63 }
 0x680   : > { %v3828_v13 = vmul.f32 0.0078125, %v3768_v51 }
 0x681   : > { %v7600_v55 = vadd.f32 %v4725_v45, %v7498_v33  ;;  %3807 = vadd.xlane.f32.xlu0 %v7597_v8  ;;  %v3770_v45 = vpop.xlane.xlu1 %3769  ;;  %v7640_v46 = vsub.f32 %v7512_v43, %v3827_v16 }
 0x683   : > { %3809 = vadd.xlane.f32.xlu1 %v7600_v55 }
 0x684   : > { %v4726_v31 = vpop.f32.mrb[116].mxu1 }
 0x685   : > { %v4727_v42 = vpop.f32.mrb[117].mxu1 }
 0x686   : > { %v4728_v7 = vadd.f32 %v4727_v42, %v4726_v31  ;;  %v4729_v6 = vpop.f32.mrb[118].mxu1  ;;  %v7634_v31 = vsub.f32 %v7509_v21, %v3826_v52  ;;  %v3888_v42 = vmul.f32 %v7621_v41, %v7621_v41 }
 0x687   : > { %v4730_v35 = vpop.f32.mrb[119].mxu1 }
 0x688   : > { %v7605_v9 = vadd.f32 %v4728_v7, %v7498_v33  ;;  %v4731_v11 = vadd.f32 %v4730_v35, %v4729_v6  ;;  %v3772_v7 = vpop.xlane.xlu0 %3771  ;;  %v3829_v6 = vmul.f32 0.0078125, %v3770_v45 }
 0x689   : > { %v3830_v21 = vmul.f32 0.0078125, %v3772_v7 }
 0x68a   : > { %v7608_v47 = vadd.f32 %v4731_v11, %v7498_v33  ;;  %3811 = vadd.xlane.f32.xlu0 %v7605_v9  ;;  %v3774_v35 = vpop.xlane.xlu1 %3773  ;;  %v7645_v11 = vsub.f32 %v7517_v1, %v3828_v13 }
 0x68b   : > { %v3831_v43 = vmul.f32 0.0078125, %v3774_v35 }
 0x68c   : > { %3813 = vadd.xlane.f32.xlu1 %v7608_v47  ;;  %v3892_v59 = vmul.f32 %v7645_v11, %v7645_v11 }
 0x68d   : > { %v4732_v54 = vpop.f32.mrb[120].mxu1  ;;  %v7660_v50 = vsub.f32 %v7528_v17, %v3831_v43 }
 0x68e   : > { %v4733_v30 = vpop.f32.mrb[121].mxu1 }
 0x68f   : > { %v4734_v4 = vadd.f32 %v4733_v30, %v4732_v54  ;;  %v4735_v57 = vpop.f32.mrb[122].mxu1  ;;  %v3890_v54 = vmul.f32 %v7634_v31, %v7634_v31  ;;  %v3895_v63 = vmul.f32 %v7660_v50, %v7660_v50 }
 0x690   : > { %v4736_v28 = vpop.f32.mrb[123].mxu1  ;;  %v3776_v30 = vpop.xlane.xlu0 %3775 }
 0x691   : > { %v7613_v22 = vadd.f32 %v4734_v4, %v7498_v33  ;;  %v4737_v24 = vadd.f32 %v4736_v28, %v4735_v57  ;;  %v7650_v4 = vsub.f32 %v7520_v27, %v3829_v6  ;;  %v3891_v57 = vmul.f32 %v7640_v46, %v7640_v46 }
 0x692   : > { %v3778_v28 = vpop.xlane.xlu1 %3777  ;;  %v3832_v1 = vmul.f32 0.0078125, %v3776_v30 }
 0x693   : > { %v7616_v36 = vadd.f32 %v4737_v24, %v7498_v33  ;;  %3815 = vadd.xlane.f32.xlu0 %v7613_v22  ;;  %v7655_v24 = vsub.f32 %v7525_v61, %v3830_v21  ;;  %v3833_v27 = vmul.f32 0.0078125, %v3778_v28 }
 0x695   : > { %3817 = vadd.xlane.f32.xlu1 %v7616_v36  ;;  %v4738_v15 = vpop.f32.mrb[124].mxu1  ;;  %v3894_v20 = vmul.f32 %v7655_v24, %v7655_v24 }
 0x696   : > { %v4739_v62 = vpop.f32.mrb[125].mxu1 }
 0x697   : > { %v4740_v5 = vadd.f32 %v4739_v62, %v4738_v15  ;;  %v4741_v2 = vpop.f32.mrb[126].mxu1  ;;  %v3893_v15 = vmul.f32 %v7650_v4, %v7650_v4  ;;  %v7665_v62 = vsub.f32 %v7533_v34, %v3832_v1 }
 0x698   : > { %v4742_v38 = vpop.f32.mrb[127].mxu1  ;;  %v3780_v37 = vpop.xlane.xlu0 %3779 }
 0x699   : > { %v7624_v14 = vadd.f32 %v4740_v5, %v7498_v33  ;;  %v4743_v10 = vadd.f32 %v4742_v38, %v4741_v2  ;;  %v3834_v61 = vmul.f32 0.0078125, %v3780_v37  ;;  %v7670_v2 = vsub.f32 %v7536_v29, %v3833_v27 }
 0x69a   : > { %v3782_v23 = vpop.xlane.xlu1 %3781 }
 0x69b   : > { %v7630_v53 = vadd.f32 %v4743_v10, %v7498_v33  ;;  %3819 = vadd.xlane.f32.xlu0 %v7624_v14  ;;  %v3889_v33 = vmul.f32 %v7627_v58, %v7627_v58  ;;  %v3835_v17 = vmul.f32 0.0078125, %v3782_v23  ;;  %v7675_v52 = vsub.f32 %v7541_v56, %v3834_v61 }
 0x69c   : > { %v3896_v10 = vmul.f32 %v7665_v62, %v7665_v62  ;;  %v3897_v45 = vmul.f32 %v7670_v2, %v7670_v2 }
 0x69d   : > { %3821 = vadd.xlane.f32.xlu1 %v7630_v53  ;;  %v7680_v16 = vsub.f32 %v7544_v19, %v3835_v17  ;;  %v3898_v7 = vmul.f32 %v7675_v52, %v7675_v52 }
 0x69f   : > { %3920 = vadd.xlane.f32.xlu0 %v3888_v42  ;;  %v3899_v35 = vmul.f32 %v7680_v16, %v7680_v16 }
 0x6a0   : > { %v3784_v5 = vpop.xlane.xlu0 %3783 }
 0x6a1   : > { %3922 = vadd.xlane.f32.xlu1 %v3889_v33  ;;  %v3836_v34 = vmul.f32 0.0078125, %v3784_v5 }
 0x6a2   : > { %v3786_v38 = vpop.xlane.xlu1 %3785 }
 0x6a3   : > { %3924 = vadd.xlane.f32.xlu0 %v3890_v54  ;;  %v3837_v29 = vmul.f32 0.0078125, %v3786_v38  ;;  %v7685_v42 = vsub.f32 %v7549_v12, %v3836_v34 }
 0x6a5   : > { %3926 = vadd.xlane.f32.xlu1 %v3891_v57  ;;  %v7690_v33 = vsub.f32 %v7552_v0, %v3837_v29  ;;  %v3900_v30 = vmul.f32 %v7685_v42, %v7685_v42 }
 0x6a7   : > { %3928 = vadd.xlane.f32.xlu0 %v3892_v59  ;;  %v3901_v0 = vmul.f32 %v7690_v33, %v7690_v33 }
 0x6a8   : > { %v3788_v51 = vpop.xlane.xlu0 %3787 }
 0x6a9   : > { %3930 = vadd.xlane.f32.xlu1 %v3893_v15  ;;  %v3838_v56 = vmul.f32 0.0078125, %v3788_v51 }
 0x6aa   : > { %v3790_v13 = vpop.xlane.xlu1 %3789 }
 0x6ab   : > { %3932 = vadd.xlane.f32.xlu0 %v3894_v20  ;;  %v3839_v19 = vmul.f32 0.0078125, %v3790_v13  ;;  %v7695_v54 = vsub.f32 %v7557_v18, %v3838_v56 }
 0x6ad   : > { %3934 = vadd.xlane.f32.xlu1 %v3895_v63  ;;  %v7700_v43 = vsub.f32 %v7560_v44, %v3839_v19  ;;  %v3902_v18 = vmul.f32 %v7695_v54, %v7695_v54 }
 0x6af   : > { %3936 = vadd.xlane.f32.xlu0 %v3896_v10  ;;  %v3903_v44 = vmul.f32 %v7700_v43, %v7700_v43 }
 0x6b0   : > { %v3792_v6 = vpop.xlane.xlu0 %3791 }
 0x6b1   : > { %3938 = vadd.xlane.f32.xlu1 %v3897_v45  ;;  %v3840_v12 = vmul.f32 0.0078125, %v3792_v6 }
 0x6b2   : > { %v3794_v21 = vpop.xlane.xlu1 %3793 }
 0x6b3   : > { %3940 = vadd.xlane.f32.xlu0 %v3898_v7  ;;  %v3841_v57 = vmul.f32 0.0078125, %v3794_v21  ;;  %v7705_v28 = vsub.f32 %v7565_v25, %v3840_v12 }
 0x6b5   : > { %3942 = vadd.xlane.f32.xlu1 %v3899_v35  ;;  %v7710_v37 = vsub.f32 %v7568_v49, %v3841_v57  ;;  %v3904_v25 = vmul.f32 %v7705_v28, %v7705_v28 }
 0x6b7   : > { %3944 = vadd.xlane.f32.xlu0 %v3900_v30  ;;  %v3905_v49 = vmul.f32 %v7710_v37, %v7710_v37 }
 0x6b8   : > { %v3796_v1 = vpop.xlane.xlu0 %3795 }
 0x6b9   : > { %3946 = vadd.xlane.f32.xlu1 %v3901_v0  ;;  %v3842_v59 = vmul.f32 0.0078125, %v3796_v1 }
 0x6ba   : > { %v3798_v27 = vpop.xlane.xlu1 %3797 }
 0x6bb   : > { %3948 = vadd.xlane.f32.xlu0 %v3902_v18  ;;  %v3843_v15 = vmul.f32 0.0078125, %v3798_v27  ;;  %v7715_v23 = vsub.f32 %v7573_v26, %v3842_v59 }
 0x6bd   : > { %3950 = vadd.xlane.f32.xlu1 %v3903_v44  ;;  %v7720_v61 = vsub.f32 %v7576_v40, %v3843_v15  ;;  %v3906_v5 = vmul.f32 %v7715_v23, %v7715_v23 }
 0x6bf   : > { %3952 = vadd.xlane.f32.xlu0 %v3904_v25  ;;  %v3907_v26 = vmul.f32 %v7720_v61, %v7720_v61 }
 0x6c0   : > { %v3800_v20 = vpop.xlane.xlu0 %3799 }
 0x6c1   : > { %3954 = vadd.xlane.f32.xlu1 %v3905_v49  ;;  %v3844_v17 = vmul.f32 0.0078125, %v3800_v20 }
 0x6c2   : > { %v3802_v63 = vpop.xlane.xlu1 %3801 }
 0x6c3   : > { %3956 = vadd.xlane.f32.xlu0 %v3906_v5  ;;  %v7729_v38 = vsub.f32 %v7581_v3, %v3844_v17  ;;  %v3845_v40 = vmul.f32 0.0078125, %v3802_v63 }
 0x6c5   : > { %3958 = vadd.xlane.f32.xlu1 %v3907_v26  ;;  %v7732_v34 = vsub.f32 %v7584_v60, %v3845_v40  ;;  %v3908_v10 = vmul.f32 %v7729_v38, %v7729_v38 }
 0x6c7   : > { %3960 = vadd.xlane.f32.xlu0 %v3908_v10  ;;  %v3909_v51 = vmul.f32 %v7732_v34, %v7732_v34 }
 0x6c9   : > { %3962 = vadd.xlane.f32.xlu1 %v3909_v51 }
 0x705   : > { %v3804_v29 = vpop.xlane.xlu0 %3803 }
 0x706   : > { %v3846_v45 = vmul.f32 0.0078125, %v3804_v29 }
 0x707   : > { %v3806_v13 = vpop.xlane.xlu1 %3805 }
 0x708   : > { %v7739_v56 = vsub.f32 %v7589_v48, %v3846_v45  ;;  %v3847_v3 = vmul.f32 0.0078125, %v3806_v13 }
 0x70a   : > { %v7742_v7 = vsub.f32 %v7592_v32, %v3847_v3  ;;  %v3910_v60 = vmul.f32 %v7739_v56, %v7739_v56 }
 0x70c   : > { %3964 = vadd.xlane.f32.xlu0 %v3910_v60  ;;  %v3911_v6 = vmul.f32 %v7742_v7, %v7742_v7 }
 0x70e   : > { %v3808_v19 = vpop.xlane.xlu0 %3807  ;;  %3966 = vadd.xlane.f32.xlu1 %v3911_v6 }
 0x70f   : > { %v3848_v35 = vmul.f32 0.0078125, %v3808_v19 }
 0x710   : > { %v3810_v21 = vpop.xlane.xlu1 %3809 }
 0x711   : > { %v7749_v12 = vsub.f32 %v7597_v8, %v3848_v35  ;;  %v3849_v48 = vmul.f32 0.0078125, %v3810_v21 }
 0x713   : > { %v7752_v30 = vsub.f32 %v7600_v55, %v3849_v48  ;;  %v3912_v32 = vmul.f32 %v7749_v12, %v7749_v12 }
 0x715   : > { %3968 = vadd.xlane.f32.xlu0 %v3912_v32  ;;  %v3913_v57 = vmul.f32 %v7752_v30, %v7752_v30 }
 0x717   : > { %3970 = vadd.xlane.f32.xlu1 %v3913_v57  ;;  %v3812_v0 = vpop.xlane.xlu0 %3811 }
 0x718   : > { %v3850_v1 = vmul.f32 0.0078125, %v3812_v0 }
 0x719   : > { %v3814_v18 = vpop.xlane.xlu1 %3813 }
 0x71a   : > { %v7759_v59 = vsub.f32 %v7605_v9, %v3850_v1  ;;  %v3851_v8 = vmul.f32 0.0078125, %v3814_v18 }
 0x71c   : > { %v7762_v27 = vsub.f32 %v7608_v47, %v3851_v8  ;;  %v3914_v55 = vmul.f32 %v7759_v59, %v7759_v59 }
 0x71e   : > { %3972 = vadd.xlane.f32.xlu0 %v3914_v55  ;;  %v3915_v44 = vmul.f32 %v7762_v27, %v7762_v27 }
 0x720   : > { %v3816_v15 = vpop.xlane.xlu0 %3815  ;;  %3974 = vadd.xlane.f32.xlu1 %v3915_v44 }
 0x721   : > { %v3852_v25 = vmul.f32 0.0078125, %v3816_v15 }
 0x722   : > { %v3818_v49 = vpop.xlane.xlu1 %3817 }
 0x723   : > { %v7769_v20 = vsub.f32 %v7613_v22, %v3852_v25  ;;  %v3853_v9 = vmul.f32 0.0078125, %v3818_v49  ;;  %v8273_v49 = vld [vmem:[#allocation25_spill] sm:$0xff] }
 0x725   : > { %v7772_v5 = vsub.f32 %v7616_v36, %v3853_v9  ;;  %v3916_v47 = vmul.f32 %v7769_v20, %v7769_v20  ;;  %v7790_v9 = vrot.slane %v7494_v39, %v8273_v49 }
 0x727   : > { %3976 = vadd.xlane.f32.xlu0 %v3916_v47  ;;  %v3917_v17 = vmul.f32 %v7772_v5, %v7772_v5 }
 0x728   : > { %v3820_v63 = vpop.xlane.xlu0 %3819 }
 0x729   : > { %v3854_v26 = vmul.f32 0.0078125, %v3820_v63  ;;  %3978 = vadd.xlane.f32.xlu1 %v3917_v17 }
 0x72a   : > { %v3822_v40 = vpop.xlane.xlu1 %3821 }
 0x72b   : > { %v7779_v10 = vsub.f32 %v7624_v14, %v3854_v26  ;;  %v3855_v22 = vmul.f32 0.0078125, %v3822_v40 }
 0x72c   : > { %v3921_v51 = vpop.xlane.xlu0 %3920 }
 0x72d   : > { %v7782_v29 = vsub.f32 %v7630_v53, %v3855_v22  ;;  %v3984_v36 = vmul.f32 0.0078125, %v3921_v51  ;;  %v3918_v45 = vmul.f32 %v7779_v10, %v7779_v10  ;;  %v8274_v22 = vld [vmem:[#allocation28_spill] sm:$0xff] }
 0x72e   : > { %v3923_v13 = vpop.xlane.xlu1 %3922  ;;  %v7795_v51 = vrot.slane %v7494_v39, %v8274_v22 }
 0x72f   : > { %v4016_v3 = vadd.f32 1e-05, %v3984_v36  ;;  %v3985_v60 = vmul.f32 0.0078125, %v3923_v13  ;;  %3980 = vadd.xlane.f32.xlu0 %v3918_v45  ;;  %v3919_v6 = vmul.f32 %v7782_v29, %v7782_v29 }
 0x730   : > { %v3925_v19 = vpop.xlane.xlu0 %3924 }
 0x731   : > { %5264 = vrsqrt.f32 %v4016_v3  ;;  %v4017_v14 = vadd.f32 1e-05, %v3985_v60  ;;  %v3986_v35 = vmul.f32 0.0078125, %v3925_v19  ;;  %3982 = vadd.xlane.f32.xlu1 %v3919_v6 }
 0x732   : > { %v3927_v21 = vpop.xlane.xlu1 %3926 }
 0x733   : > { %5266 = vrsqrt.f32 %v4017_v14  ;;  %v4018_v53 = vadd.f32 1e-05, %v3986_v35  ;;  %v3987_v48 = vmul.f32 0.0078125, %v3927_v21 }
 0x734   : > { %v3929_v32 = vpop.xlane.xlu0 %3928 }
 0x735   : > { %5268 = vrsqrt.f32 %v4018_v53  ;;  %v4019_v57 = vadd.f32 1e-05, %v3987_v48  ;;  %v3988_v0 = vmul.f32 0.0078125, %v3929_v32 }
 0x736   : > { %v3931_v1 = vpop.xlane.xlu1 %3930 }
 0x737   : > { %5270 = vrsqrt.f32 %v4019_v57  ;;  %v4020_v18 = vadd.f32 1e-05, %v3988_v0  ;;  %v3989_v8 = vmul.f32 0.0078125, %v3931_v1  ;;  %v7805_v0 = vld [vmem:[%s8043_s7] ss:$0 sm:$0xff] }
 0x738   : > { %v3933_v55 = vpop.xlane.xlu0 %3932 }
 0x739   : > { %5272 = vrsqrt.f32 %v4020_v18  ;;  %v4021_v44 = vadd.f32 1e-05, %v3989_v8  ;;  %v3990_v15 = vmul.f32 0.0078125, %v3933_v55 }
 0x73a   : > { %v3935_v25 = vpop.xlane.xlu1 %3934 }
 0x73b   : > { %v5265_v47 = vpop.eup %5264  ;;  %5274 = vrsqrt.f32 %v4021_v44  ;;  %v4022_v17 = vadd.f32 1e-05, %v3990_v15  ;;  %v3991_v63 = vmul.f32 0.0078125, %v3935_v25 }
 0x73c   : > { %v3937_v26 = vpop.xlane.xlu0 %3936  ;;  %v4080_v40 = vmul.f32 %v5265_v47, %v7621_v41 }
 0x73d   : > { %v5267_v36 = vpop.eup %5266  ;;  %5276 = vrsqrt.f32 %v4022_v17  ;;  %v4023_v45 = vadd.f32 1e-05, %v3991_v63  ;;  %v3992_v13 = vmul.f32 0.0078125, %v3937_v26 }
 0x73e   : > { %v3939_v3 = vpop.xlane.xlu1 %3938  ;;  %v4116_v60 = vmul.f32 %v7790_v9, %v4080_v40  ;;  %v4081_v6 = vmul.f32 %v5267_v36, %v7627_v58 }
 0x73f   : > { %v5269_v19 = vpop.eup %5268  ;;  %5278 = vrsqrt.f32 %v4023_v45  ;;  %v4024_v14 = vadd.f32 1e-05, %v3992_v13  ;;  %v3993_v35 = vmul.f32 0.0078125, %v3939_v3 }
 0x740   : > { %v3941_v21 = vpop.xlane.xlu0 %3940  ;;  %v4152_v41 = vadd.f32 %v7795_v51, %v4116_v60  ;;  %v4117_v53 = vmul.f32 %v7790_v9, %v4081_v6  ;;  %v4082_v39 = vmul.f32 %v5269_v19, %v7634_v31 }
 0x741   : > { %v5271_v48 = vpop.eup %5270  ;;  %5280 = vrsqrt.f32 %v4024_v14  ;;  %v4025_v32 = vadd.f32 1e-05, %v3993_v35  ;;  %v3994_v57 = vmul.f32 0.0078125, %v3941_v21 }
 0x742   : > { %v3943_v58 = vpop.xlane.xlu1 %3942  ;;  %v4184_v1 = vmax.f32 %v4152_v41, 0.0  ;;  %v4153_v18 = vadd.f32 %v7795_v51, %v4117_v53  ;;  %v4118_v8 = vmul.f32 %v7790_v9, %v4082_v39  ;;  %v4083_v55 = vmul.f32 %v5271_v48, %v7640_v46 }
 0x743   : > { %v5273_v44 = vpop.eup %5272  ;;  %5282 = vrsqrt.f32 %v4025_v32  ;;  %v4026_v31 = vadd.f32 1e-05, %v3994_v57  ;;  %v3995_v15 = vmul.f32 0.0078125, %v3943_v58 }
 0x744   : > { %v3945_v25 = vpop.xlane.xlu0 %3944  ;;  %v4223_v49 = vmul.f32 %v7805_v0, %v4184_v1  ;;  %v4185_v47 = vmax.f32 %v4153_v18, 0.0  ;;  %v4154_v17 = vadd.f32 %v7795_v51, %v4118_v8  ;;  %v4119_v63 = vmul.f32 %v7790_v9, %v4083_v55 }
 0x745   : > { %v5275_v26 = vpop.eup %5274  ;;  %5284 = vrsqrt.f32 %v4026_v31  ;;  %v4027_v40 = vadd.f32 1e-05, %v3995_v15  ;;  %v3996_v22 = vmul.f32 0.0078125, %v3945_v25  ;;  %v4084_v36 = vmul.f32 %v5273_v44, %v7645_v11 }
 0x746   : > { %v3947_v45 = vpop.xlane.xlu1 %3946  ;;  %4255 = vadd.xlane.f32.xlu0 %v4223_v49  ;;  %v4224_v46 = vmul.f32 %v7805_v0, %v4185_v47  ;;  %v4186_v13 = vmax.f32 %v4154_v17, 0.0  ;;  %v4155_v3 = vadd.f32 %v7795_v51, %v4119_v63  ;;  %v4085_v60 = vmul.f32 %v5275_v26, %v7650_v4 }
 0x747   : > { %v5277_v6 = vpop.eup %5276  ;;  %5286 = vrsqrt.f32 %v4027_v40  ;;  %v4028_v19 = vadd.f32 1e-05, %v3996_v22  ;;  %v3997_v14 = vmul.f32 0.0078125, %v3947_v45  ;;  %v4120_v35 = vmul.f32 %v7790_v9, %v4084_v36 }
 0x748   : > { %4257 = vadd.xlane.f32.xlu1 %v4224_v46  ;;  %v3949_v21 = vpop.xlane.xlu0 %3948  ;;  %v4225_v41 = vmul.f32 %v7805_v0, %v4186_v13  ;;  %v4187_v11 = vmax.f32 %v4155_v3, 0.0  ;;  %v4121_v53 = vmul.f32 %v7790_v9, %v4085_v60  ;;  %v4086_v39 = vmul.f32 %v5277_v6, %v7655_v24 }
 0x749   : > { %v5279_v48 = vpop.eup %5278  ;;  %5288 = vrsqrt.f32 %v4028_v19  ;;  %v4029_v32 = vadd.f32 1e-05, %v3997_v14  ;;  %v3998_v57 = vmul.f32 0.0078125, %v3949_v21  ;;  %v4156_v4 = vadd.f32 %v7795_v51, %v4120_v35 }
 0x74a   : > { %v3951_v58 = vpop.xlane.xlu1 %3950  ;;  %4259 = vadd.xlane.f32.xlu0 %v4225_v41  ;;  %v4226_v1 = vmul.f32 %v7805_v0, %v4187_v11  ;;  %v4157_v18 = vadd.f32 %v7795_v51, %v4121_v53  ;;  %v4122_v8 = vmul.f32 %v7790_v9, %v4086_v39  ;;  %v4087_v55 = vmul.f32 %v5279_v48, %v7660_v50 }
 0x74b   : > { %v5281_v44 = vpop.eup %5280  ;;  %5290 = vrsqrt.f32 %v4029_v32  ;;  %v4030_v31 = vadd.f32 1e-05, %v3998_v57  ;;  %v3999_v24 = vmul.f32 0.0078125, %v3951_v58  ;;  %v4188_v15 = vmax.f32 %v4156_v4, 0.0 }
 0x74c   : > { %4261 = vadd.xlane.f32.xlu1 %v4226_v1  ;;  %v3953_v25 = vpop.xlane.xlu0 %3952  ;;  %v4189_v49 = vmax.f32 %v4157_v18, 0.0  ;;  %v4158_v47 = vadd.f32 %v7795_v51, %v4122_v8  ;;  %v4123_v17 = vmul.f32 %v7790_v9, %v4087_v55  ;;  %v4088_v63 = vmul.f32 %v5281_v44, %v7665_v62 }
 0x74d   : > { %v5283_v26 = vpop.eup %5282  ;;  %5292 = vrsqrt.f32 %v4030_v31  ;;  %v4031_v40 = vadd.f32 1e-05, %v3999_v24  ;;  %v4000_v22 = vmul.f32 0.0078125, %v3953_v25  ;;  %v4227_v50 = vmul.f32 %v7805_v0, %v4188_v15 }
 0x74e   : > { %v3955_v36 = vpop.xlane.xlu1 %3954  ;;  %v4228_v45 = vmul.f32 %v7805_v0, %v4189_v49  ;;  %v4190_v46 = vmax.f32 %v4158_v47, 0.0  ;;  %v4159_v13 = vadd.f32 %v7795_v51, %v4123_v17  ;;  %v4124_v3 = vmul.f32 %v7790_v9, %v4088_v63 }
 0x74f   : > { %v5285_v60 = vpop.eup %5284  ;;  %5294 = vrsqrt.f32 %v4031_v40  ;;  %v4032_v6 = vadd.f32 1e-05, %v4000_v22  ;;  %v4001_v19 = vmul.f32 0.0078125, %v3955_v36  ;;  %4263 = vadd.xlane.f32.xlu0 %v4227_v50  ;;  %v4089_v62 = vmul.f32 %v5283_v26, %v7670_v2 }
 0x750   : > { %4265 = vadd.xlane.f32.xlu1 %v4228_v45  ;;  %v3957_v14 = vpop.xlane.xlu0 %3956  ;;  %v4229_v35 = vmul.f32 %v7805_v0, %v4190_v46  ;;  %v4191_v21 = vmax.f32 %v4159_v13, 0.0  ;;  %v4160_v41 = vadd.f32 %v7795_v51, %v4124_v3  ;;  %v4090_v11 = vmul.f32 %v5285_v60, %v7675_v52 }
 0x751   : > { %v5287_v53 = vpop.eup %5286  ;;  %5296 = vrsqrt.f32 %v4032_v6  ;;  %v4033_v39 = vadd.f32 1e-05, %v4001_v19  ;;  %v4002_v48 = vmul.f32 0.0078125, %v3957_v14  ;;  %v4125_v32 = vmul.f32 %v7790_v9, %v4089_v62 }
 0x752   : > { %v3959_v57 = vpop.xlane.xlu1 %3958  ;;  %v4230_v4 = vmul.f32 %v7805_v0, %v4191_v21  ;;  %v4192_v58 = vmax.f32 %v4160_v41, 0.0  ;;  %v4126_v2 = vmul.f32 %v7790_v9, %v4090_v11  ;;  %v4091_v1 = vmul.f32 %v5287_v53, %v7680_v16 }
 0x753   : > { %v5289_v18 = vpop.eup %5288  ;;  %5298 = vrsqrt.f32 %v4033_v39  ;;  %v4034_v8 = vadd.f32 1e-05, %v4002_v48  ;;  %v4003_v55 = vmul.f32 0.0078125, %v3959_v57  ;;  %4267 = vadd.xlane.f32.xlu0 %v4229_v35  ;;  %v4161_v52 = vadd.f32 %v7795_v51, %v4125_v32 }
 0x754   : > { %4269 = vadd.xlane.f32.xlu1 %v4230_v4  ;;  %v4231_v44 = vmul.f32 %v7805_v0, %v4192_v58  ;;  %v4162_v31 = vadd.f32 %v7795_v51, %v4126_v2  ;;  %v4127_v24 = vmul.f32 %v7790_v9, %v4091_v1  ;;  %v4092_v15 = vmul.f32 %v5289_v18, %v7685_v42  ;;  %v3961_v16 = vpop.xlane.xlu0 %3960 }
 0x755   : > { %v5291_v25 = vpop.eup %5290  ;;  %5300 = vrsqrt.f32 %v4034_v8  ;;  %v4035_v49 = vadd.f32 1e-05, %v4003_v55  ;;  %v4193_v47 = vmax.f32 %v4161_v52, 0.0  ;;  %v4004_v17 = vmul.f32 0.0078125, %v3961_v16 }
 0x756   : > { %v4194_v63 = vmax.f32 %v4162_v31, 0.0  ;;  %v4163_v26 = vadd.f32 %v7795_v51, %v4127_v24  ;;  %v4128_v40 = vmul.f32 %v7790_v9, %v4092_v15  ;;  %v3963_v50 = vpop.xlane.xlu1 %3962  ;;  %v4093_v45 = vmul.f32 %v5291_v25, %v7690_v33 }
 0x757   : > { %v5293_v22 = vpop.eup %5292  ;;  %5302 = vrsqrt.f32 %v4035_v49  ;;  %4271 = vadd.xlane.f32.xlu0 %v4231_v44  ;;  %v4232_v36 = vmul.f32 %v7805_v0, %v4193_v47  ;;  %v4036_v42 = vadd.f32 1e-05, %v4004_v17  ;;  %v4005_v46 = vmul.f32 0.0078125, %v3963_v50 }
 0x758   : > { %v4233_v13 = vmul.f32 %v7805_v0, %v4194_v63  ;;  %v4195_v3 = vmax.f32 %v4163_v26, 0.0  ;;  %v4164_v6 = vadd.f32 %v7795_v51, %v4128_v40  ;;  %v4129_v19 = vmul.f32 %v7790_v9, %v4093_v45 }
 0x759   : > { %v5295_v60 = vpop.eup %5294  ;;  %4273 = vadd.xlane.f32.xlu1 %v4232_v36  ;;  %v4094_v62 = vmul.f32 %v5293_v22, %v7695_v54  ;;  %5304 = vrsqrt.f32 %v4036_v42  ;;  %v4037_v14 = vadd.f32 1e-05, %v4005_v46 }
 0x75a   : > { %v4234_v35 = vmul.f32 %v7805_v0, %v4195_v3  ;;  %v4095_v21 = vmul.f32 %v5295_v60, %v7700_v43  ;;  %v4196_v41 = vmax.f32 %v4164_v6, 0.0  ;;  %v4165_v11 = vadd.f32 %v7795_v51, %v4129_v19 }
 0x75b   : > { %v5297_v33 = vpop.eup %5296  ;;  %4275 = vadd.xlane.f32.xlu0 %v4233_v13  ;;  %v4130_v53 = vmul.f32 %v7790_v9, %v4094_v62  ;;  %5306 = vrsqrt.f32 %v4037_v14 }
 0x75c   : > { %v4131_v39 = vmul.f32 %v7790_v9, %v4095_v21  ;;  %v4096_v48 = vmul.f32 %v5297_v33, %v7705_v28  ;;  %v4235_v54 = vmul.f32 %v7805_v0, %v4196_v41  ;;  %v4197_v57 = vmax.f32 %v4165_v11, 0.0 }
 0x75d   : > { %v5299_v32 = vpop.eup %5298  ;;  %4277 = vadd.xlane.f32.xlu1 %v4234_v35  ;;  %v4166_v4 = vadd.f32 %v7795_v51, %v4130_v53 }
 0x75e   : > { %v4167_v43 = vadd.f32 %v7795_v51, %v4131_v39  ;;  %v4132_v58 = vmul.f32 %v7790_v9, %v4096_v48  ;;  %v4097_v2 = vmul.f32 %v5299_v32, %v7710_v37  ;;  %v4236_v18 = vmul.f32 %v7805_v0, %v4197_v57 }
 0x75f   : > { %v5301_v1 = vpop.eup %5300  ;;  %4279 = vadd.xlane.f32.xlu0 %v4235_v54  ;;  %v4198_v8 = vmax.f32 %v4166_v4, 0.0 }
 0x760   : > { %v4199_v55 = vmax.f32 %v4167_v43, 0.0  ;;  %v4168_v28 = vadd.f32 %v7795_v51, %v4132_v58  ;;  %v4133_v52 = vmul.f32 %v7790_v9, %v4097_v2  ;;  %v4098_v44 = vmul.f32 %v5301_v1, %v7715_v23 }
 0x761   : > { %v5303_v31 = vpop.eup %5302  ;;  %4281 = vadd.xlane.f32.xlu1 %v4236_v18  ;;  %v4237_v24 = vmul.f32 %v7805_v0, %v4198_v8 }
 0x762   : > { %v4238_v15 = vmul.f32 %v7805_v0, %v4199_v55  ;;  %v4200_v25 = vmax.f32 %v4168_v28, 0.0  ;;  %v4169_v37 = vadd.f32 %v7795_v51, %v4133_v52  ;;  %v4134_v49 = vmul.f32 %v7790_v9, %v4098_v44 }
 0x763   : > { %4283 = vadd.xlane.f32.xlu0 %v4237_v24  ;;  %v4099_v16 = vmul.f32 %v5303_v31, %v7720_v61  ;;  %v5305_v47 = vpop.eup %5304 }
 0x764   : > { %v4239_v17 = vmul.f32 %v7805_v0, %v4200_v25  ;;  %v4201_v63 = vmax.f32 %v4169_v37, 0.0  ;;  %v4170_v23 = vadd.f32 %v7795_v51, %v4134_v49  ;;  %v4100_v40 = vmul.f32 %v5305_v47, %v7729_v38 }
 0x765   : > { %4285 = vadd.xlane.f32.xlu1 %v4238_v15  ;;  %v4135_v26 = vmul.f32 %v7790_v9, %v4099_v16  ;;  %v5307_v22 = vpop.eup %5306 }
 0x766   : > { %v4240_v50 = vmul.f32 %v7805_v0, %v4201_v63  ;;  %v4202_v36 = vmax.f32 %v4170_v23, 0.0  ;;  %v4136_v61 = vmul.f32 %v7790_v9, %v4100_v40  ;;  %v4101_v42 = vmul.f32 %v5307_v22, %v7732_v34 }
 0x767   : > { %4287 = vadd.xlane.f32.xlu0 %v4239_v17  ;;  %v4171_v45 = vadd.f32 %v7795_v51, %v4135_v26 }
 0x768   : > { %v4241_v46 = vmul.f32 %v7805_v0, %v4202_v36  ;;  %v4172_v3 = vadd.f32 %v7795_v51, %v4136_v61  ;;  %v4137_v60 = vmul.f32 %v7790_v9, %v4101_v42 }
 0x769   : > { %4289 = vadd.xlane.f32.xlu1 %v4240_v50  ;;  %v4203_v13 = vmax.f32 %v4171_v45, 0.0 }
 0x76a   : > { %v4204_v6 = vmax.f32 %v4172_v3, 0.0  ;;  %v4173_v19 = vadd.f32 %v7795_v51, %v4137_v60 }
 0x76b   : > { %4291 = vadd.xlane.f32.xlu0 %v4241_v46  ;;  %v4242_v38 = vmul.f32 %v7805_v0, %v4203_v13 }
 0x76c   : > { %v4243_v62 = vmul.f32 %v7805_v0, %v4204_v6  ;;  %v4205_v14 = vmax.f32 %v4173_v19, 0.0 }
 0x76d   : > { %4293 = vadd.xlane.f32.xlu1 %v4242_v38 }
 0x76e   : > { %v4244_v34 = vmul.f32 %v7805_v0, %v4205_v14 }
 0x76f   : > { %4295 = vadd.xlane.f32.xlu0 %v4243_v62 }
 0x771   : > { %4297 = vadd.xlane.f32.xlu1 %v4244_v34 }
 0x799   : > { %v3965_v35 = vpop.xlane.xlu0 %3964 }
 0x79a   : > { %v4006_v21 = vmul.f32 0.0078125, %v3965_v35 }
 0x79b   : > { %v3967_v33 = vpop.xlane.xlu1 %3966 }
 0x79c   : > { %v4038_v41 = vadd.f32 1e-05, %v4006_v21  ;;  %v4007_v11 = vmul.f32 0.0078125, %v3967_v33 }
 0x79e   : > { %5308 = vrsqrt.f32 %v4038_v41  ;;  %v4039_v53 = vadd.f32 1e-05, %v4007_v11 }
 0x7a0   : > { %5310 = vrsqrt.f32 %v4039_v53 }
 0x7a2   : > { %v3969_v39 = vpop.xlane.xlu0 %3968 }
 0x7a3   : > { %v4008_v48 = vmul.f32 0.0078125, %v3969_v39 }
 0x7a4   : > { %v3971_v32 = vpop.xlane.xlu1 %3970 }
 0x7a5   : > { %v4040_v54 = vadd.f32 1e-05, %v4008_v48  ;;  %v4009_v57 = vmul.f32 0.0078125, %v3971_v32 }
 0x7a7   : > { %5312 = vrsqrt.f32 %v4040_v54  ;;  %v4041_v4 = vadd.f32 1e-05, %v4009_v57 }
 0x7a8   : > { %v5309_v43 = vpop.eup %5308 }
 0x7a9   : > { %5314 = vrsqrt.f32 %v4041_v4  ;;  %v4102_v58 = vmul.f32 %v5309_v43, %v7739_v56 }
 0x7aa   : > { %v5311_v2 = vpop.eup %5310 }
 0x7ab   : > { %v4138_v1 = vmul.f32 %v7790_v9, %v4102_v58  ;;  %v4103_v18 = vmul.f32 %v5311_v2, %v7742_v7  ;;  %v3973_v8 = vpop.xlane.xlu0 %3972 }
 0x7ac   : > { %v4010_v55 = vmul.f32 0.0078125, %v3973_v8 }
 0x7ad   : > { %v4174_v28 = vadd.f32 %v7795_v51, %v4138_v1  ;;  %v4139_v52 = vmul.f32 %v7790_v9, %v4103_v18  ;;  %v3975_v44 = vpop.xlane.xlu1 %3974 }
 0x7ae   : > { %v4042_v31 = vadd.f32 1e-05, %v4010_v55  ;;  %v4011_v24 = vmul.f32 0.0078125, %v3975_v44 }
 0x7af   : > { %v4206_v15 = vmax.f32 %v4174_v28, 0.0  ;;  %v4175_v25 = vadd.f32 %v7795_v51, %v4139_v52 }
 0x7b0   : > { %5316 = vrsqrt.f32 %v4042_v31  ;;  %v4043_v56 = vadd.f32 1e-05, %v4011_v24 }
 0x7b1   : > { %v5313_v37 = vpop.eup %5312  ;;  %v4245_v49 = vmul.f32 %v7805_v0, %v4206_v15  ;;  %v4207_v16 = vmax.f32 %v4175_v25, 0.0 }
 0x7b2   : > { %v4104_v7 = vmul.f32 %v5313_v37, %v7749_v12  ;;  %5318 = vrsqrt.f32 %v4043_v56  ;;  %v7927_v37 = vstv %s4319_s13 }
 0x7b3   : > { %v5315_v47 = vpop.eup %5314  ;;  %4299 = vadd.xlane.f32.xlu0 %v4245_v49  ;;  %v4246_v17 = vmul.f32 %v7805_v0, %v4207_v16 }
 0x7b4   : > { %v3977_v63 = vpop.xlane.xlu0 %3976  ;;  %v4140_v23 = vmul.f32 %v7790_v9, %v4104_v7  ;;  %v4105_v26 = vmul.f32 %v5315_v47, %v7752_v30 }
 0x7b5   : > { %v4012_v40 = vmul.f32 0.0078125, %v3977_v63  ;;  %4301 = vadd.xlane.f32.xlu1 %v4246_v17 }
 0x7b6   : > { %v3979_v22 = vpop.xlane.xlu1 %3978  ;;  %v4176_v50 = vadd.f32 %v7795_v51, %v4140_v23  ;;  %v4141_v36 = vmul.f32 %v7790_v9, %v4105_v26 }
 0x7b7   : > { %v4044_v45 = vadd.f32 1e-05, %v4012_v40  ;;  %v4013_v61 = vmul.f32 0.0078125, %v3979_v22 }
 0x7b8   : > { %v4208_v12 = vmax.f32 %v4176_v50, 0.0  ;;  %v4177_v42 = vadd.f32 %v7795_v51, %v4141_v36 }
 0x7b9   : > { %5320 = vrsqrt.f32 %v4044_v45  ;;  %v4045_v46 = vadd.f32 1e-05, %v4013_v61 }
 0x7ba   : > { %v4247_v13 = vmul.f32 %v7805_v0, %v4208_v12  ;;  %v4209_v3 = vmax.f32 %v4177_v42, 0.0  ;;  %v5317_v60 = vpop.eup %5316 }
 0x7bb   : > { %5322 = vrsqrt.f32 %v4045_v46  ;;  %v4106_v6 = vmul.f32 %v5317_v60, %v7759_v59 }
 0x7bc   : > { %v3981_v30 = vpop.xlane.xlu0 %3980  ;;  %4303 = vadd.xlane.f32.xlu0 %v4247_v13  ;;  %v4248_v38 = vmul.f32 %v7805_v0, %v4209_v3  ;;  %v5319_v19 = vpop.eup %5318 }
 0x7bd   : > { %v4014_v62 = vmul.f32 0.0078125, %v3981_v30  ;;  %v4142_v34 = vmul.f32 %v7790_v9, %v4106_v6  ;;  %v4107_v35 = vmul.f32 %v5319_v19, %v7762_v27 }
 0x7be   : > { %v3983_v14 = vpop.xlane.xlu1 %3982  ;;  %4305 = vadd.xlane.f32.xlu1 %v4248_v38 }
 0x7bf   : > { %v4046_v21 = vadd.f32 1e-05, %v4014_v62  ;;  %v4015_v33 = vmul.f32 0.0078125, %v3983_v14  ;;  %v4178_v41 = vadd.f32 %v7795_v51, %v4142_v34  ;;  %v4143_v11 = vmul.f32 %v7790_v9, %v4107_v35 }
 0x7c1   : > { %5324 = vrsqrt.f32 %v4046_v21  ;;  %v4047_v53 = vadd.f32 1e-05, %v4015_v33  ;;  %v4210_v39 = vmax.f32 %v4178_v41, 0.0  ;;  %v4179_v48 = vadd.f32 %v7795_v51, %v4143_v11 }
 0x7c3   : > { %v5321_v59 = vpop.eup %5320  ;;  %5326 = vrsqrt.f32 %v4047_v53  ;;  %v4249_v32 = vmul.f32 %v7805_v0, %v4210_v39  ;;  %v4211_v54 = vmax.f32 %v4179_v48, 0.0 }
 0x7c4   : > { %v4108_v57 = vmul.f32 %v5321_v59, %v7769_v20 }
 0x7c5   : > { %v5323_v4 = vpop.eup %5322  ;;  %4307 = vadd.xlane.f32.xlu0 %v4249_v32  ;;  %v4250_v27 = vmul.f32 %v7805_v0, %v4211_v54 }
 0x7c6   : > { %v4144_v43 = vmul.f32 %v7790_v9, %v4108_v57  ;;  %v4109_v58 = vmul.f32 %v5323_v4, %v7772_v5 }
 0x7c7   : > { %4309 = vadd.xlane.f32.xlu1 %v4250_v27 }
 0x7c8   : > { %v4180_v2 = vadd.f32 %v7795_v51, %v4144_v43  ;;  %v4145_v1 = vmul.f32 %v7790_v9, %v4109_v58 }
 0x7ca   : > { %v4212_v18 = vmax.f32 %v4180_v2, 0.0  ;;  %v4181_v8 = vadd.f32 %v7795_v51, %v4145_v1 }
 0x7cb   : > { %v5325_v55 = vpop.eup %5324 }
 0x7cc   : > { %v4251_v20 = vmul.f32 %v7805_v0, %v4212_v18  ;;  %v4213_v28 = vmax.f32 %v4181_v8, 0.0  ;;  %v4110_v52 = vmul.f32 %v5325_v55, %v7779_v10 }
 0x7cd   : > { %v5327_v44 = vpop.eup %5326 }
 0x7ce   : > { %4311 = vadd.xlane.f32.xlu0 %v4251_v20  ;;  %v4252_v5 = vmul.f32 %v7805_v0, %v4213_v28  ;;  %v4146_v31 = vmul.f32 %v7790_v9, %v4110_v52  ;;  %v4111_v24 = vmul.f32 %v5327_v44, %v7782_v29 }
 0x7d0   : > { %4313 = vadd.xlane.f32.xlu1 %v4252_v5  ;;  %v4182_v15 = vadd.f32 %v7795_v51, %v4146_v31  ;;  %v4147_v25 = vmul.f32 %v7790_v9, %v4111_v24 }
 0x7d2   : > { %v4214_v56 = vmax.f32 %v4182_v15, 0.0  ;;  %v4183_v49 = vadd.f32 %v7795_v51, %v4147_v25 }
 0x7d3   : > { %v4256_v10 = vpop.xlane.xlu0 %4255 }
 0x7d4   : > { %v4321_v29 = vadd.f32 %v7927_v37, %v4256_v10  ;;  %v4253_v9 = vmul.f32 %v7805_v0, %v4214_v56  ;;  %v4215_v16 = vmax.f32 %v4183_v49, 0.0 }
 0x7d5   : > { %v4258_v7 = vpop.xlane.xlu1 %4257 }
 0x7d6   : > { %4354 = vst.msk [vmem:[%s7933_s16] sm:$0xff] %vm4353_vm0, %v4321_v29  ;;  %v4322_v51 = vadd.f32 %v7927_v37, %v4258_v7  ;;  %4315 = vadd.xlane.f32.xlu0 %v4253_v9  ;;  %v4254_v47 = vmul.f32 %v7805_v0, %v4215_v16 }
 0x7d7   : > { %v4260_v17 = vpop.xlane.xlu0 %4259 }
 0x7d8   : > { %4355 = vst.msk [vmem:[%s7933_s16 + $0x8] sm:$0xff] %vm4353_vm0, %v4322_v51  ;;  %v4323_v63 = vadd.f32 %v7927_v37, %v4260_v17  ;;  %4317 = vadd.xlane.f32.xlu1 %v4254_v47 }
 0x7d9   : > { %v4262_v23 = vpop.xlane.xlu1 %4261 }
 0x7da   : > { %4356 = vst.msk [vmem:[%s7933_s16 + $0x10] sm:$0xff] %vm4353_vm0, %v4323_v63  ;;  %v4324_v26 = vadd.f32 %v7927_v37, %v4262_v23 }
 0x7dc   : > { %4357 = vst.msk [vmem:[%s7933_s16 + $0x18] sm:$0xff] %vm4353_vm0, %v4324_v26  ;;  %v4264_v40 = vpop.xlane.xlu0 %4263 }
 0x7dd   : > { %v4325_v22 = vadd.f32 %v7927_v37, %v4264_v40  ;;  %v4266_v0 = vpop.xlane.xlu1 %4265 }
 0x7de   : > { %v4326_v50 = vadd.f32 %v7927_v37, %v4266_v0 }
 0x7df   : > { %4358 = vst.msk [vmem:[%s7933_s16 + $0x20] sm:$0xff] %vm4353_vm0, %v4325_v22 }
 0x7e0   : > { %4359 = vst.msk [vmem:[%s7933_s16 + $0x28] sm:$0xff] %vm4353_vm0, %v4326_v50  ;;  %v4268_v36 = vpop.xlane.xlu0 %4267 }
 0x7e1   : > { %v4327_v45 = vadd.f32 %v7927_v37, %v4268_v36  ;;  %v4270_v61 = vpop.xlane.xlu1 %4269 }
 0x7e2   : > { %v4328_v12 = vadd.f32 %v7927_v37, %v4270_v61 }
 0x7e3   : > { %4360 = vst.msk [vmem:[%s7933_s16 + $0x30] sm:$0xff] %vm4353_vm0, %v4327_v45 }
 0x7e4   : > { %4361 = vst.msk [vmem:[%s7933_s16 + $0x38] sm:$0xff] %vm4353_vm0, %v4328_v12  ;;  %v4272_v42 = vpop.xlane.xlu0 %4271 }
 0x7e5   : > { %v4329_v46 = vadd.f32 %v7927_v37, %v4272_v42 }
 0x7e6   : > { %v4274_v13 = vpop.xlane.xlu1 %4273 }
 0x7e7   : > { %4362 = vst.msk [vmem:[%s7933_s16 + $0x40] sm:$0xff] %vm4353_vm0, %v4329_v46  ;;  %v4330_v3 = vadd.f32 %v7927_v37, %v4274_v13 }
 0x7e8   : > { %v4276_v60 = vpop.xlane.xlu0 %4275 }
 0x7e9   : > { %4363 = vst.msk [vmem:[%s7933_s16 + $0x48] sm:$0xff] %vm4353_vm0, %v4330_v3  ;;  %v4331_v30 = vadd.f32 %v7927_v37, %v4276_v60 }
 0x7ea   : > { %v4278_v38 = vpop.xlane.xlu1 %4277 }
 0x7eb   : > { %4364 = vst.msk [vmem:[%s7933_s16 + $0x50] sm:$0xff] %vm4353_vm0, %v4331_v30  ;;  %v4332_v6 = vadd.f32 %v7927_v37, %v4278_v38 }
 0x7ec   : > { %v4280_v19 = vpop.xlane.xlu0 %4279 }
 0x7ed   : > { %4365 = vst.msk [vmem:[%s7933_s16 + $0x58] sm:$0xff] %vm4353_vm0, %v4332_v6  ;;  %v4333_v62 = vadd.f32 %v7927_v37, %v4280_v19 }
 0x7ee   : > { %v4282_v14 = vpop.xlane.xlu1 %4281 }
 0x7ef   : > { %4366 = vst.msk [vmem:[%s7933_s16 + $0x60] sm:$0xff] %vm4353_vm0, %v4333_v62  ;;  %v4334_v34 = vadd.f32 %v7927_v37, %v4282_v14 }
 0x7f0   : > { %v4284_v35 = vpop.xlane.xlu0 %4283 }
 0x7f1   : > { %4367 = vst.msk [vmem:[%s7933_s16 + $0x68] sm:$0xff] %vm4353_vm0, %v4334_v34  ;;  %v4335_v21 = vadd.f32 %v7927_v37, %v4284_v35 }
 0x7f2   : > { %v4286_v33 = vpop.xlane.xlu1 %4285 }
 0x7f3   : > { %4368 = vst.msk [vmem:[%s7933_s16 + $0x70] sm:$0xff] %vm4353_vm0, %v4335_v21  ;;  %v4336_v41 = vadd.f32 %v7927_v37, %v4286_v33 }
 0x7f4   : > { %v4288_v11 = vpop.xlane.xlu0 %4287 }
 0x7f5   : > { %4369 = vst.msk [vmem:[%s7933_s16 + $0x78] sm:$0xff] %vm4353_vm0, %v4336_v41  ;;  %v4337_v53 = vadd.f32 %v7927_v37, %v4288_v11 }
 0x7f6   : > { %v4290_v39 = vpop.xlane.xlu1 %4289 }
 0x7f7   : > { %4370 = vst.msk [vmem:[%s7933_s16 + $0x80] sm:$0xff] %vm4353_vm0, %v4337_v53  ;;  %v4338_v48 = vadd.f32 %v7927_v37, %v4290_v39 }
 0x7f8   : > { %v4292_v59 = vpop.xlane.xlu0 %4291 }
 0x7f9   : > { %4371 = vst.msk [vmem:[%s7933_s16 + $0x88] sm:$0xff] %vm4353_vm0, %v4338_v48  ;;  %v4339_v32 = vadd.f32 %v7927_v37, %v4292_v59 }
 0x7fa   : > { %v4294_v54 = vpop.xlane.xlu1 %4293 }
 0x7fb   : > { %4372 = vst.msk [vmem:[%s7933_s16 + $0x90] sm:$0xff] %vm4353_vm0, %v4339_v32  ;;  %v4340_v57 = vadd.f32 %v7927_v37, %v4294_v54 }
 0x7fc   : > { %v4296_v4 = vpop.xlane.xlu0 %4295 }
 0x7fd   : > { %4373 = vst.msk [vmem:[%s7933_s16 + $0x98] sm:$0xff] %vm4353_vm0, %v4340_v57  ;;  %v4341_v27 = vadd.f32 %v7927_v37, %v4296_v4 }
 0x7fe   : > { %v4298_v43 = vpop.xlane.xlu1 %4297 }
 0x7ff   : > { %4374 = vst.msk [vmem:[%s7933_s16 + $0xa0] sm:$0xff] %vm4353_vm0, %v4341_v27  ;;  %v4342_v58 = vadd.f32 %v7927_v37, %v4298_v43 }
 0x801   : > { %4375 = vst.msk [vmem:[%s7933_s16 + $0xa8] sm:$0xff] %vm4353_vm0, %v4342_v58 }
 0x840   : > { %v4300_v2 = vpop.xlane.xlu0 %4299 }
 0x841   : > { %v4343_v1 = vadd.f32 %v7927_v37, %v4300_v2 }
 0x842   : > { %v4302_v18 = vpop.xlane.xlu1 %4301 }
 0x843   : > { %4376 = vst.msk [vmem:[%s7933_s16 + $0xb0] sm:$0xff] %vm4353_vm0, %v4343_v1  ;;  %v4344_v8 = vadd.f32 %v7927_v37, %v4302_v18 }
 0x845   : > { %4377 = vst.msk [vmem:[%s7933_s16 + $0xb8] sm:$0xff] %vm4353_vm0, %v4344_v8 }
 0x849   : > { %v4304_v55 = vpop.xlane.xlu0 %4303 }
 0x84a   : > { %v4345_v20 = vadd.f32 %v7927_v37, %v4304_v55 }
 0x84b   : > { %v4306_v28 = vpop.xlane.xlu1 %4305 }
 0x84c   : > { %4378 = vst.msk [vmem:[%s7933_s16 + $0xc0] sm:$0xff] %vm4353_vm0, %v4345_v20  ;;  %v4346_v52 = vadd.f32 %v7927_v37, %v4306_v28 }
 0x84e   : > { %4379 = vst.msk [vmem:[%s7933_s16 + $0xc8] sm:$0xff] %vm4353_vm0, %v4346_v52 }
 0x852   : > { %v4308_v44 = vpop.xlane.xlu0 %4307 }
 0x853   : > { %v4347_v5 = vadd.f32 %v7927_v37, %v4308_v44 }
 0x854   : > { %v4310_v31 = vpop.xlane.xlu1 %4309 }
 0x855   : > { %4380 = vst.msk [vmem:[%s7933_s16 + $0xd0] sm:$0xff] %vm4353_vm0, %v4347_v5  ;;  %v4348_v24 = vadd.f32 %v7927_v37, %v4310_v31 }
 0x857   : > { %4381 = vst.msk [vmem:[%s7933_s16 + $0xd8] sm:$0xff] %vm4353_vm0, %v4348_v24 }
 0x85b   : > { %v4312_v15 = vpop.xlane.xlu0 %4311 }
 0x85c   : > { %v4349_v25 = vadd.f32 %v7927_v37, %v4312_v15 }
 0x85d   : > { %v4314_v56 = vpop.xlane.xlu1 %4313 }
 0x85e   : > { %4382 = vst.msk [vmem:[%s7933_s16 + $0xe0] sm:$0xff] %vm4353_vm0, %v4349_v25  ;;  %v4350_v49 = vadd.f32 %v7927_v37, %v4314_v56 }
 0x860   : > { %4383 = vst.msk [vmem:[%s7933_s16 + $0xe8] sm:$0xff] %vm4353_vm0, %v4350_v49 }
 0x863   : > { %v4316_v10 = vpop.xlane.xlu0 %4315 }
 0x864   : > { %v4351_v29 = vadd.f32 %v7927_v37, %v4316_v10 }
 0x865   : > { %v4318_v9 = vpop.xlane.xlu1 %4317 }
 0x866   : > { %4384 = vst.msk [vmem:[%s7933_s16 + $0xf0] sm:$0xff] %vm4353_vm0, %v4351_v29  ;;  %v4352_v16 = vadd.f32 %v7927_v37, %v4318_v9 }
 0x868   : > { %4385 = vst.msk [vmem:[%s7933_s16 + $0xf8] sm:$0xff] %vm4353_vm0, %v4352_v16 }
 0x869 PF: > { %s20_s11 = sadd.s32 1, %s5334_s11  }
 0x86a   : > { %p17_p4 = scmp.ge.s32.totalorder %s20_s11, 4  }
 0x86c   :  { %19 = sbr.rel (!%p17_p4) target bundleno = 2 (0x2), region = 86 }

</bundles_post_ra>
